<compile_context>
chip_gen: v6e
topology: v6e:2x2x1
jax: 0.10.0
libtpu: 0.0.40
codegen_flags: <defaults>
</compile_context>

<pallas_src>
import jax
import jax.numpy as jnp
from jax.experimental import pallas as pl
from jax.experimental.pallas import tpu as pltpu


def _round_up(x, m):
    return (x + m - 1) // m * m


def _vmem_capacity_bytes():
    """Per-TensorCore VMEM capacity; conservative default if the query fails."""
    try:
        info = pltpu.get_tpu_info()
        cap = getattr(info, "vmem_capacity_bytes", None)
        if cap:
            return int(cap)
    except Exception:
        pass
    return 64 << 20  # v7x per-TC size (smallest of current generations)


# ----------------------------- kernels --------------------------------------

def _linear_kernel_single_k(x_ref, wt_ref, b_ref, out_ref):
    # Full-K strip (common case): no scratch accumulator, no init/finalize.
    out_ref[...] = (
        jnp.dot(x_ref[...], wt_ref[...], preferred_element_type=jnp.float32)
        + b_ref[...].astype(jnp.float32)
    ).astype(out_ref.dtype)


def _linear_kernel_multi_k(x_ref, wt_ref, b_ref, out_ref, acc_ref):
    # x_ref: (tm, tk)  wt_ref: (tk, tn)  b_ref: (1, tn)
    # out_ref: (tm, tn)  acc_ref: f32 (tm, tn) scratch
    k = pl.program_id(2)

    @pl.when(k == 0)
    def _():
        # Seed the accumulator with the broadcast bias: removes the epilogue add.
        acc_ref[...] = jnp.broadcast_to(
            b_ref[...].astype(jnp.float32), acc_ref.shape)

    acc_ref[...] += jnp.dot(
        x_ref[...], wt_ref[...], preferred_element_type=jnp.float32)

    @pl.when(k == pl.num_programs(2) - 1)
    def _():
        out_ref[...] = acc_ref[...].astype(out_ref.dtype)


# ----------------------------- forward --------------------------------------

def classifier_forward(x, wt, bias, *, tm_max=512, tn_max=512, tk_max=2048,
                       allow_fallback=True):
    """y = x @ W^T + bias for nn.Linear(inputs, class_num).

    `wt` is the PRE-TRANSPOSED weight of shape (inputs, class_num), optionally
    already zero-padded up to 128-multiples in both dims (init_classifier_params
    does this once at init).  `bias` keeps its logical length class_num, which
    is how the forward recovers the true output width.
    """
    orig_shape = x.shape
    K = int(orig_shape[-1])
    N = int(bias.shape[0])
    K_w, N_w = wt.shape
    k128 = _round_up(K, 128)
    n128 = _round_up(N, 128)
    if not (K <= K_w <= k128 and N <= N_w <= n128):
        raise ValueError(
            f"weight shape {wt.shape} inconsistent with inputs={K}, class_num={N}")

    x2d = x.reshape(-1, K)
    M = x2d.shape[0]
    out_dtype = x.dtype

    # ---- tiny problems: pallas_call fixed cost dwarfs the matmul -----------
    if allow_fallback and 2 * M * K * N < (1 << 21):
        y = jnp.dot(x2d, wt[:K, :N].astype(x2d.dtype),
                    preferred_element_type=jnp.float32)
        y = (y + bias.astype(jnp.float32)).astype(out_dtype)
        return y.reshape(*orig_shape[:-1], N)

    compute_dtype = wt.dtype
    if x2d.dtype != compute_dtype:
        x2d = x2d.astype(compute_dtype)
    isz = jnp.dtype(compute_dtype).itemsize
    out_isz = jnp.dtype(out_dtype).itemsize
    sublane = {4: 8, 2: 16, 1: 32}.get(isz, 8)

    # ---- tile selection -----------------------------------------------------
    tm_max = max(_round_up(tm_max, sublane), sublane)
    tk_max = max(tk_max, 128)
    m_pad0 = _round_up(max(M, 1), sublane)
    if m_pad0 <= tm_max:
        tm, M_pad = m_pad0, m_pad0
    else:
        tm = tm_max
        M_pad = _round_up(M, tm)

    # N / K tiles are 128-multiples that DIVIDE the padded extents, so a
    # weight pre-padded at init is never re-padded per call.
    N_pad, K_pad = n128, k128

    def _largest_tile(total, cap):
        units = total // 128
        best = 1
        for d in range(1, units + 1):
            if units % d == 0 and d * 128 <= cap:
                best = d
        return best * 128

    tn = _largest_tile(N_pad, tn_max)

    # v7x has 2 TensorCores: ensure the "parallel" axes give both some work.
    if (M_pad // tm) * (N_pad // tn) == 1:
        if tn % 256 == 0:
            tn //= 2                       # prefer re-streaming x (small) ...
        elif tm % (2 * sublane) == 0:
            tm //= 2                       # ... over re-streaming the weight

    vcap = _vmem_capacity_bytes()
    budget = vcap * 3 // 4                  # ~96 MiB v5e/v6e, ~48 MiB v7x

    bias_isz = jnp.dtype(bias.dtype).itemsize

    def _vmem_need(tk, multi_k):
        need = 2 * (tm * tk + tk * tn) * isz        # double-buffered inputs
        need += 2 * 8 * tn * bias_isz               # bias tile (sublane-padded)
        need += 2 * tm * tn * out_isz               # double-buffered output
        if multi_k:
            need += tm * tn * 4                     # f32 accumulator scratch
        return need

    units_k = K_pad // 128
    tk = 128
    for d in range(1, units_k + 1):
        if units_k % d:
            continue
        cand = d * 128
        if cand > tk_max:
            continue
        if _vmem_need(cand, cand < K_pad) <= budget:
            tk = max(tk, cand)
    multi_k = tk < K_pad

    vmem_need = _vmem_need(tk, multi_k)
    vmem_limit = int(min(budget, max(2 * vmem_need, 16 << 20)))

    # ---- pad operands (weight pad is a no-op when pre-padded at init) -------
    if (M_pad, K_pad) != (M, K):
        x2d = jnp.pad(x2d, ((0, M_pad - M), (0, K_pad - K)))
    wt_p = wt
    if (K_w, N_w) != (K_pad, N_pad):
        wt_p = jnp.pad(wt, ((0, K_pad - K_w), (0, N_pad - N_w)))
    b2d = bias.reshape(1, N)
    if N_pad != N:
        b2d = jnp.pad(b2d, ((0, 0), (0, N_pad - N)))

    if not multi_k:
        # Full-K strip: 2-D grid, no accumulator revisits, no scratch.
        grid = (M_pad // tm, N_pad // tn)
        out = pl.pallas_call(
            _linear_kernel_single_k,
            out_shape=jax.ShapeDtypeStruct((M_pad, N_pad), out_dtype),
            grid_spec=pltpu.PrefetchScalarGridSpec(
                num_scalar_prefetch=0,
                grid=grid,
                in_specs=[
                    pl.BlockSpec((tm, K_pad), lambda i, j: (i, 0)),
                    # TODO(synk): sweep pipeline_mode=pl.Buffered(3) on the
                    # weight spec for small-M, weight-stream-bound shapes.
                    pl.BlockSpec((K_pad, tn), lambda i, j: (0, j)),
                    pl.BlockSpec((1, tn), lambda i, j: (0, j)),
                ],
                out_specs=pl.BlockSpec((tm, tn), lambda i, j: (i, j)),
            ),
            compiler_params=pltpu.CompilerParams(
                dimension_semantics=("parallel", "parallel"),
                vmem_limit_bytes=vmem_limit,
            ),
        )(x2d, wt_p, b2d)
    else:
        grid = (M_pad // tm, N_pad // tn, K_pad // tk)
        out = pl.pallas_call(
            _linear_kernel_multi_k,
            out_shape=jax.ShapeDtypeStruct((M_pad, N_pad), out_dtype),
            grid_spec=pltpu.PrefetchScalarGridSpec(
                num_scalar_prefetch=0,
                grid=grid,
                in_specs=[
                    pl.BlockSpec((tm, tk), lambda i, j, k: (i, k)),
                    pl.BlockSpec((tk, tn), lambda i, j, k: (k, j)),
                    pl.BlockSpec((1, tn), lambda i, j, k: (0, j)),
                ],
                out_specs=pl.BlockSpec((tm, tn), lambda i, j, k: (i, j)),
                scratch_shapes=[pltpu.VMEM((tm, tn), jnp.float32)],
            ),
            compiler_params=pltpu.CompilerParams(
                dimension_semantics=("parallel", "parallel", "arbitrary"),
                vmem_limit_bytes=vmem_limit,
            ),
        )(x2d, wt_p, b2d)

    out = out[:M, :N]
    return out.reshape(*orig_shape[:-1], N)


def init_classifier_params(key, inputs, class_num, dtype=jnp.float32):
    """Matches nn.Linear init: weight ~ N(0, 0.01), bias = 0.

    The weight is returned PRE-TRANSPOSED and PRE-PADDED to
    (round_up(inputs, 128), round_up(class_num, 128)) so the forward pass
    never transposes or pads the weight in HBM per call.  The bias keeps its
    logical length class_num.  Pass dtype=jnp.bfloat16 to halve the weight
    HBM stream and use the bf16 MXU path (f32 accumulation is kept).
    """
    w = 0.01 * jax.random.normal(key, (class_num, inputs), dtype=jnp.float32)
    wt = w.T.astype(dtype)
    k_pad = _round_up(inputs, 128)
    n_pad = _round_up(class_num, 128)
    if (k_pad, n_pad) != (inputs, class_num):
        wt = jnp.pad(wt, ((0, k_pad - inputs), (0, n_pad - class_num)))
    b = jnp.zeros((class_num,), dtype=dtype)
    return wt, b


if __name__ == "__main__":
    key = jax.random.PRNGKey(0)
    k_w, k_x, k_w2, k_x2, k_w3, k_x3, k_w4, k_x4 = jax.random.split(key, 8)

    # 1) Module-sized tiny shape (batch=8, inputs=32, class_num=16):
    #    exercises the jnp fallback path for sub-launch-overhead problems.
    batch, inputs, class_num = 8, 32, 16
    wt, bias = init_classifier_params(k_w, inputs, class_num)
    x = jax.random.normal(k_x, (batch, inputs), dtype=jnp.float32)
    y = classifier_forward(x, wt, bias)
    jax.block_until_ready(y)
    y_ref = x @ wt[:inputs, :class_num] + bias
    assert y.shape == (batch, class_num)
    assert jnp.allclose(y, y_ref, atol=1e-5), "mismatch (tiny/fallback)"

    # 2) Unaligned shape -> Pallas single-K-strip kernel with padding.
    M2, K2, N2 = 300, 1300, 200
    wt2 = 0.01 * jax.random.normal(k_w2, (K2, N2), dtype=jnp.float32)
    b2 = jnp.zeros((N2,), dtype=jnp.float32)
    x2 = jax.random.normal(k_x2, (M2, K2), dtype=jnp.float32)
    y2 = classifier_forward(x2, wt2, b2)
    jax.block_until_ready(y2)
    y2_ref = x2 @ wt2 + b2
    assert y2.shape == (M2, N2)
    assert jnp.allclose(y2, y2_ref, atol=1e-3, rtol=1e-5), "mismatch (single-K)"

    # 3) Force the tiled-K accumulator path (small tk_max -> 2 K steps).
    M3, K3, N3 = 64, 512, 256
    wt3, b3 = init_classifier_params(k_w3, K3, N3)
    x3 = jax.random.normal(k_x3, (M3, K3), dtype=jnp.float32)
    y3 = classifier_forward(x3, wt3, b3, tk_max=256)
    jax.block_until_ready(y3)
    y3_ref = x3 @ wt3[:K3, :N3] + b3
    assert y3.shape == (M3, N3)
    assert jnp.allclose(y3, y3_ref, atol=1e-3, rtol=1e-5), "mismatch (multi-K)"

    # 4) bf16 weights/activations (halved HBM stream, bf16 MXU, f32 accum).
    M4, K4, N4 = 64, 512, 200
    wt4, b4 = init_classifier_params(k_w4, K4, N4, dtype=jnp.bfloat16)
    x4 = jax.random.normal(k_x4, (M4, K4), dtype=jnp.float32).astype(jnp.bfloat16)
    y4 = classifier_forward(x4, wt4, b4)
    jax.block_until_ready(y4)
    y4_ref = (x4.astype(jnp.float32) @ wt4[:K4, :N4].astype(jnp.float32)
              + b4.astype(jnp.float32))
    assert y4.shape == (M4, N4)
    assert jnp.allclose(y4.astype(jnp.float32), y4_ref, atol=5e-3, rtol=5e-3), \
        "mismatch (bf16)"

    print("KERNEL_OK")
</pallas_src>

<mosaic_0001>
module attributes {stable_mosaic.version = 11 : i64} {
  func.func @_linear_kernel_single_k(%arg0: i32, %arg1: i32, %arg2: memref<304x1408xf32, #tpu.memory_space<vmem>>, %arg3: memref<1408x128xf32, #tpu.memory_space<vmem>>, %arg4: memref<1x128xf32, #tpu.memory_space<vmem>>, %arg5: memref<304x128xf32, #tpu.memory_space<vmem>>) attributes {dimension_semantics = [#tpu.dimension_semantics<parallel>, #tpu.dimension_semantics<parallel>], iteration_bounds = array<i64: 1, 2>, scalar_prefetch = 0 : i64, scratch_operands = 0 : i64, tpu.core_type = #tpu.core_type<tc>, window_params = [{transform_indices = @transform_0, window_bounds = array<i64: 304, 1408>}, {transform_indices = @transform_1, window_bounds = array<i64: 1408, 128>}, {transform_indices = @transform_2, window_bounds = array<i64: 1, 128>}, {transform_indices = @transform_3, window_bounds = array<i64: 304, 128>}]} {
    %c0 = arith.constant 0 : index
    %c0_0 = arith.constant 0 : index
    %0 = vector.load %arg2[%c0, %c0_0] : memref<304x1408xf32, #tpu.memory_space<vmem>>, vector<304x1408xf32>
    %c0_1 = arith.constant 0 : index
    %c0_2 = arith.constant 0 : index
    %1 = vector.load %arg3[%c0_1, %c0_2] : memref<1408x128xf32, #tpu.memory_space<vmem>>, vector<1408x128xf32>
    %cst = arith.constant dense<0.000000e+00> : vector<304x128xf32>
    %2 = tpu.matmul %0, %1, %cst {dimension_numbers = #tpu.dot_dimension_numbers<[1], [0], [0], [1], [0, 0, 1, 1], [], []>} : vector<304x1408xf32>, vector<1408x128xf32>, vector<304x128xf32> -> vector<304x128xf32>
    %c0_3 = arith.constant 0 : index
    %c0_4 = arith.constant 0 : index
    %3 = vector.load %arg4[%c0_3, %c0_4] : memref<1x128xf32, #tpu.memory_space<vmem>>, vector<1x128xf32>
    %4 = vector.broadcast %3 : vector<1x128xf32> to vector<304x128xf32>
    %5 = arith.addf %2, %4 : vector<304x128xf32>
    %c0_5 = arith.constant 0 : index
    %c0_6 = arith.constant 0 : index
    %6 = vector.load %arg5[%c0_5, %c0_6] : memref<304x128xf32, #tpu.memory_space<vmem>>, vector<304x128xf32>
    tpu.vector_store %arg5[%c0_5, %c0_6], %5 {strides = array<i32>} : memref<304x128xf32, #tpu.memory_space<vmem>>, vector<304x128xf32>,
    return
  }
  func.func @transform_0(%arg0: i32, %arg1: i32) -> (i32, i32) {
    %c0_i32 = arith.constant 0 : i32
    %c0_i32_0 = arith.constant 0 : i32
    return %arg0, %c0_i32 : i32, i32
  }
  func.func @transform_1(%arg0: i32, %arg1: i32) -> (i32, i32) {
    %c0_i32 = arith.constant 0 : i32
    %c0_i32_0 = arith.constant 0 : i32
    return %c0_i32, %arg1 : i32, i32
  }
  func.func @transform_2(%arg0: i32, %arg1: i32) -> (i32, i32) {
    %c0_i32 = arith.constant 0 : i32
    %c0_i32_0 = arith.constant 0 : i32
    return %c0_i32, %arg1 : i32, i32
  }
  func.func @transform_3(%arg0: i32, %arg1: i32) -> (i32, i32) {
    %c0_i32 = arith.constant 0 : i32
    return %arg0, %arg1 : i32, i32
  }
}

</mosaic_0001>

<bundles_post_ra>
// kernel: tpu_custom_call.1
= control target key start
LH: loop header
LB: loop body
LE: loop exit
PB: predicated region body
PF: predicated region fallthrough
CT: control target
= control target key end

     0   :  { %8 = vsyncpa [#allocation3], 0  ;;  %s3960_s0 = inlined_call_operand.hbm [shape: f32[304,1408], index: 0, kind: input, shape index: {}]   ;;  %s3961_s1 = inlined_call_operand.hbm [shape: f32[1408,256], index: 1, kind: input, shape index: {}]   ;;  %s3962_s2 = inlined_call_operand.hbm [shape: f32[1,256], index: 2, kind: input, shape index: {}]   ;;  %s3963_s3 = inlined_call_operand.hbm [shape: f32[304,256], index: 3, kind: output, shape index: {}]  }
   0x1   :  { %9 = vsyncpa [#allocation6], 0 }
   0x2   :  { %11 = vsyncpa [#allocation6 + $0x1], 0 }
   0x3   :  { %12 = vsyncpa [#allocation4], 0 }
   0x4   :  { %14 = vsyncpa [#allocation4 + $0x1], 0  ;;  %s3070_s12 = smov 0   ;;  %s3072_s13 = smov 0  }
   0x5   :  { %s3074_s14 = smov 0   ;;  %s3076_s15 = smov 0  }
   0x6   :  { %s3078_s16 = smov 0   ;;  %s3080_s17 = smov 0  }
   0x7 LB: > { %s29_s18 = sadd.s32 1, %s3031_s16  ;;  %s65_s19 = sadd.s32 1, %s3023_s14  ;;  %s3035_s17 = sphi %s3080_s17, %s20_s17   ;;  %s3031_s16 = sphi %s3078_s16, %s3983_s16   ;;  %s3027_s15 = sphi %s3076_s15, %s3982_s15   ;;  %s3023_s14 = sphi %s3074_s14, %s3981_s14   ;;  %s3019_s13 = sphi %s3072_s13, %s3980_s13   ;;  %s3015_s12 = sphi %s3070_s12, %s3979_s12  }
   0x8   : > { %p30_p0 = scmp.ge.s32.totalorder %s29_s18, 2  ;;  %p72_p1 = scmp.ne.s32.totalorder %s3023_s14, %s3019_s13 }
   0x9   : > { %p73_p2 = scmp.eq.s32.totalorder %s3035_s17, 0  ;;  %p2807_p5 = scmp.lt.s32.totalorder %s3035_s17, 2 }
   0xa   : > { %s3985_s18 = smov (%p30_p0, %s29_s18), 0  ;;  %s173_s21 = sand.u32 1, %s3035_s17  }
   0xb   : > { %p74_p4 = por %p73_p2, %p72_p1  ;;  %s62_s20 = ssub.s32 %s3031_s16, %s3985_s18 }
   0xc   : > { %p63_p6 = scmp.eq.s32.totalorder %s62_s20, 0  ;;  %s175_s22 = sand.u32 1, %s3023_s14  }
   0xd   : > { %s2563_s23 = sshll.u32 %s3031_s16, 7  ;;  %s2778_s25 = smul.u32 1408, %s175_s22 }
   0xe   : > { %s3118_s24 = scalar_select %p63_p6, %s3023_s14, %s65_s19  }
   0xf   : > { %s182_s28 = scalar_lea.hbm %s3961_s1, %s2563_s23  ;;  %p3125_p7 = pnand %p2807_p5, %p74_p4 }
  0x10   : > { %s177_s30 = scalar_lea.vmem [#allocation5], %s2778_s25  ;;  %s3129_s5 = scalar_lea.sflag [#allocation6], %s173_s21 }
  0x11   : > { %s183_s4 = sshll.u32 %s177_s30, 4  ;;  %p3964_p8 = pneg %p3125_p7  ;;  %s184_s4 = int_to_ptr.vmem [resolvable:$true] %s183_s4 }
  0x12   : > { %s2882_s6 = scalar_lea.vmem %s184_s4, 22528  ;;  %s3037_s7 = smov [#allocation5]  }
  0x13   : > { %p2883_p9 = scmp.ne.s32.totalorder %s184_s4, %s2882_s6  ;;  %s2887_s8 = sshll.u32 %s3037_s7, 4  ;;  %s2888_s8 = int_to_ptr.vmem [resolvable:$false] %s2887_s8 }
  0x14   : > { %s2889_s9 = scalar_lea.vmem %s2888_s8, 45056  ;;  %p2890_p12 = scmp.lt.s32.totalorder %s184_s4, %s2888_s8 }
  0x15   : > { %p2885_p10 = pnand %p2883_p9, %p3964_p8  ;;  %p2891_p13 = scmp.lt.s32.totalorder %s2889_s9, %s2882_s6 }
  0x17   : > { %p2886_p11 = pneg %p2885_p10  ;;  %p2892_p0 = por %p2891_p13, %p2890_p12 }
  0x19   : > { %p2893_p2 = pnand %p2892_p0, %p2886_p11 }
  0x1b   : > { %2896 = shalt.err (!%p2893_p2)
}
  0x1c   : > { %s3038_s10 = smov 256   ;;  %s3039_s11 = smov 128  }
  0x1d   : > { %s3040_s19 = smov 8   ;;  %s3140_s20 = sadd.s32 4294967295, %s3035_s17  }
  0x1e   : > { %2798 = dma.hbm_to_vmem [thread:$0]  (!%p3125_p7), %s182_s28, 22528, %s184_s4, %s3129_s5, %s3038_s10, %s3039_s11, %s3040_s19  }
  0x1f   : > { %s2559_s21 = sadd.s32 4294967294, %s3035_s17   ;;  %p78_p4 = scmp.ne.s32.totalorder %s3019_s13, %s3015_s12 }
  0x20   : > { %p3965_p5 = scmp.eq.s32.totalorder %s3140_s20, 0  ;;  %p130_p6 = scmp.eq.s32.totalorder %s3140_s20, 1 }
  0x21   : > { %p136_p9 = scmp.eq.s32.totalorder %s2559_s21, 1  ;;  %p2560_p11 = scmp.ge.s32.totalorder %s3035_s17, 1 }
  0x22   : > { %p3149_p10 = por %p3965_p5, %p78_p4  ;;  %p3157_p12 = por %p130_p6, %p72_p1 }
  0x23   : > { %p3161_p13 = por %p136_p9, %p78_p4  ;;  %p143_p0 = scmp.lt.s32.totalorder %s3035_s17, 3 }
  0x24   : > { %s3969_s25 = scalar_select %p3157_p12, 1, 0 }
  0x25   : > { %s3970_s26 = scalar_select %p3161_p13, 1, 0 }
  0x26   : > { %p3166_p2 = pnand %p2560_p11, %p143_p0  ;;  %s3041_s28 = smov [#allocation2]  }
  0x27   : > { %s159_s30 = sshll.u32 %s3041_s28, 4  ;;  %s2564_s4 = sshll.u32 %s3031_s16, 4  ;;  %s160_s30 = int_to_ptr.vmem [resolvable:$true] %s159_s30 }
  0x28   : > { %p2791_p3 = pneg %p3166_p2  ;;  %s196_s6 = scalar_lea.vmem [#allocation7], %s175_s22 }
  0x29   : > { %s203_s7 = sshll.u32 %s196_s6, 4  ;;  %s3184_s11 = scalar_lea.hbm %s3962_s2, %s2564_s4  ;;  %s204_s7 = int_to_ptr.vmem [resolvable:$true] %s203_s7 }
  0x2a   : > { %p3177_p1 = pnand %p2791_p3, %p3965_p5  ;;  %s2908_s19 = scalar_lea.vmem %s160_s30, 53504 }
  0x2b   : > { %p2909_p6 = scmp.ne.s32.totalorder %s160_s30, %s2908_s19  ;;  %p2916_p0 = scmp.lt.s32.totalorder %s160_s30, %s160_s30 }
  0x2c   : > { %p2899_p4 = pneg %p3177_p1  ;;  %p2917_p8 = scmp.lt.s32.totalorder %s2908_s19, %s2908_s19 }
  0x2e   : > { %p2911_p9 = pnand %p2909_p6, %p2899_p4  ;;  %p2918_p13 = por %p2917_p8, %p2916_p0 }
  0x30   : > { %p2912_p11 = pneg %p2911_p9 }
  0x32   : > { %p2919_p3 = pnand %p2918_p13, %p2912_p11 }
  0x34   : > { %2922 = shalt.err (!%p2919_p3)
}
  0x35   : > { %s3042_s22 = smov 1408   ;;  %s3043_s21 = smov 88  }
  0x36   : > { %2794 = dma.hbm_to_vmem [thread:$0]  (!%p3177_p1), %s3960_s0, 53504, %s160_s30, [#allocation3], %s3042_s22, %s3042_s22, %s3043_s21  }
  0x37   : > { %s2936_s6 = scalar_lea.vmem %s204_s7, 16  ;;  %p3973_p12 = pneg %p3125_p7 }
  0x38   : > { %p2937_p5 = scmp.ne.s32.totalorder %s204_s7, %s2936_s6  ;;  %s3044_s9 = smov [#allocation7]  }
  0x39   : > { %s2941_s10 = sshll.u32 %s3044_s9, 4  ;;  %s2942_s10 = int_to_ptr.vmem [resolvable:$false] %s2941_s10 }
  0x3a   : > { %p2939_p4 = pnand %p2937_p5, %p3973_p12  ;;  %s2943_s19 = scalar_lea.vmem %s2942_s10, 32 }
  0x3b   : > { %p2944_p8 = scmp.lt.s32.totalorder %s204_s7, %s2942_s10  ;;  %p2945_p13 = scmp.lt.s32.totalorder %s2943_s19, %s2936_s6 }
  0x3c   : > { %p2940_p6 = pneg %p2939_p4 }
  0x3d   : > { %p2946_p9 = por %p2945_p13, %p2944_p8 }
  0x3f   : > { %p2947_p11 = pnand %p2946_p9, %p2940_p6 }
  0x41   : > { %2950 = shalt.err (!%p2947_p11)
}
  0x42   : > { %2801 = dma.hbm_to_vmem [thread:$0]  (!%p3125_p7), %s3184_s11, 16, %s204_s7, %s3129_s5  }
  0x43   : > { %212 = sbr.rel (%p3166_p2) target bundleno = 772 (0x304), region = 32  ;;  %p3974_p5 = scmp.eq.s32.totalorder (!%p3166_p2), %s3140_s20, 0 }
  0x48   : > { %3002 = dma.done.wait (%p3974_p5), [#allocation3], 53504   ;;  %p3975_p12 = pmov %p3974_p5 }
  0x49   : > { %s218_s30 = sand.u32 1, %s3140_s20   ;;  %s3208_s8 = sand.u32 1, %s3019_s13  }
  0x4a   : > { %3004 = vsyncadd (%p3975_p12), [#allocation3], 4294913792  ;;  %s2779_s29 = smul.u32 1408, %s3208_s8  ;;  %s219_s22 = scalar_lea.sflag [#allocation6], %s218_s30 }
  0x4c   : > { %s3211_s21 = scalar_lea.vmem [#allocation5], %s2779_s29 }
  0x4d   : > { %3006 = dma.done.wait (%p3149_p10), %s219_s22, 22544  }
  0x4e   : > { %3008 = vsyncadd (%p3149_p10), %s219_s22, 4294944752  ;;  %v3045_v0 = vmov 0.0   ;;  %v692_v1 = vld [vmem:[%s3211_s21 + $0x78] sm:$0xff]  ;;  %v691_v3 = vld [vmem:[%s3211_s21 + $0x70] sm:$0xff]  ;;  %s230_s5 = scalar_lea.vmem [#allocation7], %s3208_s8  ;;  %s2780_s20 = smul.u32 304, %s3208_s8 }
  0x4f   : > { %860 = vmatprep.subr.mxu0 %v3045_v0  ;;  %1115 = vmatprep.subr.mxu1 %v3045_v0  ;;  %v724_v2 = vld [vmem:[%s3211_s21 + $0x178] sm:$0xff]  ;;  %v723_v4 = vld [vmem:[%s3211_s21 + $0x170] sm:$0xff]  ;;  %v690_v5 = vld [vmem:[%s3211_s21 + $0x68] sm:$0xff]  ;;  %s2568_s27 = sshll.u32 %s3027_s15, 7  ;;  %s2429_s15 = scalar_lea.sflag [#allocation4], %s3208_s8 }
  0x50   : > { %861 = vmatpush1.msra.mxu0 %v692_v1  ;;  %1116 = vmatpush1.msra.mxu1 %v724_v2  ;;  %v722_v6 = vld [vmem:[%s3211_s21 + $0x168] sm:$0xff]  ;;  %v689_v7 = vld [vmem:[%s3211_s21 + $0x60] sm:$0xff]  ;;  %v688_v9 = vld [vmem:[%s3211_s21 + $0x58] sm:$0xff]  ;;  %s3830_s23 = scalar_lea.vmem [#allocation8], %s2780_s20  ;;  %s3908_s4 = scalar_lea.hbm %s3963_s3, %s2568_s27 }
  0x51   : > { %862 = vmatprep.subr.mxu0 %v3045_v0  ;;  %1117 = vmatprep.subr.mxu1 %v3045_v0  ;;  %v721_v8 = vld [vmem:[%s3211_s21 + $0x160] sm:$0xff]  ;;  %v720_v10 = vld [vmem:[%s3211_s21 + $0x158] sm:$0xff]  ;;  %v687_v11 = vld [vmem:[%s3211_s21 + $0x50] sm:$0xff]  ;;  %s2444_s7 = sshll.u32 %s3830_s23, 4  ;;  %p3976_p10 = scmp.ne.s32.totalorder %s3969_s25, 0  ;;  %s3911_s7 = int_to_ptr.vmem [resolvable:$true] %s2444_s7 }
  0x52   : > { %863 = vmatpush1.msra.mxu0 %v691_v3  ;;  %1118 = vmatpush1.msra.mxu1 %v723_v4  ;;  %v719_v12 = vld [vmem:[%s3211_s21 + $0x150] sm:$0xff]  ;;  %v686_v13 = vld [vmem:[%s3211_s21 + $0x48] sm:$0xff]  ;;  %v685_v15 = vld [vmem:[%s3211_s21 + $0x40] sm:$0xff]  ;;  %s2951_s6 = scalar_lea.vmem %s3911_s7, 4864  ;;  %s3046_s9 = smov [#allocation8]  }
  0x53   : > { %864 = vmatprep.subr.mxu0 %v3045_v0  ;;  %1119 = vmatprep.subr.mxu1 %v3045_v0  ;;  %v718_v14 = vld [vmem:[%s3211_s21 + $0x148] sm:$0xff]  ;;  %v717_v16 = vld [vmem:[%s3211_s21 + $0x140] sm:$0xff]  ;;  %v684_v17 = vld [vmem:[%s3211_s21 + $0x38] sm:$0xff]  ;;  %p2952_p7 = scmp.ne.s32.totalorder %s3911_s7, %s2951_s6  ;;  %s2955_s10 = sshll.u32 %s3046_s9, 4  ;;  %s2956_s10 = int_to_ptr.vmem [resolvable:$false] %s2955_s10 }
  0x54   : > { %865 = vmatpush1.msra.mxu0 %v690_v5  ;;  %1120 = vmatpush1.msra.mxu1 %v722_v6  ;;  %v716_v18 = vld [vmem:[%s3211_s21 + $0x138] sm:$0xff]  ;;  %v683_v19 = vld [vmem:[%s3211_s21 + $0x30] sm:$0xff]  ;;  %v682_v21 = vld [vmem:[%s3211_s21 + $0x28] sm:$0xff]  ;;  %s2957_s19 = scalar_lea.vmem %s2956_s10, 9728  ;;  %p2958_p0 = scmp.lt.s32.totalorder %s3911_s7, %s2956_s10 }
  0x55   : > { %866 = vmatprep.subr.mxu0 %v3045_v0  ;;  %1121 = vmatprep.subr.mxu1 %v3045_v0  ;;  %v715_v20 = vld [vmem:[%s3211_s21 + $0x130] sm:$0xff]  ;;  %v714_v22 = vld [vmem:[%s3211_s21 + $0x128] sm:$0xff]  ;;  %v681_v23 = vld [vmem:[%s3211_s21 + $0x20] sm:$0xff]  ;;  %p2953_p2 = pnand %p2952_p7, %p3976_p10  ;;  %p2959_p3 = scmp.lt.s32.totalorder %s2957_s19, %s2951_s6 }
  0x56   : > { %867 = vmatpush1.msra.mxu0 %v689_v7  ;;  %1122 = vmatpush1.msra.mxu1 %v721_v8  ;;  %v713_v24 = vld [vmem:[%s3211_s21 + $0x120] sm:$0xff]  ;;  %v680_v25 = vld [vmem:[%s3211_s21 + $0x18] sm:$0xff]  ;;  %v679_v27 = vld [vmem:[%s3211_s21 + $0x10] sm:$0xff] }
  0x57   : > { %868 = vmatprep.subr.mxu0 %v3045_v0  ;;  %1123 = vmatprep.subr.mxu1 %v3045_v0  ;;  %v712_v26 = vld [vmem:[%s3211_s21 + $0x118] sm:$0xff]  ;;  %v711_v28 = vld [vmem:[%s3211_s21 + $0x110] sm:$0xff]  ;;  %v678_v29 = vld [vmem:[%s3211_s21 + $0x8] sm:$0xff]  ;;  %p2954_p1 = pneg %p2953_p2  ;;  %p2960_p4 = por %p2959_p3, %p2958_p0 }
  0x58   : > { %869 = vmatpush1.msra.mxu0 %v688_v9  ;;  %1124 = vmatpush1.msra.mxu1 %v720_v10  ;;  %v710_v30 = vld [vmem:[%s3211_s21 + $0x108] sm:$0xff]  ;;  %v677_v31 = vld [vmem:[%s3211_s21] sm:$0xff]  ;;  %v708_v33 = vld [vmem:[%s3211_s21 + $0xf8] sm:$0xff] }
  0x59   : > { %870 = vmatprep.subr.mxu0 %v3045_v0  ;;  %1125 = vmatprep.subr.mxu1 %v3045_v0  ;;  %v709_v32 = vld [vmem:[%s3211_s21 + $0x100] sm:$0xff]  ;;  %v740_v34 = vld [vmem:[%s3211_s21 + $0x1f8] sm:$0xff]  ;;  %v707_v35 = vld [vmem:[%s3211_s21 + $0xf0] sm:$0xff]  ;;  %p2961_p6 = pnand %p2960_p4, %p2954_p1 }
  0x5a   : > { %871 = vmatpush1.msra.mxu0 %v687_v11  ;;  %1126 = vmatpush1.msra.mxu1 %v719_v12  ;;  %v739_v36 = vld [vmem:[%s3211_s21 + $0x1f0] sm:$0xff]  ;;  %v706_v37 = vld [vmem:[%s3211_s21 + $0xe8] sm:$0xff]  ;;  %v705_v39 = vld [vmem:[%s3211_s21 + $0xe0] sm:$0xff] }
  0x5b   : > { %872 = vmatprep.subr.mxu0 %v3045_v0  ;;  %1127 = vmatprep.subr.mxu1 %v3045_v0  ;;  %v738_v38 = vld [vmem:[%s3211_s21 + $0x1e8] sm:$0xff]  ;;  %v737_v40 = vld [vmem:[%s3211_s21 + $0x1e0] sm:$0xff]  ;;  %v704_v41 = vld [vmem:[%s3211_s21 + $0xd8] sm:$0xff] }
  0x5c   : > { %873 = vmatpush1.msra.mxu0 %v686_v13  ;;  %1128 = vmatpush1.msra.mxu1 %v718_v14  ;;  %v736_v42 = vld [vmem:[%s3211_s21 + $0x1d8] sm:$0xff]  ;;  %v703_v43 = vld [vmem:[%s3211_s21 + $0xd0] sm:$0xff]  ;;  %v702_v45 = vld [vmem:[%s3211_s21 + $0xc8] sm:$0xff] }
  0x5d   : > { %874 = vmatprep.subr.mxu0 %v3045_v0  ;;  %1129 = vmatprep.subr.mxu1 %v3045_v0  ;;  %v735_v44 = vld [vmem:[%s3211_s21 + $0x1d0] sm:$0xff]  ;;  %v734_v46 = vld [vmem:[%s3211_s21 + $0x1c8] sm:$0xff]  ;;  %v701_v47 = vld [vmem:[%s3211_s21 + $0xc0] sm:$0xff] }
  0x5e   : > { %875 = vmatpush1.msra.mxu0 %v685_v15  ;;  %1130 = vmatpush1.msra.mxu1 %v717_v16  ;;  %v733_v48 = vld [vmem:[%s3211_s21 + $0x1c0] sm:$0xff]  ;;  %v700_v49 = vld [vmem:[%s3211_s21 + $0xb8] sm:$0xff]  ;;  %v699_v51 = vld [vmem:[%s3211_s21 + $0xb0] sm:$0xff] }
  0x5f   : > { %876 = vmatprep.subr.mxu0 %v3045_v0  ;;  %1131 = vmatprep.subr.mxu1 %v3045_v0  ;;  %v732_v50 = vld [vmem:[%s3211_s21 + $0x1b8] sm:$0xff]  ;;  %v731_v52 = vld [vmem:[%s3211_s21 + $0x1b0] sm:$0xff]  ;;  %v698_v53 = vld [vmem:[%s3211_s21 + $0xa8] sm:$0xff] }
  0x60   : > { %877 = vmatpush1.msra.mxu0 %v684_v17  ;;  %1132 = vmatpush1.msra.mxu1 %v716_v18  ;;  %v730_v54 = vld [vmem:[%s3211_s21 + $0x1a8] sm:$0xff]  ;;  %v697_v55 = vld [vmem:[%s3211_s21 + $0xa0] sm:$0xff]  ;;  %v696_v57 = vld [vmem:[%s3211_s21 + $0x98] sm:$0xff] }
  0x61   : > { %878 = vmatprep.subr.mxu0 %v3045_v0  ;;  %1133 = vmatprep.subr.mxu1 %v3045_v0  ;;  %v729_v56 = vld [vmem:[%s3211_s21 + $0x1a0] sm:$0xff]  ;;  %v728_v58 = vld [vmem:[%s3211_s21 + $0x198] sm:$0xff]  ;;  %v695_v59 = vld [vmem:[%s3211_s21 + $0x90] sm:$0xff] }
  0x62   : > { %879 = vmatpush1.msra.mxu0 %v683_v19  ;;  %1134 = vmatpush1.msra.mxu1 %v715_v20  ;;  %v727_v60 = vld [vmem:[%s3211_s21 + $0x190] sm:$0xff]  ;;  %v694_v61 = vld [vmem:[%s3211_s21 + $0x88] sm:$0xff]  ;;  %v693_v63 = vld [vmem:[%s3211_s21 + $0x80] sm:$0xff] }
  0x63   : > { %880 = vmatprep.subr.mxu0 %v3045_v0  ;;  %1135 = vmatprep.subr.mxu1 %v3045_v0  ;;  %v726_v62 = vld [vmem:[%s3211_s21 + $0x188] sm:$0xff]  ;;  %v260_v1 = vld [vmem:[#allocation2 + $0x8] sm:$0xff]  ;;  %v725_v2 = vld [vmem:[%s3211_s21 + $0x180] sm:$0xff] }
  0x64   : > { %881 = vmatpush1.msra.mxu0 %v682_v21  ;;  %1136 = vmatpush1.msra.mxu1 %v714_v22  ;;  %v262_v3 = vld [vmem:[#allocation2 + $0x18] sm:$0xff]  ;;  %v259_v4 = vld [vmem:[#allocation2] sm:$0xff]  ;;  %v261_v5 = vld [vmem:[#allocation2 + $0x10] sm:$0xff] }
  0x65   : > { %882 = vmatprep.subr.mxu0 %v3045_v0  ;;  %1137 = vmatprep.subr.mxu1 %v3045_v0  ;;  %v271_v6 = vld [vmem:[#allocation2 + $0x60] sm:$0xff]  ;;  %v756_v7 = vld [vmem:[%s3211_s21 + $0x278] sm:$0xff]  ;;  %v273_v8 = vld [vmem:[#allocation2 + $0x70] sm:$0xff] }
  0x66   : > { %883 = vmatpush1.msra.mxu0 %v681_v23  ;;  %1138 = vmatpush1.msra.mxu1 %v713_v24  ;;  %v270_v9 = vld [vmem:[#allocation2 + $0x58] sm:$0xff]  ;;  %v272_v10 = vld [vmem:[#allocation2 + $0x68] sm:$0xff]  ;;  %v755_v12 = vld [vmem:[%s3211_s21 + $0x270] sm:$0xff] }
  0x67   : > { %884 = vmatprep.subr.mxu0 %v3045_v0  ;;  %1139 = vmatprep.subr.mxu1 %v3045_v0  ;;  %v788_v11 = vld [vmem:[%s3211_s21 + $0x378] sm:$0xff]  ;;  %v282_v13 = vld [vmem:[#allocation2 + $0xb8] sm:$0xff]  ;;  %v281_v15 = vld [vmem:[#allocation2 + $0xb0] sm:$0xff] }
  0x68   : > { %885 = vmatpush1.msra.mxu0 %v680_v25  ;;  %1140 = vmatpush1.msra.mxu1 %v712_v26  ;;  %v284_v14 = vld [vmem:[#allocation2 + $0xc8] sm:$0xff]  ;;  %v283_v16 = vld [vmem:[#allocation2 + $0xc0] sm:$0xff]  ;;  %v293_v18 = vld [vmem:[#allocation2 + $0x110] sm:$0xff] }
  0x69   : > { %886 = vmatprep.subr.mxu0 %v3045_v0  ;;  %1141 = vmatprep.subr.mxu1 %v3045_v0  ;;  %v787_v17 = vld [vmem:[%s3211_s21 + $0x370] sm:$0xff]  ;;  %v754_v20 = vld [vmem:[%s3211_s21 + $0x268] sm:$0xff]  ;;  %v292_v21 = vld [vmem:[#allocation2 + $0x108] sm:$0xff] }
  0x6a   : > { %887 = vmatpush1.msra.mxu0 %v679_v27  ;;  %1142 = vmatpush1.msra.mxu1 %v711_v28  ;;  %v295_v19 = vld [vmem:[#allocation2 + $0x120] sm:$0xff]  ;;  %v294_v22 = vld [vmem:[#allocation2 + $0x118] sm:$0xff]  ;;  %v304_v23 = vld [vmem:[#allocation2 + $0x168] sm:$0xff] }
  0x6b   : > { %888 = vmatprep.subr.mxu0 %v3045_v0  ;;  %1143 = vmatprep.subr.mxu1 %v3045_v0  ;;  %v306_v24 = vld [vmem:[#allocation2 + $0x178] sm:$0xff]  ;;  %v753_v26 = vld [vmem:[%s3211_s21 + $0x260] sm:$0xff]  ;;  %v303_v27 = vld [vmem:[#allocation2 + $0x160] sm:$0xff] }
  0x6c   : > { %889 = vmatpush1.msra.mxu0 %v678_v29  ;;  %1144 = vmatpush1.msra.mxu1 %v710_v30  ;;  %v786_v25 = vld [vmem:[%s3211_s21 + $0x368] sm:$0xff]  ;;  %v305_v28 = vld [vmem:[#allocation2 + $0x170] sm:$0xff]  ;;  %v315_v29 = vld [vmem:[#allocation2 + $0x1c0] sm:$0xff] }
  0x6d   : > { %890 = vmatprep.subr.mxu0 %v3045_v0  ;;  %1145 = vmatprep.subr.mxu1 %v3045_v0  ;;  %v317_v30 = vld [vmem:[#allocation2 + $0x1d0] sm:$0xff] }
  0x6e   : > { %891 = vmatpush1.msra.mxu0 %v677_v31  ;;  %1146 = vmatpush1.msra.mxu1 %v709_v32  ;;  %v752_v31 = vld [vmem:[%s3211_s21 + $0x258] sm:$0xff]  ;;  %v785_v32 = vld [vmem:[%s3211_s21 + $0x360] sm:$0xff] }
  0x6f   : > { %892 = vmatprep.subr.mxu0 %v3045_v0  ;;  %1147 = vmatprep.subr.mxu1 %v3045_v0 }
  0x70   : > { %893 = vmatpush2.msra.mxu0 %v708_v33  ;;  %1148 = vmatpush2.msra.mxu1 %v740_v34  ;;  %v314_v33 = vld [vmem:[#allocation2 + $0x1b8] sm:$0xff]  ;;  %v316_v34 = vld [vmem:[#allocation2 + $0x1c8] sm:$0xff] }
  0x71   : > { %894 = vmatprep.subr.mxu0 %v3045_v0  ;;  %1149 = vmatprep.subr.mxu1 %v3045_v0 }
  0x72   : > { %895 = vmatpush2.msra.mxu0 %v707_v35  ;;  %1150 = vmatpush2.msra.mxu1 %v739_v36  ;;  %v326_v35 = vld [vmem:[#allocation2 + $0x218] sm:$0xff]  ;;  %v328_v36 = vld [vmem:[#allocation2 + $0x228] sm:$0xff] }
  0x73   : > { %896 = vmatprep.subr.mxu0 %v3045_v0  ;;  %1151 = vmatprep.subr.mxu1 %v3045_v0 }
  0x74   : > { %897 = vmatpush2.msra.mxu0 %v706_v37  ;;  %1152 = vmatpush2.msra.mxu1 %v738_v38  ;;  %v784_v37 = vld [vmem:[%s3211_s21 + $0x358] sm:$0xff]  ;;  %v751_v38 = vld [vmem:[%s3211_s21 + $0x250] sm:$0xff] }
  0x75   : > { %898 = vmatprep.subr.mxu0 %v3045_v0  ;;  %1153 = vmatprep.subr.mxu1 %v3045_v0 }
  0x76   : > { %899 = vmatpush2.msra.mxu0 %v705_v39  ;;  %1154 = vmatpush2.msra.mxu1 %v737_v40  ;;  %v325_v39 = vld [vmem:[#allocation2 + $0x210] sm:$0xff]  ;;  %v327_v40 = vld [vmem:[#allocation2 + $0x220] sm:$0xff] }
  0x77   : > { %900 = vmatprep.subr.mxu0 %v3045_v0  ;;  %1155 = vmatprep.subr.mxu1 %v3045_v0 }
  0x78   : > { %901 = vmatpush2.msra.mxu0 %v704_v41  ;;  %1156 = vmatpush2.msra.mxu1 %v736_v42  ;;  %v337_v41 = vld [vmem:[#allocation2 + $0x270] sm:$0xff]  ;;  %v339_v42 = vld [vmem:[#allocation2 + $0x280] sm:$0xff] }
  0x79   : > { %902 = vmatprep.subr.mxu0 %v3045_v0  ;;  %1157 = vmatprep.subr.mxu1 %v3045_v0 }
  0x7a   : > { %903 = vmatpush2.msra.mxu0 %v703_v43  ;;  %1158 = vmatpush2.msra.mxu1 %v735_v44  ;;  %v783_v43 = vld [vmem:[%s3211_s21 + $0x350] sm:$0xff]  ;;  %v750_v44 = vld [vmem:[%s3211_s21 + $0x248] sm:$0xff] }
  0x7b   : > { %904 = vmatprep.subr.mxu0 %v3045_v0  ;;  %1159 = vmatprep.subr.mxu1 %v3045_v0 }
  0x7c   : > { %905 = vmatpush2.msra.mxu0 %v702_v45  ;;  %1160 = vmatpush2.msra.mxu1 %v734_v46  ;;  %v336_v45 = vld [vmem:[#allocation2 + $0x268] sm:$0xff]  ;;  %v338_v46 = vld [vmem:[#allocation2 + $0x278] sm:$0xff] }
  0x7d   : > { %906 = vmatprep.subr.mxu0 %v3045_v0  ;;  %1161 = vmatprep.subr.mxu1 %v3045_v0 }
  0x7e   : > { %907 = vmatpush2.msra.mxu0 %v701_v47  ;;  %1162 = vmatpush2.msra.mxu1 %v733_v48  ;;  %v348_v47 = vld [vmem:[#allocation2 + $0x2c8] sm:$0xff]  ;;  %v350_v48 = vld [vmem:[#allocation2 + $0x2d8] sm:$0xff] }
  0x7f   : > { %908 = vmatprep.subr.mxu0 %v3045_v0  ;;  %1163 = vmatprep.subr.mxu1 %v3045_v0 }
  0x80   : > { %909 = vmatpush2.msra.mxu0 %v700_v49  ;;  %1164 = vmatpush2.msra.mxu1 %v732_v50  ;;  %v782_v49 = vld [vmem:[%s3211_s21 + $0x348] sm:$0xff]  ;;  %v749_v50 = vld [vmem:[%s3211_s21 + $0x240] sm:$0xff] }
  0x81   : > { %910 = vmatprep.subr.mxu0 %v3045_v0  ;;  %1165 = vmatprep.subr.mxu1 %v3045_v0 }
  0x82   : > { %911 = vmatpush2.msra.mxu0 %v699_v51  ;;  %1166 = vmatpush2.msra.mxu1 %v731_v52  ;;  %v347_v51 = vld [vmem:[#allocation2 + $0x2c0] sm:$0xff]  ;;  %v349_v52 = vld [vmem:[#allocation2 + $0x2d0] sm:$0xff] }
  0x83   : > { %912 = vmatprep.subr.mxu0 %v3045_v0  ;;  %1167 = vmatprep.subr.mxu1 %v3045_v0 }
  0x84   : > { %913 = vmatpush2.msra.mxu0 %v698_v53  ;;  %1168 = vmatpush2.msra.mxu1 %v730_v54  ;;  %v359_v53 = vld [vmem:[#allocation2 + $0x320] sm:$0xff]  ;;  %v361_v54 = vld [vmem:[#allocation2 + $0x330] sm:$0xff] }
  0x85   : > { %914 = vmatprep.subr.mxu0 %v3045_v0  ;;  %1169 = vmatprep.subr.mxu1 %v3045_v0 }
  0x86   : > { %915 = vmatpush2.msra.mxu0 %v697_v55  ;;  %1170 = vmatpush2.msra.mxu1 %v729_v56  ;;  %v748_v55 = vld [vmem:[%s3211_s21 + $0x238] sm:$0xff]  ;;  %v781_v56 = vld [vmem:[%s3211_s21 + $0x340] sm:$0xff] }
  0x87   : > { %916 = vmatprep.subr.mxu0 %v3045_v0  ;;  %1171 = vmatprep.subr.mxu1 %v3045_v0 }
  0x88   : > { %917 = vmatpush2.msra.mxu0 %v696_v57  ;;  %1172 = vmatpush2.msra.mxu1 %v728_v58  ;;  %v358_v57 = vld [vmem:[#allocation2 + $0x318] sm:$0xff]  ;;  %v360_v58 = vld [vmem:[#allocation2 + $0x328] sm:$0xff] }
  0x89   : > { %918 = vmatprep.subr.mxu0 %v3045_v0  ;;  %1173 = vmatprep.subr.mxu1 %v3045_v0 }
  0x8a   : > { %919 = vmatpush2.msra.mxu0 %v695_v59  ;;  %1174 = vmatpush2.msra.mxu1 %v727_v60  ;;  %v370_v59 = vld [vmem:[#allocation2 + $0x378] sm:$0xff]  ;;  %v372_v60 = vld [vmem:[#allocation2 + $0x388] sm:$0xff] }
  0x8b   : > { %920 = vmatprep.subr.mxu0 %v3045_v0  ;;  %1175 = vmatprep.subr.mxu1 %v3045_v0 }
  0x8c   : > { %921 = vmatpush2.msra.mxu0 %v694_v61  ;;  %1176 = vmatpush2.msra.mxu1 %v726_v62  ;;  %v780_v61 = vld [vmem:[%s3211_s21 + $0x338] sm:$0xff]  ;;  %v747_v62 = vld [vmem:[%s3211_s21 + $0x230] sm:$0xff] }
  0x8d   : > { %922 = vmatprep.subr.mxu0 %v3045_v0  ;;  %1177 = vmatprep.subr.mxu1 %v3045_v0 }
  0x8e   : > { %923 = vmatpush2.msra.mxu0 %v693_v63  ;;  %924 = vmatprep.mubr.f32.mxu0 %v260_v1  ;;  %v369_v63 = vld [vmem:[#allocation2 + $0x370] sm:$0xff]  ;;  %v371_v1 = vld [vmem:[#allocation2 + $0x380] sm:$0xff] }
  0x8f   : > { %1178 = vmatpush2.msra.mxu1 %v725_v2  ;;  %1179 = vmatprep.mubr.f32.mxu1 %v262_v3  ;;  %v381_v2 = vld [vmem:[#allocation2 + $0x3d0] sm:$0xff]  ;;  %v383_v3 = vld [vmem:[#allocation2 + $0x3e0] sm:$0xff] }
  0x90   : > { %925 = vmatmul.mubr.f32.vlgmr.msra.gmra.mxu0 %v259_v4  ;;  %1180 = vmatmul.mubr.f32.vlgmr.msra.gmra.mxu1 %v261_v5  ;;  %v779_v4 = vld [vmem:[%s3211_s21 + $0x330] sm:$0xff]  ;;  %v746_v5 = vld [vmem:[%s3211_s21 + $0x228] sm:$0xff] }
  0x91   : > { %1370 = vmatprep.subr.mxu0 %v3045_v0  ;;  %929 = vmatprep.mubr.f32.mxu0 %v271_v6  ;;  %v380_v6 = vld [vmem:[#allocation2 + $0x3c8] sm:$0xff] }
  0x92   : > { %1371 = vmatpush1.msra.mxu0 %v756_v7  ;;  %1184 = vmatprep.mubr.f32.mxu1 %v273_v8  ;;  %v382_v7 = vld [vmem:[#allocation2 + $0x3d8] sm:$0xff]  ;;  %v392_v8 = vld [vmem:[#allocation2 + $0x428] sm:$0xff] }
  0x93   : > { %1625 = vmatprep.subr.mxu1 %v3045_v0  ;;  %1372 = vmatprep.subr.mxu0 %v3045_v0 }
  0x94   : > { %930 = vmatmul.mubr.f32.gmra.mxu0 %v270_v9  ;;  %1185 = vmatmul.mubr.f32.gmra.mxu1 %v272_v10  ;;  %v394_v9 = vld [vmem:[#allocation2 + $0x438] sm:$0xff] }
  0x95   : > { %1626 = vmatpush1.msra.mxu1 %v788_v11  ;;  %1373 = vmatpush1.msra.mxu0 %v755_v12  ;;  %v778_v10 = vld [vmem:[%s3211_s21 + $0x328] sm:$0xff]  ;;  %v745_v11 = vld [vmem:[%s3211_s21 + $0x220] sm:$0xff]  ;;  %v391_v12 = vld [vmem:[#allocation2 + $0x420] sm:$0xff] }
  0x96   : > { %934 = vmatprep.mubr.f32.mxu0 %v282_v13  ;;  %1189 = vmatprep.mubr.f32.mxu1 %v284_v14  ;;  %v393_v13 = vld [vmem:[#allocation2 + $0x430] sm:$0xff]  ;;  %v403_v14 = vld [vmem:[#allocation2 + $0x480] sm:$0xff] }
  0x97   : > { %1627 = vmatprep.subr.mxu1 %v3045_v0  ;;  %1374 = vmatprep.subr.mxu0 %v3045_v0 }
  0x98   : > { %935 = vmatmul.mubr.f32.gmra.mxu0 %v281_v15  ;;  %1190 = vmatmul.mubr.f32.gmra.mxu1 %v283_v16  ;;  %v405_v15 = vld [vmem:[#allocation2 + $0x490] sm:$0xff]  ;;  %v744_v16 = vld [vmem:[%s3211_s21 + $0x218] sm:$0xff] }
  0x99   : > { %1628 = vmatpush1.msra.mxu1 %v787_v17  ;;  %939 = vmatprep.mubr.f32.mxu0 %v293_v18  ;;  %v777_v17 = vld [vmem:[%s3211_s21 + $0x320] sm:$0xff]  ;;  %v402_v18 = vld [vmem:[#allocation2 + $0x478] sm:$0xff] }
  0x9a   : > { %1194 = vmatprep.mubr.f32.mxu1 %v295_v19  ;;  %1375 = vmatpush1.msra.mxu0 %v754_v20  ;;  %v404_v19 = vld [vmem:[#allocation2 + $0x488] sm:$0xff]  ;;  %v414_v20 = vld [vmem:[#allocation2 + $0x4d8] sm:$0xff] }
  0x9b   : > { %1629 = vmatprep.subr.mxu1 %v3045_v0  ;;  %1376 = vmatprep.subr.mxu0 %v3045_v0 }
  0x9c   : > { %940 = vmatmul.mubr.f32.gmra.mxu0 %v292_v21  ;;  %1195 = vmatmul.mubr.f32.gmra.mxu1 %v294_v22  ;;  %v416_v21 = vld [vmem:[#allocation2 + $0x4e8] sm:$0xff] }
  0x9d   : > { %944 = vmatprep.mubr.f32.mxu0 %v304_v23  ;;  %1199 = vmatprep.mubr.f32.mxu1 %v306_v24  ;;  %v776_v22 = vld [vmem:[%s3211_s21 + $0x318] sm:$0xff]  ;;  %v743_v23 = vld [vmem:[%s3211_s21 + $0x210] sm:$0xff]  ;;  %v413_v24 = vld [vmem:[#allocation2 + $0x4d0] sm:$0xff] }
  0x9e   : > { %1630 = vmatpush1.msra.mxu1 %v786_v25  ;;  %1377 = vmatpush1.msra.mxu0 %v753_v26  ;;  %v415_v25 = vld [vmem:[#allocation2 + $0x4e0] sm:$0xff]  ;;  %v425_v26 = vld [vmem:[#allocation2 + $0x530] sm:$0xff] }
  0x9f   : > { %1378 = vmatprep.subr.mxu0 %v3045_v0  ;;  %1631 = vmatprep.subr.mxu1 %v3045_v0 }
  0xa0   : > { %945 = vmatmul.mubr.f32.gmra.mxu0 %v303_v27  ;;  %1200 = vmatmul.mubr.f32.gmra.mxu1 %v305_v28  ;;  %v427_v27 = vld [vmem:[#allocation2 + $0x540] sm:$0xff] }
  0xa1   : > { %949 = vmatprep.mubr.f32.mxu0 %v315_v29  ;;  %1204 = vmatprep.mubr.f32.mxu1 %v317_v30  ;;  %v775_v28 = vld [vmem:[%s3211_s21 + $0x310] sm:$0xff]  ;;  %v742_v29 = vld [vmem:[%s3211_s21 + $0x208] sm:$0xff]  ;;  %v424_v30 = vld [vmem:[#allocation2 + $0x528] sm:$0xff] }
  0xa2   : > { %1379 = vmatpush1.msra.mxu0 %v752_v31  ;;  %1632 = vmatpush1.msra.mxu1 %v785_v32  ;;  %v426_v31 = vld [vmem:[#allocation2 + $0x538] sm:$0xff]  ;;  %v436_v32 = vld [vmem:[#allocation2 + $0x588] sm:$0xff] }
  0xa3   : > { %1633 = vmatprep.subr.mxu1 %v3045_v0  ;;  %1380 = vmatprep.subr.mxu0 %v3045_v0 }
  0xa4   : > { %950 = vmatmul.mubr.f32.gmra.mxu0 %v314_v33  ;;  %1205 = vmatmul.mubr.f32.gmra.mxu1 %v316_v34  ;;  %v438_v33 = vld [vmem:[#allocation2 + $0x598] sm:$0xff] }
  0xa5   : > { %954 = vmatprep.mubr.f32.mxu0 %v326_v35  ;;  %1209 = vmatprep.mubr.f32.mxu1 %v328_v36  ;;  %v774_v34 = vld [vmem:[%s3211_s21 + $0x308] sm:$0xff]  ;;  %v741_v35 = vld [vmem:[%s3211_s21 + $0x200] sm:$0xff]  ;;  %v435_v36 = vld [vmem:[#allocation2 + $0x580] sm:$0xff] }
  0xa6   : > { %1634 = vmatpush1.msra.mxu1 %v784_v37  ;;  %1381 = vmatpush1.msra.mxu0 %v751_v38  ;;  %v437_v37 = vld [vmem:[#allocation2 + $0x590] sm:$0xff]  ;;  %v447_v38 = vld [vmem:[#allocation2 + $0x5e0] sm:$0xff] }
  0xa7   : > { %1635 = vmatprep.subr.mxu1 %v3045_v0  ;;  %1382 = vmatprep.subr.mxu0 %v3045_v0 }
  0xa8   : > { %955 = vmatmul.mubr.f32.gmra.mxu0 %v325_v39  ;;  %1210 = vmatmul.mubr.f32.gmra.mxu1 %v327_v40  ;;  %v449_v39 = vld [vmem:[#allocation2 + $0x5f0] sm:$0xff]  ;;  %v772_v40 = vld [vmem:[%s3211_s21 + $0x2f8] sm:$0xff] }
  0xa9   : > { %959 = vmatprep.mubr.f32.mxu0 %v337_v41  ;;  %1214 = vmatprep.mubr.f32.mxu1 %v339_v42  ;;  %v773_v41 = vld [vmem:[%s3211_s21 + $0x300] sm:$0xff]  ;;  %v446_v42 = vld [vmem:[#allocation2 + $0x5d8] sm:$0xff] }
  0xaa   : > { %1636 = vmatpush1.msra.mxu1 %v783_v43  ;;  %1383 = vmatpush1.msra.mxu0 %v750_v44  ;;  %v448_v43 = vld [vmem:[#allocation2 + $0x5e8] sm:$0xff]  ;;  %v458_v44 = vld [vmem:[#allocation2 + $0x638] sm:$0xff] }
  0xab   : > { %1637 = vmatprep.subr.mxu1 %v3045_v0  ;;  %1384 = vmatprep.subr.mxu0 %v3045_v0 }
  0xac   : > { %960 = vmatmul.mubr.f32.gmra.mxu0 %v336_v45  ;;  %1215 = vmatmul.mubr.f32.gmra.mxu1 %v338_v46  ;;  %v460_v45 = vld [vmem:[#allocation2 + $0x648] sm:$0xff] }
  0xad   : > { %964 = vmatprep.mubr.f32.mxu0 %v348_v47  ;;  %1219 = vmatprep.mubr.f32.mxu1 %v350_v48  ;;  %v804_v46 = vld [vmem:[%s3211_s21 + $0x3f8] sm:$0xff]  ;;  %v771_v47 = vld [vmem:[%s3211_s21 + $0x2f0] sm:$0xff]  ;;  %v457_v48 = vld [vmem:[#allocation2 + $0x630] sm:$0xff] }
  0xae   : > { %1638 = vmatpush1.msra.mxu1 %v782_v49  ;;  %1385 = vmatpush1.msra.mxu0 %v749_v50  ;;  %v459_v49 = vld [vmem:[#allocation2 + $0x640] sm:$0xff]  ;;  %v469_v50 = vld [vmem:[#allocation2 + $0x690] sm:$0xff] }
  0xaf   : > { %1386 = vmatprep.subr.mxu0 %v3045_v0  ;;  %1639 = vmatprep.subr.mxu1 %v3045_v0 }
  0xb0   : > { %965 = vmatmul.mubr.f32.gmra.mxu0 %v347_v51  ;;  %1220 = vmatmul.mubr.f32.gmra.mxu1 %v349_v52  ;;  %v471_v51 = vld [vmem:[#allocation2 + $0x6a0] sm:$0xff] }
  0xb1   : > { %969 = vmatprep.mubr.f32.mxu0 %v359_v53  ;;  %1224 = vmatprep.mubr.f32.mxu1 %v361_v54  ;;  %v803_v52 = vld [vmem:[%s3211_s21 + $0x3f0] sm:$0xff]  ;;  %v770_v53 = vld [vmem:[%s3211_s21 + $0x2e8] sm:$0xff]  ;;  %v468_v54 = vld [vmem:[#allocation2 + $0x688] sm:$0xff] }
  0xb2   : > { %1387 = vmatpush1.msra.mxu0 %v748_v55  ;;  %1640 = vmatpush1.msra.mxu1 %v781_v56  ;;  %v470_v55 = vld [vmem:[#allocation2 + $0x698] sm:$0xff]  ;;  %v480_v56 = vld [vmem:[#allocation2 + $0x6e8] sm:$0xff] }
  0xb3   : > { %1641 = vmatprep.subr.mxu1 %v3045_v0  ;;  %1388 = vmatprep.subr.mxu0 %v3045_v0 }
  0xb4   : > { %970 = vmatmul.mubr.f32.gmra.mxu0 %v358_v57  ;;  %1225 = vmatmul.mubr.f32.gmra.mxu1 %v360_v58  ;;  %v482_v57 = vld [vmem:[#allocation2 + $0x6f8] sm:$0xff] }
  0xb5   : > { %974 = vmatprep.mubr.f32.mxu0 %v370_v59  ;;  %1229 = vmatprep.mubr.f32.mxu1 %v372_v60  ;;  %v802_v58 = vld [vmem:[%s3211_s21 + $0x3e8] sm:$0xff]  ;;  %v769_v59 = vld [vmem:[%s3211_s21 + $0x2e0] sm:$0xff]  ;;  %v479_v60 = vld [vmem:[#allocation2 + $0x6e0] sm:$0xff] }
  0xb6   : > { %1642 = vmatpush1.msra.mxu1 %v780_v61  ;;  %1389 = vmatpush1.msra.mxu0 %v747_v62  ;;  %v481_v61 = vld [vmem:[#allocation2 + $0x6f0] sm:$0xff]  ;;  %v491_v62 = vld [vmem:[#allocation2 + $0x740] sm:$0xff] }
  0xb7   : > { %1643 = vmatprep.subr.mxu1 %v3045_v0  ;;  %1390 = vmatprep.subr.mxu0 %v3045_v0 }
  0xb8   : > { %975 = vmatmul.mubr.f32.gmra.mxu0 %v369_v63  ;;  %1230 = vmatmul.mubr.f32.gmra.mxu1 %v371_v1  ;;  %v493_v63 = vld [vmem:[#allocation2 + $0x750] sm:$0xff]  ;;  %v768_v1 = vld [vmem:[%s3211_s21 + $0x2d8] sm:$0xff] }
  0xb9   : > { %979 = vmatprep.mubr.f32.mxu0 %v381_v2  ;;  %1234 = vmatprep.mubr.f32.mxu1 %v383_v3  ;;  %v801_v2 = vld [vmem:[%s3211_s21 + $0x3e0] sm:$0xff]  ;;  %v490_v3 = vld [vmem:[#allocation2 + $0x738] sm:$0xff] }
  0xba   : > { %1644 = vmatpush1.msra.mxu1 %v779_v4  ;;  %1391 = vmatpush1.msra.mxu0 %v746_v5  ;;  %v492_v4 = vld [vmem:[#allocation2 + $0x748] sm:$0xff]  ;;  %v502_v5 = vld [vmem:[#allocation2 + $0x798] sm:$0xff] }
  0xbb   : > { %1645 = vmatprep.subr.mxu1 %v3045_v0  ;;  %1392 = vmatprep.subr.mxu0 %v3045_v0 }
  0xbc   : > { %980 = vmatmul.mubr.f32.gmra.mxu0 %v380_v6  ;;  %1235 = vmatmul.mubr.f32.gmra.mxu1 %v382_v7  ;;  %v504_v6 = vld [vmem:[#allocation2 + $0x7a8] sm:$0xff] }
  0xbd   : > { %984 = vmatprep.mubr.f32.mxu0 %v392_v8  ;;  %1239 = vmatprep.mubr.f32.mxu1 %v394_v9  ;;  %v800_v7 = vld [vmem:[%s3211_s21 + $0x3d8] sm:$0xff]  ;;  %v767_v8 = vld [vmem:[%s3211_s21 + $0x2d0] sm:$0xff]  ;;  %v501_v9 = vld [vmem:[#allocation2 + $0x790] sm:$0xff] }
  0xbe   : > { %1646 = vmatpush1.msra.mxu1 %v778_v10  ;;  %1393 = vmatpush1.msra.mxu0 %v745_v11  ;;  %v503_v10 = vld [vmem:[#allocation2 + $0x7a0] sm:$0xff]  ;;  %v513_v11 = vld [vmem:[#allocation2 + $0x7f0] sm:$0xff] }
  0xbf   : > { %1394 = vmatprep.subr.mxu0 %v3045_v0  ;;  %1647 = vmatprep.subr.mxu1 %v3045_v0 }
  0xc0   : > { %985 = vmatmul.mubr.f32.gmra.mxu0 %v391_v12  ;;  %1240 = vmatmul.mubr.f32.gmra.mxu1 %v393_v13  ;;  %v515_v12 = vld [vmem:[#allocation2 + $0x800] sm:$0xff] }
  0xc1   : > { %989 = vmatprep.mubr.f32.mxu0 %v403_v14  ;;  %1244 = vmatprep.mubr.f32.mxu1 %v405_v15  ;;  %v799_v13 = vld [vmem:[%s3211_s21 + $0x3d0] sm:$0xff]  ;;  %v766_v14 = vld [vmem:[%s3211_s21 + $0x2c8] sm:$0xff]  ;;  %v512_v15 = vld [vmem:[#allocation2 + $0x7e8] sm:$0xff] }
  0xc2   : > { %1395 = vmatpush1.msra.mxu0 %v744_v16  ;;  %1648 = vmatpush1.msra.mxu1 %v777_v17  ;;  %v514_v16 = vld [vmem:[#allocation2 + $0x7f8] sm:$0xff]  ;;  %v524_v17 = vld [vmem:[#allocation2 + $0x848] sm:$0xff] }
  0xc3   : > { %1649 = vmatprep.subr.mxu1 %v3045_v0  ;;  %1396 = vmatprep.subr.mxu0 %v3045_v0 }
  0xc4   : > { %990 = vmatmul.mubr.f32.gmra.mxu0 %v402_v18  ;;  %1245 = vmatmul.mubr.f32.gmra.mxu1 %v404_v19  ;;  %v526_v18 = vld [vmem:[#allocation2 + $0x858] sm:$0xff] }
  0xc5   : > { %994 = vmatprep.mubr.f32.mxu0 %v414_v20  ;;  %1249 = vmatprep.mubr.f32.mxu1 %v416_v21  ;;  %v798_v19 = vld [vmem:[%s3211_s21 + $0x3c8] sm:$0xff]  ;;  %v765_v20 = vld [vmem:[%s3211_s21 + $0x2c0] sm:$0xff]  ;;  %v523_v21 = vld [vmem:[#allocation2 + $0x840] sm:$0xff] }
  0xc6   : > { %1650 = vmatpush1.msra.mxu1 %v776_v22  ;;  %1397 = vmatpush1.msra.mxu0 %v743_v23  ;;  %v525_v22 = vld [vmem:[#allocation2 + $0x850] sm:$0xff]  ;;  %v535_v23 = vld [vmem:[#allocation2 + $0x8a0] sm:$0xff] }
  0xc7   : > { %1651 = vmatprep.subr.mxu1 %v3045_v0  ;;  %1398 = vmatprep.subr.mxu0 %v3045_v0 }
  0xc8   : > { %995 = vmatmul.mubr.f32.gmra.mxu0 %v413_v24  ;;  %1250 = vmatmul.mubr.f32.gmra.mxu1 %v415_v25  ;;  %v537_v24 = vld [vmem:[#allocation2 + $0x8b0] sm:$0xff]  ;;  %v764_v25 = vld [vmem:[%s3211_s21 + $0x2b8] sm:$0xff] }
  0xc9   : > { %999 = vmatprep.mubr.f32.mxu0 %v425_v26  ;;  %1254 = vmatprep.mubr.f32.mxu1 %v427_v27  ;;  %v797_v26 = vld [vmem:[%s3211_s21 + $0x3c0] sm:$0xff]  ;;  %v534_v27 = vld [vmem:[#allocation2 + $0x898] sm:$0xff] }
  0xca   : > { %1652 = vmatpush1.msra.mxu1 %v775_v28  ;;  %1399 = vmatpush1.msra.mxu0 %v742_v29  ;;  %v536_v28 = vld [vmem:[#allocation2 + $0x8a8] sm:$0xff]  ;;  %v546_v29 = vld [vmem:[#allocation2 + $0x8f8] sm:$0xff] }
  0xcb   : > { %1653 = vmatprep.subr.mxu1 %v3045_v0  ;;  %1400 = vmatprep.subr.mxu0 %v3045_v0 }
  0xcc   : > { %1000 = vmatmul.mubr.f32.gmra.mxu0 %v424_v30  ;;  %1255 = vmatmul.mubr.f32.gmra.mxu1 %v426_v31  ;;  %v548_v30 = vld [vmem:[#allocation2 + $0x908] sm:$0xff] }
  0xcd   : > { %1004 = vmatprep.mubr.f32.mxu0 %v436_v32  ;;  %1259 = vmatprep.mubr.f32.mxu1 %v438_v33  ;;  %v796_v31 = vld [vmem:[%s3211_s21 + $0x3b8] sm:$0xff]  ;;  %v763_v32 = vld [vmem:[%s3211_s21 + $0x2b0] sm:$0xff]  ;;  %v545_v33 = vld [vmem:[#allocation2 + $0x8f0] sm:$0xff] }
  0xce   : > { %1654 = vmatpush1.msra.mxu1 %v774_v34  ;;  %1401 = vmatpush1.msra.mxu0 %v741_v35  ;;  %v547_v34 = vld [vmem:[#allocation2 + $0x900] sm:$0xff]  ;;  %v557_v35 = vld [vmem:[#allocation2 + $0x950] sm:$0xff] }
  0xcf   : > { %1402 = vmatprep.subr.mxu0 %v3045_v0  ;;  %1655 = vmatprep.subr.mxu1 %v3045_v0 }
  0xd0   : > { %1005 = vmatmul.mubr.f32.gmra.mxu0 %v435_v36  ;;  %1260 = vmatmul.mubr.f32.gmra.mxu1 %v437_v37  ;;  %v559_v36 = vld [vmem:[#allocation2 + $0x960] sm:$0xff] }
  0xd1   : > { %1009 = vmatprep.mubr.f32.mxu0 %v447_v38  ;;  %1264 = vmatprep.mubr.f32.mxu1 %v449_v39  ;;  %v795_v37 = vld [vmem:[%s3211_s21 + $0x3b0] sm:$0xff]  ;;  %v762_v38 = vld [vmem:[%s3211_s21 + $0x2a8] sm:$0xff]  ;;  %v556_v39 = vld [vmem:[#allocation2 + $0x948] sm:$0xff] }
  0xd2   : > { %1403 = vmatpush2.msra.mxu0 %v772_v40  ;;  %1656 = vmatpush1.msra.mxu1 %v773_v41  ;;  %v558_v40 = vld [vmem:[#allocation2 + $0x958] sm:$0xff]  ;;  %v568_v41 = vld [vmem:[#allocation2 + $0x9a8] sm:$0xff] }
  0xd3   : > { %1657 = vmatprep.subr.mxu1 %v3045_v0  ;;  %1404 = vmatprep.subr.mxu0 %v3045_v0 }
  0xd4   : > { %1010 = vmatmul.mubr.f32.gmra.mxu0 %v446_v42  ;;  %1265 = vmatmul.mubr.f32.gmra.mxu1 %v448_v43  ;;  %v570_v42 = vld [vmem:[#allocation2 + $0x9b8] sm:$0xff] }
  0xd5   : > { %1014 = vmatprep.mubr.f32.mxu0 %v458_v44  ;;  %1269 = vmatprep.mubr.f32.mxu1 %v460_v45  ;;  %v794_v43 = vld [vmem:[%s3211_s21 + $0x3a8] sm:$0xff]  ;;  %v761_v44 = vld [vmem:[%s3211_s21 + $0x2a0] sm:$0xff]  ;;  %v567_v45 = vld [vmem:[#allocation2 + $0x9a0] sm:$0xff] }
  0xd6   : > { %1658 = vmatpush2.msra.mxu1 %v804_v46  ;;  %1405 = vmatpush2.msra.mxu0 %v771_v47  ;;  %v569_v46 = vld [vmem:[#allocation2 + $0x9b0] sm:$0xff]  ;;  %v579_v47 = vld [vmem:[#allocation2 + $0xa00] sm:$0xff] }
  0xd7   : > { %1659 = vmatprep.subr.mxu1 %v3045_v0  ;;  %1406 = vmatprep.subr.mxu0 %v3045_v0 }
  0xd8   : > { %1015 = vmatmul.mubr.f32.gmra.mxu0 %v457_v48  ;;  %1270 = vmatmul.mubr.f32.gmra.mxu1 %v459_v49  ;;  %v581_v48 = vld [vmem:[#allocation2 + $0xa10] sm:$0xff]  ;;  %v760_v49 = vld [vmem:[%s3211_s21 + $0x298] sm:$0xff] }
  0xd9   : > { %1019 = vmatprep.mubr.f32.mxu0 %v469_v50  ;;  %1274 = vmatprep.mubr.f32.mxu1 %v471_v51  ;;  %v793_v50 = vld [vmem:[%s3211_s21 + $0x3a0] sm:$0xff]  ;;  %v578_v51 = vld [vmem:[#allocation2 + $0x9f8] sm:$0xff] }
  0xda   : > { %1660 = vmatpush2.msra.mxu1 %v803_v52  ;;  %1407 = vmatpush2.msra.mxu0 %v770_v53  ;;  %v580_v52 = vld [vmem:[#allocation2 + $0xa08] sm:$0xff]  ;;  %v590_v53 = vld [vmem:[#allocation2 + $0xa58] sm:$0xff] }
  0xdb   : > { %1661 = vmatprep.subr.mxu1 %v3045_v0  ;;  %1408 = vmatprep.subr.mxu0 %v3045_v0 }
  0xdc   : > { %1020 = vmatmul.mubr.f32.gmra.mxu0 %v468_v54  ;;  %1275 = vmatmul.mubr.f32.gmra.mxu1 %v470_v55  ;;  %v592_v54 = vld [vmem:[#allocation2 + $0xa68] sm:$0xff] }
  0xdd   : > { %1024 = vmatprep.mubr.f32.mxu0 %v480_v56  ;;  %1279 = vmatprep.mubr.f32.mxu1 %v482_v57  ;;  %v792_v55 = vld [vmem:[%s3211_s21 + $0x398] sm:$0xff]  ;;  %v759_v56 = vld [vmem:[%s3211_s21 + $0x290] sm:$0xff]  ;;  %v589_v57 = vld [vmem:[#allocation2 + $0xa50] sm:$0xff] }
  0xde   : > { %1662 = vmatpush2.msra.mxu1 %v802_v58  ;;  %1409 = vmatpush2.msra.mxu0 %v769_v59  ;;  %v591_v58 = vld [vmem:[#allocation2 + $0xa60] sm:$0xff]  ;;  %v601_v59 = vld [vmem:[#allocation2 + $0xab0] sm:$0xff] }
  0xdf   : > { %1410 = vmatprep.subr.mxu0 %v3045_v0  ;;  %1663 = vmatprep.subr.mxu1 %v3045_v0 }
  0xe0   : > { %1025 = vmatmul.mubr.f32.gmra.mxu0 %v479_v60  ;;  %1280 = vmatmul.mubr.f32.gmra.mxu1 %v481_v61  ;;  %v603_v60 = vld [vmem:[#allocation2 + $0xac0] sm:$0xff] }
  0xe1   : > { %1029 = vmatprep.mubr.f32.mxu0 %v491_v62  ;;  %1284 = vmatprep.mubr.f32.mxu1 %v493_v63  ;;  %v791_v61 = vld [vmem:[%s3211_s21 + $0x390] sm:$0xff]  ;;  %v758_v62 = vld [vmem:[%s3211_s21 + $0x288] sm:$0xff]  ;;  %v600_v63 = vld [vmem:[#allocation2 + $0xaa8] sm:$0xff] }
  0xe2   : > { %1411 = vmatpush2.msra.mxu0 %v768_v1  ;;  %1664 = vmatpush2.msra.mxu1 %v801_v2  ;;  %v602_v1 = vld [vmem:[#allocation2 + $0xab8] sm:$0xff]  ;;  %v612_v2 = vld [vmem:[#allocation2 + $0xb08] sm:$0xff] }
  0xe3   : > { %1665 = vmatprep.subr.mxu1 %v3045_v0  ;;  %1412 = vmatprep.subr.mxu0 %v3045_v0 }
  0xe4   : > { %1030 = vmatmul.mubr.f32.gmra.mxu0 %v490_v3  ;;  %1285 = vmatmul.mubr.f32.gmra.mxu1 %v492_v4  ;;  %v614_v3 = vld [vmem:[#allocation2 + $0xb18] sm:$0xff] }
  0xe5   : > { %1034 = vmatprep.mubr.f32.mxu0 %v502_v5  ;;  %1289 = vmatprep.mubr.f32.mxu1 %v504_v6  ;;  %v790_v4 = vld [vmem:[%s3211_s21 + $0x388] sm:$0xff]  ;;  %v757_v5 = vld [vmem:[%s3211_s21 + $0x280] sm:$0xff]  ;;  %v611_v6 = vld [vmem:[#allocation2 + $0xb00] sm:$0xff] }
  0xe6   : > { %1666 = vmatpush2.msra.mxu1 %v800_v7  ;;  %1413 = vmatpush2.msra.mxu0 %v767_v8  ;;  %v613_v7 = vld [vmem:[#allocation2 + $0xb10] sm:$0xff]  ;;  %v623_v8 = vld [vmem:[#allocation2 + $0xb60] sm:$0xff] }
  0xe7   : > { %1667 = vmatprep.subr.mxu1 %v3045_v0  ;;  %1414 = vmatprep.subr.mxu0 %v3045_v0 }
  0xe8   : > { %1035 = vmatmul.mubr.f32.gmra.mxu0 %v501_v9  ;;  %1290 = vmatmul.mubr.f32.gmra.mxu1 %v503_v10  ;;  %v625_v9 = vld [vmem:[#allocation2 + $0xb70] sm:$0xff] }
  0xe9   : > { %1039 = vmatprep.mubr.f32.mxu0 %v513_v11  ;;  %1294 = vmatprep.mubr.f32.mxu1 %v515_v12  ;;  %v789_v10 = vld [vmem:[%s3211_s21 + $0x380] sm:$0xff]  ;;  %v622_v11 = vld [vmem:[#allocation2 + $0xb58] sm:$0xff]  ;;  %v624_v12 = vld [vmem:[#allocation2 + $0xb68] sm:$0xff] }
  0xea   : > { %1668 = vmatpush2.msra.mxu1 %v799_v13  ;;  %1415 = vmatpush2.msra.mxu0 %v766_v14  ;;  %v634_v13 = vld [vmem:[#allocation2 + $0xbb8] sm:$0xff]  ;;  %v636_v14 = vld [vmem:[#allocation2 + $0xbc8] sm:$0xff] }
  0xeb   : > { %1669 = vmatprep.subr.mxu1 %v3045_v0  ;;  %1416 = vmatprep.subr.mxu0 %v3045_v0 }
  0xec   : > { %1040 = vmatmul.mubr.f32.gmra.mxu0 %v512_v15  ;;  %1295 = vmatmul.mubr.f32.gmra.mxu1 %v514_v16  ;;  %v633_v15 = vld [vmem:[#allocation2 + $0xbb0] sm:$0xff]  ;;  %v635_v16 = vld [vmem:[#allocation2 + $0xbc0] sm:$0xff] }
  0xed   : > { %1044 = vmatprep.mubr.f32.mxu0 %v524_v17  ;;  %1299 = vmatprep.mubr.f32.mxu1 %v526_v18  ;;  %v645_v17 = vld [vmem:[#allocation2 + $0xc10] sm:$0xff]  ;;  %v647_v18 = vld [vmem:[#allocation2 + $0xc20] sm:$0xff] }
  0xee   : > { %1670 = vmatpush2.msra.mxu1 %v798_v19  ;;  %1417 = vmatpush2.msra.mxu0 %v765_v20  ;;  %v644_v19 = vld [vmem:[#allocation2 + $0xc08] sm:$0xff]  ;;  %v646_v20 = vld [vmem:[#allocation2 + $0xc18] sm:$0xff] }
  0xef   : > { %1418 = vmatprep.subr.mxu0 %v3045_v0  ;;  %1671 = vmatprep.subr.mxu1 %v3045_v0 }
  0xf0   : > { %1045 = vmatmul.mubr.f32.gmra.mxu0 %v523_v21  ;;  %1300 = vmatmul.mubr.f32.gmra.mxu1 %v525_v22  ;;  %v656_v21 = vld [vmem:[#allocation2 + $0xc68] sm:$0xff]  ;;  %v658_v22 = vld [vmem:[#allocation2 + $0xc78] sm:$0xff] }
  0xf1   : > { %1049 = vmatprep.mubr.f32.mxu0 %v535_v23  ;;  %1304 = vmatprep.mubr.f32.mxu1 %v537_v24  ;;  %v655_v23 = vld [vmem:[#allocation2 + $0xc60] sm:$0xff]  ;;  %v657_v24 = vld [vmem:[#allocation2 + $0xc70] sm:$0xff] }
  0xf2   : > { %1419 = vmatpush2.msra.mxu0 %v764_v25  ;;  %1672 = vmatpush2.msra.mxu1 %v797_v26  ;;  %v667_v25 = vld [vmem:[#allocation2 + $0xcc0] sm:$0xff]  ;;  %v669_v26 = vld [vmem:[#allocation2 + $0xcd0] sm:$0xff] }
  0xf3   : > { %1673 = vmatprep.subr.mxu1 %v3045_v0  ;;  %1420 = vmatprep.subr.mxu0 %v3045_v0 }
  0xf4   : > { %1050 = vmatmul.mubr.f32.gmra.mxu0 %v534_v27  ;;  %1305 = vmatmul.mubr.f32.gmra.mxu1 %v536_v28  ;;  %v666_v27 = vld [vmem:[#allocation2 + $0xcb8] sm:$0xff]  ;;  %v668_v28 = vld [vmem:[#allocation2 + $0xcc8] sm:$0xff] }
  0xf5   : > { %1054 = vmatprep.mubr.f32.mxu0 %v546_v29  ;;  %1309 = vmatprep.mubr.f32.mxu1 %v548_v30  ;;  %v264_v29 = vld [vmem:[#allocation2 + $0x28] sm:$0xff]  ;;  %v266_v30 = vld [vmem:[#allocation2 + $0x38] sm:$0xff] }
  0xf6   : > { %1674 = vmatpush2.msra.mxu1 %v796_v31  ;;  %1421 = vmatpush2.msra.mxu0 %v763_v32  ;;  %v263_v31 = vld [vmem:[#allocation2 + $0x20] sm:$0xff]  ;;  %v265_v32 = vld [vmem:[#allocation2 + $0x30] sm:$0xff] }
  0xf7   : > { %1675 = vmatprep.subr.mxu1 %v3045_v0  ;;  %1422 = vmatprep.subr.mxu0 %v3045_v0 }
  0xf8   : > { %1055 = vmatmul.mubr.f32.gmra.mxu0 %v545_v33  ;;  %1310 = vmatmul.mubr.f32.gmra.mxu1 %v547_v34  ;;  %v820_v33 = vld [vmem:[%s3211_s21 + $0x478] sm:$0xff]  ;;  %v275_v34 = vld [vmem:[#allocation2 + $0x80] sm:$0xff] }
  0xf9   : > { %1059 = vmatprep.mubr.f32.mxu0 %v557_v35  ;;  %1314 = vmatprep.mubr.f32.mxu1 %v559_v36  ;;  %v277_v35 = vld [vmem:[#allocation2 + $0x90] sm:$0xff]  ;;  %v274_v36 = vld [vmem:[#allocation2 + $0x78] sm:$0xff] }
  0xfa   : > { %1676 = vmatpush2.msra.mxu1 %v795_v37  ;;  %1423 = vmatpush2.msra.mxu0 %v762_v38  ;;  %v276_v37 = vld [vmem:[#allocation2 + $0x88] sm:$0xff]  ;;  %v819_v38 = vld [vmem:[%s3211_s21 + $0x470] sm:$0xff] }
  0xfb   : > { %1677 = vmatprep.subr.mxu1 %v3045_v0  ;;  %1424 = vmatprep.subr.mxu0 %v3045_v0 }
  0xfc   : > { %1060 = vmatmul.mubr.f32.gmra.mxu0 %v556_v39  ;;  %1315 = vmatmul.mubr.f32.gmra.mxu1 %v558_v40  ;;  %v286_v39 = vld [vmem:[#allocation2 + $0xd8] sm:$0xff]  ;;  %v288_v40 = vld [vmem:[#allocation2 + $0xe8] sm:$0xff] }
  0xfd   : > { %1064 = vmatprep.mubr.f32.mxu0 %v568_v41  ;;  %1319 = vmatprep.mubr.f32.mxu1 %v570_v42  ;;  %v285_v41 = vld [vmem:[#allocation2 + $0xd0] sm:$0xff]  ;;  %v287_v42 = vld [vmem:[#allocation2 + $0xe0] sm:$0xff] }
  0xfe   : > { %1678 = vmatpush2.msra.mxu1 %v794_v43  ;;  %1425 = vmatpush2.msra.mxu0 %v761_v44  ;;  %v297_v43 = vld [vmem:[#allocation2 + $0x130] sm:$0xff]  ;;  %v299_v44 = vld [vmem:[#allocation2 + $0x140] sm:$0xff] }
  0xff   : > { %1426 = vmatprep.subr.mxu0 %v3045_v0  ;;  %1679 = vmatprep.subr.mxu1 %v3045_v0 }
 0x100   : > { %1065 = vmatmul.mubr.f32.gmra.mxu0 %v567_v45  ;;  %1320 = vmatmul.mubr.f32.gmra.mxu1 %v569_v46  ;;  %v818_v45 = vld [vmem:[%s3211_s21 + $0x468] sm:$0xff]  ;;  %v296_v46 = vld [vmem:[#allocation2 + $0x128] sm:$0xff] }
 0x101   : > { %1069 = vmatprep.mubr.f32.mxu0 %v579_v47  ;;  %1324 = vmatprep.mubr.f32.mxu1 %v581_v48  ;;  %v298_v47 = vld [vmem:[#allocation2 + $0x138] sm:$0xff]  ;;  %v308_v48 = vld [vmem:[#allocation2 + $0x188] sm:$0xff] }
 0x102   : > { %1427 = vmatpush2.msra.mxu0 %v760_v49  ;;  %1680 = vmatpush2.msra.mxu1 %v793_v50  ;;  %v310_v49 = vld [vmem:[#allocation2 + $0x198] sm:$0xff]  ;;  %v817_v50 = vld [vmem:[%s3211_s21 + $0x460] sm:$0xff] }
 0x103   : > { %1681 = vmatprep.subr.mxu1 %v3045_v0  ;;  %1428 = vmatprep.subr.mxu0 %v3045_v0 }
 0x104   : > { %1070 = vmatmul.mubr.f32.gmra.mxu0 %v578_v51  ;;  %1325 = vmatmul.mubr.f32.gmra.mxu1 %v580_v52  ;;  %v307_v51 = vld [vmem:[#allocation2 + $0x180] sm:$0xff]  ;;  %v309_v52 = vld [vmem:[#allocation2 + $0x190] sm:$0xff] }
 0x105   : > { %1074 = vmatprep.mubr.f32.mxu0 %v590_v53  ;;  %1329 = vmatprep.mubr.f32.mxu1 %v592_v54  ;;  %v319_v53 = vld [vmem:[#allocation2 + $0x1e0] sm:$0xff]  ;;  %v321_v54 = vld [vmem:[#allocation2 + $0x1f0] sm:$0xff] }
 0x106   : > { %1682 = vmatpush2.msra.mxu1 %v792_v55  ;;  %1429 = vmatpush2.msra.mxu0 %v759_v56  ;;  %v816_v55 = vld [vmem:[%s3211_s21 + $0x458] sm:$0xff]  ;;  %v318_v56 = vld [vmem:[#allocation2 + $0x1d8] sm:$0xff] }
 0x107   : > { %1683 = vmatprep.subr.mxu1 %v3045_v0  ;;  %1430 = vmatprep.subr.mxu0 %v3045_v0 }
 0x108   : > { %1075 = vmatmul.mubr.f32.gmra.mxu0 %v589_v57  ;;  %1330 = vmatmul.mubr.f32.gmra.mxu1 %v591_v58  ;;  %v320_v57 = vld [vmem:[#allocation2 + $0x1e8] sm:$0xff]  ;;  %v330_v58 = vld [vmem:[#allocation2 + $0x238] sm:$0xff] }
 0x109   : > { %1079 = vmatprep.mubr.f32.mxu0 %v601_v59  ;;  %1334 = vmatprep.mubr.f32.mxu1 %v603_v60  ;;  %v332_v59 = vld [vmem:[#allocation2 + $0x248] sm:$0xff]  ;;  %v815_v60 = vld [vmem:[%s3211_s21 + $0x450] sm:$0xff] }
 0x10a   : > { %1684 = vmatpush2.msra.mxu1 %v791_v61  ;;  %1431 = vmatpush2.msra.mxu0 %v758_v62  ;;  %v329_v61 = vld [vmem:[#allocation2 + $0x230] sm:$0xff]  ;;  %v331_v62 = vld [vmem:[#allocation2 + $0x240] sm:$0xff] }
 0x10b   : > { %1685 = vmatprep.subr.mxu1 %v3045_v0  ;;  %1432 = vmatprep.subr.mxu0 %v3045_v0 }
 0x10c   : > { %1080 = vmatmul.mubr.f32.gmra.mxu0 %v600_v63  ;;  %1335 = vmatmul.mubr.f32.gmra.mxu1 %v602_v1  ;;  %v341_v63 = vld [vmem:[#allocation2 + $0x290] sm:$0xff]  ;;  %v343_v1 = vld [vmem:[#allocation2 + $0x2a0] sm:$0xff] }
 0x10d   : > { %1084 = vmatprep.mubr.f32.mxu0 %v612_v2  ;;  %1339 = vmatprep.mubr.f32.mxu1 %v614_v3  ;;  %v814_v2 = vld [vmem:[%s3211_s21 + $0x448] sm:$0xff]  ;;  %v340_v3 = vld [vmem:[#allocation2 + $0x288] sm:$0xff] }
 0x10e   : > { %1686 = vmatpush2.msra.mxu1 %v790_v4  ;;  %1433 = vmatpush2.msra.mxu0 %v757_v5  ;;  %v342_v4 = vld [vmem:[#allocation2 + $0x298] sm:$0xff]  ;;  %v352_v5 = vld [vmem:[#allocation2 + $0x2e8] sm:$0xff] }
 0x10f   : > { %1687 = vmatprep.subr.mxu1 %v3045_v0  ;;  %1880 = vmatprep.subr.mxu0 %v3045_v0 }
 0x110   : > { %1085 = vmatmul.mubr.f32.gmra.mxu0 %v611_v6  ;;  %1340 = vmatmul.mubr.f32.gmra.mxu1 %v613_v7  ;;  %v354_v6 = vld [vmem:[#allocation2 + $0x2f8] sm:$0xff]  ;;  %v813_v7 = vld [vmem:[%s3211_s21 + $0x440] sm:$0xff] }
 0x111   : > { %1089 = vmatprep.mubr.f32.mxu0 %v623_v8  ;;  %1344 = vmatprep.mubr.f32.mxu1 %v625_v9  ;;  %v351_v8 = vld [vmem:[#allocation2 + $0x2e0] sm:$0xff]  ;;  %v353_v9 = vld [vmem:[#allocation2 + $0x2f0] sm:$0xff] }
 0x112   : > { %1688 = vmatpush2.msra.mxu1 %v789_v10  ;;  %v363_v10 = vld [vmem:[#allocation2 + $0x340] sm:$0xff] }
 0x113   : > { %2714 = vmatprep.subr.mxu1 %v3045_v0 }
 0x114   : > { %1090 = vmatmul.mubr.f32.gmra.mxu0 %v622_v11  ;;  %1345 = vmatmul.mubr.f32.gmra.mxu1 %v624_v12  ;;  %v365_v11 = vld [vmem:[#allocation2 + $0x350] sm:$0xff]  ;;  %v812_v12 = vld [vmem:[%s3211_s21 + $0x438] sm:$0xff] }
 0x115   : > { %1094 = vmatprep.mubr.f32.mxu0 %v634_v13  ;;  %1349 = vmatprep.mubr.f32.mxu1 %v636_v14  ;;  %v362_v13 = vld [vmem:[#allocation2 + $0x338] sm:$0xff]  ;;  %v364_v14 = vld [vmem:[#allocation2 + $0x348] sm:$0xff] }
 0x118   : > { %1095 = vmatmul.mubr.f32.gmra.mxu0 %v633_v15  ;;  %1350 = vmatmul.mubr.f32.gmra.mxu1 %v635_v16  ;;  %v374_v15 = vld [vmem:[#allocation2 + $0x398] sm:$0xff]  ;;  %v376_v16 = vld [vmem:[#allocation2 + $0x3a8] sm:$0xff] }
 0x119   : > { %1099 = vmatprep.mubr.f32.mxu0 %v645_v17  ;;  %1354 = vmatprep.mubr.f32.mxu1 %v647_v18  ;;  %v811_v17 = vld [vmem:[%s3211_s21 + $0x430] sm:$0xff]  ;;  %v373_v18 = vld [vmem:[#allocation2 + $0x390] sm:$0xff] }
 0x11c   : > { %1100 = vmatmul.mubr.f32.gmra.mxu0 %v644_v19  ;;  %1355 = vmatmul.mubr.f32.gmra.mxu1 %v646_v20  ;;  %v375_v19 = vld [vmem:[#allocation2 + $0x3a0] sm:$0xff] }
 0x11d   : > { %1104 = vmatprep.mubr.f32.mxu0 %v656_v21  ;;  %1359 = vmatprep.mubr.f32.mxu1 %v658_v22  ;;  %v3506_v20 = vld [vmem:[%s230_s5] ss:$0 sm:$0xff]  ;;  %v385_v21 = vld [vmem:[#allocation2 + $0x3f0] sm:$0xff] }
 0x11e   : > { %v387_v22 = vld [vmem:[#allocation2 + $0x400] sm:$0xff] }
 0x120   : > { %1105 = vmatmul.mubr.f32.gmra.mxu0 %v655_v23  ;;  %1360 = vmatmul.mubr.f32.gmra.mxu1 %v657_v24  ;;  %v810_v23 = vld [vmem:[%s3211_s21 + $0x428] sm:$0xff] }
 0x121   : > { %1109 = vmatprep.mubr.f32.mxu0 %v667_v25  ;;  %1364 = vmatprep.mubr.f32.mxu1 %v669_v26 }
 0x124   : > { %1110 = vmatmul.mubr.f32.gmra.mxu0 %v666_v27  ;;  %1365 = vmatmul.mubr.f32.gmra.mxu1 %v668_v28  ;;  %v384_v27 = vld [vmem:[#allocation2 + $0x3e8] sm:$0xff]  ;;  %v386_v28 = vld [vmem:[#allocation2 + $0x3f8] sm:$0xff] }
 0x125   : > { %1434 = vmatprep.mubr.f32.mxu0 %v264_v29  ;;  %1689 = vmatprep.mubr.f32.mxu1 %v266_v30 }
 0x128   : > { %1435 = vmatmul.mubr.f32.vlgmr.msra.gmra.mxu0 %v263_v31  ;;  %1690 = vmatmul.mubr.f32.vlgmr.msra.gmra.mxu1 %v265_v32  ;;  %v396_v31 = vld [vmem:[#allocation2 + $0x448] sm:$0xff]  ;;  %v398_v32 = vld [vmem:[#allocation2 + $0x458] sm:$0xff] }
 0x129   : > { %1881 = vmatpush1.msra.mxu0 %v820_v33  ;;  %1439 = vmatprep.mubr.f32.mxu0 %v275_v34  ;;  %v809_v34 = vld [vmem:[%s3211_s21 + $0x420] sm:$0xff] }
 0x12a   : > { %1694 = vmatprep.mubr.f32.mxu1 %v277_v35  ;;  %2746 = vmatpush1.msra.mxu1 %v820_v33 }
 0x12b   : > { %1882 = vmatprep.subr.mxu0 %v3045_v0  ;;  %2715 = vmatprep.subr.mxu1 %v3045_v0 }
 0x12c   : > { %1440 = vmatmul.mubr.f32.gmra.mxu0 %v274_v36  ;;  %1695 = vmatmul.mubr.f32.gmra.mxu1 %v276_v37 }
 0x12d   : > { %1883 = vmatpush1.msra.mxu0 %v819_v38  ;;  %1444 = vmatprep.mubr.f32.mxu0 %v286_v39  ;;  %v397_v39 = vld [vmem:[#allocation2 + $0x450] sm:$0xff] }
 0x12e   : > { %1699 = vmatprep.mubr.f32.mxu1 %v288_v40  ;;  %2747 = vmatpush1.msra.mxu1 %v819_v38  ;;  %v395_v38 = vld [vmem:[#allocation2 + $0x440] sm:$0xff] }
 0x12f   : > { %1884 = vmatprep.subr.mxu0 %v3045_v0  ;;  %2716 = vmatprep.subr.mxu1 %v3045_v0 }
 0x130   : > { %1445 = vmatmul.mubr.f32.gmra.mxu0 %v285_v41  ;;  %1700 = vmatmul.mubr.f32.gmra.mxu1 %v287_v42  ;;  %v407_v42 = vld [vmem:[#allocation2 + $0x4a0] sm:$0xff] }
 0x131   : > { %1449 = vmatprep.mubr.f32.mxu0 %v297_v43  ;;  %1704 = vmatprep.mubr.f32.mxu1 %v299_v44  ;;  %v409_v43 = vld [vmem:[#allocation2 + $0x4b0] sm:$0xff] }
 0x132   : > { %1885 = vmatpush1.msra.mxu0 %v818_v45  ;;  %2748 = vmatpush1.msra.mxu1 %v818_v45  ;;  %v808_v45 = vld [vmem:[%s3211_s21 + $0x418] sm:$0xff] }
 0x133   : > { %1886 = vmatprep.subr.mxu0 %v3045_v0  ;;  %2717 = vmatprep.subr.mxu1 %v3045_v0 }
 0x134   : > { %1450 = vmatmul.mubr.f32.gmra.mxu0 %v296_v46  ;;  %1705 = vmatmul.mubr.f32.gmra.mxu1 %v298_v47 }
 0x135   : > { %1454 = vmatprep.mubr.f32.mxu0 %v308_v48  ;;  %1709 = vmatprep.mubr.f32.mxu1 %v310_v49  ;;  %v406_v49 = vld [vmem:[#allocation2 + $0x498] sm:$0xff] }
 0x136   : > { %1887 = vmatpush1.msra.mxu0 %v817_v50  ;;  %2749 = vmatpush1.msra.mxu1 %v817_v50  ;;  %v408_v50 = vld [vmem:[#allocation2 + $0x4a8] sm:$0xff] }
 0x137   : > { %1888 = vmatprep.subr.mxu0 %v3045_v0  ;;  %2718 = vmatprep.subr.mxu1 %v3045_v0 }
 0x138   : > { %1455 = vmatmul.mubr.f32.gmra.mxu0 %v307_v51  ;;  %1710 = vmatmul.mubr.f32.gmra.mxu1 %v309_v52 }
 0x139   : > { %1459 = vmatprep.mubr.f32.mxu0 %v319_v53  ;;  %1714 = vmatprep.mubr.f32.mxu1 %v321_v54  ;;  %v418_v53 = vld [vmem:[#allocation2 + $0x4f8] sm:$0xff]  ;;  %v420_v54 = vld [vmem:[#allocation2 + $0x508] sm:$0xff] }
 0x13a   : > { %1889 = vmatpush1.msra.mxu0 %v816_v55  ;;  %2750 = vmatpush1.msra.mxu1 %v816_v55 }
 0x13b   : > { %1890 = vmatprep.subr.mxu0 %v3045_v0  ;;  %2719 = vmatprep.subr.mxu1 %v3045_v0 }
 0x13c   : > { %1460 = vmatmul.mubr.f32.gmra.mxu0 %v318_v56  ;;  %1715 = vmatmul.mubr.f32.gmra.mxu1 %v320_v57  ;;  %v807_v56 = vld [vmem:[%s3211_s21 + $0x410] sm:$0xff] }
 0x13d   : > { %1464 = vmatprep.mubr.f32.mxu0 %v330_v58  ;;  %1719 = vmatprep.mubr.f32.mxu1 %v332_v59 }
 0x13e   : > { %1891 = vmatpush1.msra.mxu0 %v815_v60  ;;  %2751 = vmatpush1.msra.mxu1 %v815_v60  ;;  %v417_v60 = vld [vmem:[#allocation2 + $0x4f0] sm:$0xff] }
 0x13f   : > { %1892 = vmatprep.subr.mxu0 %v3045_v0  ;;  %2720 = vmatprep.subr.mxu1 %v3045_v0 }
 0x140   : > { %1465 = vmatmul.mubr.f32.gmra.mxu0 %v329_v61  ;;  %1720 = vmatmul.mubr.f32.gmra.mxu1 %v331_v62  ;;  %v419_v61 = vld [vmem:[#allocation2 + $0x500] sm:$0xff] }
 0x141   : > { %1469 = vmatprep.mubr.f32.mxu0 %v341_v63  ;;  %1724 = vmatprep.mubr.f32.mxu1 %v343_v1  ;;  %v429_v1 = vld [vmem:[#allocation2 + $0x550] sm:$0xff] }
 0x142   : > { %1893 = vmatpush1.msra.mxu0 %v814_v2  ;;  %2752 = vmatpush1.msra.mxu1 %v814_v2  ;;  %v431_v2 = vld [vmem:[#allocation2 + $0x560] sm:$0xff] }
 0x143   : > { %1894 = vmatprep.subr.mxu0 %v3045_v0  ;;  %2721 = vmatprep.subr.mxu1 %v3045_v0 }
 0x144   : > { %1470 = vmatmul.mubr.f32.gmra.mxu0 %v340_v3  ;;  %1725 = vmatmul.mubr.f32.gmra.mxu1 %v342_v4  ;;  %v806_v4 = vld [vmem:[%s3211_s21 + $0x408] sm:$0xff] }
 0x145   : > { %1474 = vmatprep.mubr.f32.mxu0 %v352_v5  ;;  %1729 = vmatprep.mubr.f32.mxu1 %v354_v6 }
 0x146   : > { %1895 = vmatpush1.msra.mxu0 %v813_v7  ;;  %2753 = vmatpush1.msra.mxu1 %v813_v7 }
 0x147   : > { %1896 = vmatprep.subr.mxu0 %v3045_v0  ;;  %2722 = vmatprep.subr.mxu1 %v3045_v0 }
 0x148   : > { %1475 = vmatmul.mubr.f32.gmra.mxu0 %v351_v8  ;;  %1730 = vmatmul.mubr.f32.gmra.mxu1 %v353_v9  ;;  %v428_v8 = vld [vmem:[#allocation2 + $0x548] sm:$0xff]  ;;  %v430_v9 = vld [vmem:[#allocation2 + $0x558] sm:$0xff] }
 0x149   : > { %1479 = vmatprep.mubr.f32.mxu0 %v363_v10  ;;  %1734 = vmatprep.mubr.f32.mxu1 %v365_v11 }
 0x14a   : > { %1897 = vmatpush1.msra.mxu0 %v812_v12  ;;  %2754 = vmatpush1.msra.mxu1 %v812_v12  ;;  %v440_v12 = vld [vmem:[#allocation2 + $0x5a8] sm:$0xff] }
 0x14b   : > { %1898 = vmatprep.subr.mxu0 %v3045_v0  ;;  %2723 = vmatprep.subr.mxu1 %v3045_v0 }
 0x14c   : > { %1480 = vmatmul.mubr.f32.gmra.mxu0 %v362_v13  ;;  %1735 = vmatmul.mubr.f32.gmra.mxu1 %v364_v14  ;;  %v442_v13 = vld [vmem:[#allocation2 + $0x5b8] sm:$0xff] }
 0x14d   : > { %1484 = vmatprep.mubr.f32.mxu0 %v374_v15  ;;  %1739 = vmatprep.mubr.f32.mxu1 %v376_v16  ;;  %v805_v15 = vld [vmem:[%s3211_s21 + $0x400] sm:$0xff] }
 0x14e   : > { %1899 = vmatpush1.msra.mxu0 %v811_v17  ;;  %2755 = vmatpush1.msra.mxu1 %v811_v17 }
 0x14f   : > { %1900 = vmatprep.subr.mxu0 %v3045_v0  ;;  %2724 = vmatprep.subr.mxu1 %v3045_v0 }
 0x150   : > { %v926_v24 = vpop.f32.mrf.mxu0  ;;  %v1181_v25 = vpop.f32.mrf.mxu1  ;;  %1485 = vmatmul.mubr.f32.gmra.mxu0 %v373_v18  ;;  %1740 = vmatmul.mubr.f32.gmra.mxu1 %v375_v19  ;;  %v439_v19 = vld [vmem:[#allocation2 + $0x5a0] sm:$0xff] }
 0x151   : > { %v927_v26 = vadd.f32 %v3506_v20, %v926_v24  ;;  %1489 = vmatprep.mubr.f32.mxu0 %v385_v21  ;;  %1744 = vmatprep.mubr.f32.mxu1 %v387_v22  ;;  %v441_v21 = vld [vmem:[#allocation2 + $0x5b0] sm:$0xff]  ;;  %v451_v24 = vld [vmem:[#allocation2 + $0x600] sm:$0xff] }
 0x152   : > { %v928_v29 = vpop.f32.mrf.mxu0  ;;  %v1183_v30 = vpop.f32.mrf.mxu1  ;;  %1901 = vmatpush1.msra.mxu0 %v810_v23  ;;  %2756 = vmatpush1.msra.mxu1 %v810_v23 }
 0x153   : > { %v3512_v33 = vadd.f32 %v1181_v25, %v927_v26  ;;  %1902 = vmatprep.subr.mxu0 %v3045_v0  ;;  %2725 = vmatprep.subr.mxu1 %v3045_v0  ;;  %v453_v25 = vld [vmem:[#allocation2 + $0x610] sm:$0xff] }
 0x154   : > { %v931_v35 = vpop.f32.mrf.mxu0  ;;  %v1186_v36 = vpop.f32.mrf.mxu1  ;;  %1490 = vmatmul.mubr.f32.gmra.mxu0 %v384_v27  ;;  %1745 = vmatmul.mubr.f32.gmra.mxu1 %v386_v28  ;;  %v836_v27 = vld [vmem:[%s3211_s21 + $0x4f8] sm:$0xff] }
 0x155   : > { %v932_v37 = vadd.f32 %v3506_v20, %v931_v35  ;;  %1494 = vmatprep.mubr.f32.mxu0 %v396_v31  ;;  %1749 = vmatprep.mubr.f32.mxu1 %v398_v32  ;;  %v450_v31 = vld [vmem:[#allocation2 + $0x5f8] sm:$0xff]  ;;  %v452_v32 = vld [vmem:[#allocation2 + $0x608] sm:$0xff] }
 0x156   : > { %v933_v40 = vpop.f32.mrf.mxu0  ;;  %v1188_v41 = vpop.f32.mrf.mxu1  ;;  %1903 = vmatpush1.msra.mxu0 %v809_v34  ;;  %2757 = vmatpush1.msra.mxu1 %v809_v34 }
 0x157   : > { %v3518_v44 = vadd.f32 %v1186_v36, %v932_v37  ;;  %1904 = vmatprep.subr.mxu0 %v3045_v0  ;;  %2726 = vmatprep.subr.mxu1 %v3045_v0  ;;  %v462_v36 = vld [vmem:[#allocation2 + $0x658] sm:$0xff]  ;;  %v464_v37 = vld [vmem:[#allocation2 + $0x668] sm:$0xff] }
 0x158   : > { %v936_v46 = vpop.f32.mrf.mxu0  ;;  %v1191_v47 = vpop.f32.mrf.mxu1  ;;  %1495 = vmatmul.mubr.f32.gmra.mxu0 %v395_v38  ;;  %1750 = vmatmul.mubr.f32.gmra.mxu1 %v397_v39  ;;  %v835_v39 = vld [vmem:[%s3211_s21 + $0x4f0] sm:$0xff] }
 0x159   : > { %v937_v48 = vadd.f32 %v3506_v20, %v936_v46  ;;  %1499 = vmatprep.mubr.f32.mxu0 %v407_v42  ;;  %1754 = vmatprep.mubr.f32.mxu1 %v409_v43  ;;  %v461_v43 = vld [vmem:[#allocation2 + $0x650] sm:$0xff] }
 0x15a   : > { %v938_v51 = vpop.f32.mrf.mxu0  ;;  %v1193_v52 = vpop.f32.mrf.mxu1  ;;  %1905 = vmatpush1.msra.mxu0 %v808_v45  ;;  %2758 = vmatpush1.msra.mxu1 %v808_v45  ;;  %v463_v45 = vld [vmem:[#allocation2 + $0x660] sm:$0xff] }
 0x15b   : > { %v3524_v55 = vadd.f32 %v1191_v47, %v937_v48  ;;  %1906 = vmatprep.subr.mxu0 %v3045_v0  ;;  %2727 = vmatprep.subr.mxu1 %v3045_v0  ;;  %v473_v48 = vld [vmem:[#allocation2 + $0x6b0] sm:$0xff]  ;;  %v834_v51 = vld [vmem:[%s3211_s21 + $0x4e8] sm:$0xff] }
 0x15c   : > { %v941_v57 = vpop.f32.mrf.mxu0  ;;  %v1196_v58 = vpop.f32.mrf.mxu1  ;;  %1500 = vmatmul.mubr.f32.gmra.mxu0 %v406_v49  ;;  %1755 = vmatmul.mubr.f32.gmra.mxu1 %v408_v50  ;;  %v475_v49 = vld [vmem:[#allocation2 + $0x6c0] sm:$0xff] }
 0x15d   : > { %v942_v59 = vadd.f32 %v3506_v20, %v941_v57  ;;  %1504 = vmatprep.mubr.f32.mxu0 %v418_v53  ;;  %1759 = vmatprep.mubr.f32.mxu1 %v420_v54  ;;  %v474_v57 = vld [vmem:[#allocation2 + $0x6b8] sm:$0xff] }
 0x15e   : > { %v943_v62 = vpop.f32.mrf.mxu0  ;;  %v1198_v63 = vpop.f32.mrf.mxu1  ;;  %1907 = vmatpush1.msra.mxu0 %v807_v56  ;;  %2759 = vmatpush1.msra.mxu1 %v807_v56  ;;  %v472_v56 = vld [vmem:[#allocation2 + $0x6a8] sm:$0xff] }
 0x15f   : > { %v3530_v3 = vadd.f32 %v1196_v58, %v942_v59  ;;  %1908 = vmatprep.subr.mxu0 %v3045_v0  ;;  %2728 = vmatprep.subr.mxu1 %v3045_v0  ;;  %v833_v63 = vld [vmem:[%s3211_s21 + $0x4e0] sm:$0xff] }
 0x160   : > { %v946_v5 = vpop.f32.mrf.mxu0  ;;  %v1201_v6 = vpop.f32.mrf.mxu1  ;;  %1505 = vmatmul.mubr.f32.gmra.mxu0 %v417_v60  ;;  %1760 = vmatmul.mubr.f32.gmra.mxu1 %v419_v61  ;;  %v484_v60 = vld [vmem:[#allocation2 + $0x708] sm:$0xff]  ;;  %v486_v61 = vld [vmem:[#allocation2 + $0x718] sm:$0xff] }
 0x161   : > { %v947_v7 = vadd.f32 %v3506_v20, %v946_v5  ;;  %1509 = vmatprep.mubr.f32.mxu0 %v429_v1  ;;  %1764 = vmatprep.mubr.f32.mxu1 %v431_v2  ;;  %v483_v5 = vld [vmem:[#allocation2 + $0x700] sm:$0xff] }
 0x162   : > { %v948_v10 = vpop.f32.mrf.mxu0  ;;  %v1203_v11 = vpop.f32.mrf.mxu1  ;;  %1909 = vmatpush1.msra.mxu0 %v806_v4  ;;  %2760 = vmatpush1.msra.mxu1 %v806_v4 }
 0x163   : > { %v3536_v14 = vadd.f32 %v1201_v6, %v947_v7  ;;  %1910 = vmatprep.subr.mxu0 %v3045_v0  ;;  %2729 = vmatprep.subr.mxu1 %v3045_v0  ;;  %v485_v6 = vld [vmem:[#allocation2 + $0x710] sm:$0xff] }
 0x164   : > { %v951_v16 = vpop.f32.mrf.mxu0  ;;  %v1206_v17 = vpop.f32.mrf.mxu1  ;;  %1510 = vmatmul.mubr.f32.gmra.mxu0 %v428_v8  ;;  %1765 = vmatmul.mubr.f32.gmra.mxu1 %v430_v9  ;;  %v495_v9 = vld [vmem:[#allocation2 + $0x760] sm:$0xff]  ;;  %v497_v10 = vld [vmem:[#allocation2 + $0x770] sm:$0xff] }
 0x165   : > { %v952_v18 = vadd.f32 %v3506_v20, %v951_v16  ;;  %1514 = vmatprep.mubr.f32.mxu0 %v440_v12  ;;  %1769 = vmatprep.mubr.f32.mxu1 %v442_v13  ;;  %v832_v12 = vld [vmem:[%s3211_s21 + $0x4d8] sm:$0xff] }
 0x166   : > { %v953_v22 = vpop.f32.mrf.mxu0  ;;  %v1208_v23 = vpop.f32.mrf.mxu1  ;;  %1911 = vmatpush1.msra.mxu0 %v805_v15  ;;  %2761 = vmatpush1.msra.mxu1 %v805_v15 }
 0x167   : > { %v3542_v26 = vadd.f32 %v1206_v17, %v952_v18  ;;  %1912 = vmatprep.subr.mxu0 %v3045_v0  ;;  %2730 = vmatprep.subr.mxu1 %v3045_v0  ;;  %v494_v17 = vld [vmem:[#allocation2 + $0x758] sm:$0xff]  ;;  %v496_v18 = vld [vmem:[#allocation2 + $0x768] sm:$0xff] }
 0x168   : > { %v956_v28 = vpop.f32.mrf.mxu0  ;;  %v1211_v29 = vpop.f32.mrf.mxu1  ;;  %1515 = vmatmul.mubr.f32.gmra.mxu0 %v439_v19  ;;  %1770 = vmatmul.mubr.f32.gmra.mxu1 %v441_v21  ;;  %v506_v22 = vld [vmem:[#allocation2 + $0x7b8] sm:$0xff]  ;;  %v508_v23 = vld [vmem:[#allocation2 + $0x7c8] sm:$0xff] }
 0x169   : > { %v957_v30 = vadd.f32 %v3506_v20, %v956_v28  ;;  %1519 = vmatprep.mubr.f32.mxu0 %v451_v24  ;;  %1774 = vmatprep.mubr.f32.mxu1 %v453_v25  ;;  %v831_v25 = vld [vmem:[%s3211_s21 + $0x4d0] sm:$0xff] }
 0x16a   : > { %v958_v34 = vpop.f32.mrf.mxu0  ;;  %v1213_v35 = vpop.f32.mrf.mxu1  ;;  %1913 = vmatpush2.msra.mxu0 %v836_v27  ;;  %2762 = vmatpush2.msra.mxu1 %v836_v27 }
 0x16b   : > { %v3548_v38 = vadd.f32 %v1211_v29, %v957_v30  ;;  %1914 = vmatprep.subr.mxu0 %v3045_v0  ;;  %2731 = vmatprep.subr.mxu1 %v3045_v0  ;;  %v505_v30 = vld [vmem:[#allocation2 + $0x7b0] sm:$0xff] }
 0x16c   : > { %v961_v40 = vpop.f32.mrf.mxu0  ;;  %v1216_v41 = vpop.f32.mrf.mxu1  ;;  %1520 = vmatmul.mubr.f32.gmra.mxu0 %v450_v31  ;;  %1775 = vmatmul.mubr.f32.gmra.mxu1 %v452_v32  ;;  %v507_v31 = vld [vmem:[#allocation2 + $0x7c0] sm:$0xff]  ;;  %v517_v35 = vld [vmem:[#allocation2 + $0x810] sm:$0xff] }
 0x16d   : > { %v962_v42 = vadd.f32 %v3506_v20, %v961_v40  ;;  %1524 = vmatprep.mubr.f32.mxu0 %v462_v36  ;;  %1779 = vmatprep.mubr.f32.mxu1 %v464_v37  ;;  %v519_v36 = vld [vmem:[#allocation2 + $0x820] sm:$0xff] }
 0x16e   : > { %v963_v46 = vpop.f32.mrf.mxu0  ;;  %v1218_v47 = vpop.f32.mrf.mxu1  ;;  %1915 = vmatpush2.msra.mxu0 %v835_v39  ;;  %2763 = vmatpush2.msra.mxu1 %v835_v39  ;;  %v830_v39 = vld [vmem:[%s3211_s21 + $0x4c8] sm:$0xff] }
 0x16f   : > { %v3554_v50 = vadd.f32 %v1216_v41, %v962_v42  ;;  %1916 = vmatprep.subr.mxu0 %v3045_v0  ;;  %2732 = vmatprep.subr.mxu1 %v3045_v0 }
 0x170   : > { %v966_v52 = vpop.f32.mrf.mxu0  ;;  %v1221_v53 = vpop.f32.mrf.mxu1  ;;  %1525 = vmatmul.mubr.f32.gmra.mxu0 %v461_v43  ;;  %1780 = vmatmul.mubr.f32.gmra.mxu1 %v463_v45  ;;  %v516_v43 = vld [vmem:[#allocation2 + $0x808] sm:$0xff]  ;;  %v518_v45 = vld [vmem:[#allocation2 + $0x818] sm:$0xff] }
 0x171   : > { %v967_v54 = vadd.f32 %v3506_v20, %v966_v52  ;;  %1529 = vmatprep.mubr.f32.mxu0 %v473_v48  ;;  %1784 = vmatprep.mubr.f32.mxu1 %v475_v49  ;;  %v528_v48 = vld [vmem:[#allocation2 + $0x868] sm:$0xff]  ;;  %v530_v49 = vld [vmem:[#allocation2 + $0x878] sm:$0xff]  ;;  %v829_v52 = vld [vmem:[%s3211_s21 + $0x4c0] sm:$0xff] }
 0x172   : > { %v968_v58 = vpop.f32.mrf.mxu0  ;;  %v1223_v59 = vpop.f32.mrf.mxu1  ;;  %1917 = vmatpush2.msra.mxu0 %v834_v51  ;;  %2764 = vmatpush2.msra.mxu1 %v834_v51 }
 0x173   : > { %v3560_v62 = vadd.f32 %v1221_v53, %v967_v54  ;;  %1918 = vmatprep.subr.mxu0 %v3045_v0  ;;  %2733 = vmatprep.subr.mxu1 %v3045_v0  ;;  %v529_v58 = vld [vmem:[#allocation2 + $0x870] sm:$0xff] }
 0x174   : > { %v971_v1 = vpop.f32.mrf.mxu0  ;;  %v1226_v2 = vpop.f32.mrf.mxu1  ;;  %1530 = vmatmul.mubr.f32.gmra.mxu0 %v472_v56  ;;  %1785 = vmatmul.mubr.f32.gmra.mxu1 %v474_v57  ;;  %v527_v57 = vld [vmem:[#allocation2 + $0x860] sm:$0xff] }
 0x175   : > { %v972_v4 = vadd.f32 %v3506_v20, %v971_v1  ;;  %1534 = vmatprep.mubr.f32.mxu0 %v484_v60  ;;  %1789 = vmatprep.mubr.f32.mxu1 %v486_v61  ;;  %v539_v61 = vld [vmem:[#allocation2 + $0x8c0] sm:$0xff] }
 0x176   : > { %v973_v7 = vpop.f32.mrf.mxu0  ;;  %v1228_v8 = vpop.f32.mrf.mxu1  ;;  %1919 = vmatpush2.msra.mxu0 %v833_v63  ;;  %2765 = vmatpush2.msra.mxu1 %v833_v63  ;;  %v541_v63 = vld [vmem:[#allocation2 + $0x8d0] sm:$0xff] }
 0x177   : > { %v3566_v11 = vadd.f32 %v1226_v2, %v972_v4  ;;  %1920 = vmatprep.subr.mxu0 %v3045_v0  ;;  %2734 = vmatprep.subr.mxu1 %v3045_v0  ;;  %v828_v2 = vld [vmem:[%s3211_s21 + $0x4b8] sm:$0xff]  ;;  %v538_v7 = vld [vmem:[#allocation2 + $0x8b8] sm:$0xff] }
 0x178   : > { %v976_v13 = vpop.f32.mrf.mxu0  ;;  %v1231_v15 = vpop.f32.mrf.mxu1  ;;  %1535 = vmatmul.mubr.f32.gmra.mxu0 %v483_v5  ;;  %1790 = vmatmul.mubr.f32.gmra.mxu1 %v485_v6  ;;  %v540_v8 = vld [vmem:[#allocation2 + $0x8c8] sm:$0xff] }
 0x179   : > { %v977_v16 = vadd.f32 %v3506_v20, %v976_v13  ;;  %1539 = vmatprep.mubr.f32.mxu0 %v495_v9  ;;  %1794 = vmatprep.mubr.f32.mxu1 %v497_v10  ;;  %v552_v13 = vld [vmem:[#allocation2 + $0x928] sm:$0xff] }
 0x17a   : > { %v978_v19 = vpop.f32.mrf.mxu0  ;;  %v1233_v21 = vpop.f32.mrf.mxu1  ;;  %1921 = vmatpush2.msra.mxu0 %v832_v12  ;;  %2766 = vmatpush2.msra.mxu1 %v832_v12  ;;  %v550_v12 = vld [vmem:[#allocation2 + $0x918] sm:$0xff] }
 0x17b   : > { %v3572_v24 = vadd.f32 %v1231_v15, %v977_v16  ;;  %1922 = vmatprep.subr.mxu0 %v3045_v0  ;;  %2735 = vmatprep.subr.mxu1 %v3045_v0  ;;  %v827_v16 = vld [vmem:[%s3211_s21 + $0x4b0] sm:$0xff]  ;;  %v549_v21 = vld [vmem:[#allocation2 + $0x910] sm:$0xff] }
 0x17c   : > { %v981_v27 = vpop.f32.mrf.mxu0  ;;  %v1236_v28 = vpop.f32.mrf.mxu1  ;;  %1540 = vmatmul.mubr.f32.gmra.mxu0 %v494_v17  ;;  %1795 = vmatmul.mubr.f32.gmra.mxu1 %v496_v18 }
 0x17d   : > { %v982_v29 = vadd.f32 %v3506_v20, %v981_v27  ;;  %1544 = vmatprep.mubr.f32.mxu0 %v506_v22  ;;  %1799 = vmatprep.mubr.f32.mxu1 %v508_v23  ;;  %v551_v22 = vld [vmem:[#allocation2 + $0x920] sm:$0xff]  ;;  %v561_v27 = vld [vmem:[#allocation2 + $0x970] sm:$0xff] }
 0x17e   : > { %v983_v32 = vpop.f32.mrf.mxu0  ;;  %v1238_v34 = vpop.f32.mrf.mxu1  ;;  %1923 = vmatpush2.msra.mxu0 %v831_v25  ;;  %2767 = vmatpush2.msra.mxu1 %v831_v25 }
 0x17f   : > { %v3578_v37 = vadd.f32 %v1236_v28, %v982_v29  ;;  %1924 = vmatprep.subr.mxu0 %v3045_v0  ;;  %2736 = vmatprep.subr.mxu1 %v3045_v0  ;;  %v563_v28 = vld [vmem:[#allocation2 + $0x980] sm:$0xff] }
 0x180   : > { %v986_v40 = vpop.f32.mrf.mxu0  ;;  %v1241_v41 = vpop.f32.mrf.mxu1  ;;  %1545 = vmatmul.mubr.f32.gmra.mxu0 %v505_v30  ;;  %1800 = vmatmul.mubr.f32.gmra.mxu1 %v507_v31  ;;  %v826_v30 = vld [vmem:[%s3211_s21 + $0x4a8] sm:$0xff] }
 0x181   : > { %v987_v42 = vadd.f32 %v3506_v20, %v986_v40  ;;  %1549 = vmatprep.mubr.f32.mxu0 %v517_v35  ;;  %1804 = vmatprep.mubr.f32.mxu1 %v519_v36  ;;  %v560_v35 = vld [vmem:[#allocation2 + $0x968] sm:$0xff]  ;;  %v562_v36 = vld [vmem:[#allocation2 + $0x978] sm:$0xff] }
 0x182   : > { %v988_v46 = vpop.f32.mrf.mxu0  ;;  %v1243_v47 = vpop.f32.mrf.mxu1  ;;  %1925 = vmatpush2.msra.mxu0 %v830_v39  ;;  %2768 = vmatpush2.msra.mxu1 %v830_v39 }
 0x183   : > { %v3584_v51 = vadd.f32 %v1241_v41, %v987_v42  ;;  %1926 = vmatprep.subr.mxu0 %v3045_v0  ;;  %2737 = vmatprep.subr.mxu1 %v3045_v0  ;;  %v572_v41 = vld [vmem:[#allocation2 + $0x9c8] sm:$0xff]  ;;  %v574_v42 = vld [vmem:[#allocation2 + $0x9d8] sm:$0xff] }
 0x184   : > { %v991_v53 = vpop.f32.mrf.mxu0  ;;  %v1246_v54 = vpop.f32.mrf.mxu1  ;;  %1550 = vmatmul.mubr.f32.gmra.mxu0 %v516_v43  ;;  %1805 = vmatmul.mubr.f32.gmra.mxu1 %v518_v45  ;;  %v825_v45 = vld [vmem:[%s3211_s21 + $0x4a0] sm:$0xff] }
 0x185   : > { %v992_v56 = vadd.f32 %v3506_v20, %v991_v53  ;;  %1554 = vmatprep.mubr.f32.mxu0 %v528_v48  ;;  %1809 = vmatprep.mubr.f32.mxu1 %v530_v49  ;;  %v571_v49 = vld [vmem:[#allocation2 + $0x9c0] sm:$0xff] }
 0x186   : > { %v993_v59 = vpop.f32.mrf.mxu0  ;;  %v1248_v60 = vpop.f32.mrf.mxu1  ;;  %1927 = vmatpush2.msra.mxu0 %v829_v52  ;;  %2769 = vmatpush2.msra.mxu1 %v829_v52  ;;  %v573_v52 = vld [vmem:[#allocation2 + $0x9d0] sm:$0xff] }
 0x187   : > { %v3590_v1 = vadd.f32 %v1246_v54, %v992_v56  ;;  %1928 = vmatprep.subr.mxu0 %v3045_v0  ;;  %2738 = vmatprep.subr.mxu1 %v3045_v0  ;;  %v583_v56 = vld [vmem:[#allocation2 + $0xa20] sm:$0xff]  ;;  %v824_v59 = vld [vmem:[%s3211_s21 + $0x498] sm:$0xff] }
 0x188   : > { %v996_v4 = vpop.f32.mrf.mxu0  ;;  %v1251_v5 = vpop.f32.mrf.mxu1  ;;  %1555 = vmatmul.mubr.f32.gmra.mxu0 %v527_v57  ;;  %1810 = vmatmul.mubr.f32.gmra.mxu1 %v529_v58  ;;  %v585_v57 = vld [vmem:[#allocation2 + $0xa30] sm:$0xff] }
 0x189   : > { %v997_v6 = vadd.f32 %v3506_v20, %v996_v4  ;;  %1559 = vmatprep.mubr.f32.mxu0 %v539_v61  ;;  %1814 = vmatprep.mubr.f32.mxu1 %v541_v63  ;;  %v584_v4 = vld [vmem:[#allocation2 + $0xa28] sm:$0xff] }
 0x18a   : > { %v998_v9 = vpop.f32.mrf.mxu0  ;;  %v1253_v10 = vpop.f32.mrf.mxu1  ;;  %1929 = vmatpush2.msra.mxu0 %v828_v2  ;;  %2770 = vmatpush2.msra.mxu1 %v828_v2  ;;  %v582_v2 = vld [vmem:[#allocation2 + $0xa18] sm:$0xff] }
 0x18b   : > { %v3596_v15 = vadd.f32 %v1251_v5, %v997_v6  ;;  %1930 = vmatprep.subr.mxu0 %v3045_v0  ;;  %2739 = vmatprep.subr.mxu1 %v3045_v0  ;;  %v823_v10 = vld [vmem:[%s3211_s21 + $0x490] sm:$0xff] }
 0x18c   : > { %v1001_v17 = vpop.f32.mrf.mxu0  ;;  %v1256_v18 = vpop.f32.mrf.mxu1  ;;  %1560 = vmatmul.mubr.f32.gmra.mxu0 %v538_v7  ;;  %1815 = vmatmul.mubr.f32.gmra.mxu1 %v540_v8  ;;  %v594_v7 = vld [vmem:[#allocation2 + $0xa78] sm:$0xff]  ;;  %v596_v8 = vld [vmem:[#allocation2 + $0xa88] sm:$0xff] }
 0x18d   : > { %v1002_v19 = vadd.f32 %v3506_v20, %v1001_v17  ;;  %1564 = vmatprep.mubr.f32.mxu0 %v550_v12  ;;  %1819 = vmatprep.mubr.f32.mxu1 %v552_v13  ;;  %v593_v17 = vld [vmem:[#allocation2 + $0xa70] sm:$0xff] }
 0x18e   : > { %v1003_v23 = vpop.f32.mrf.mxu0  ;;  %v1258_v25 = vpop.f32.mrf.mxu1  ;;  %1931 = vmatpush2.msra.mxu0 %v827_v16  ;;  %2771 = vmatpush2.msra.mxu1 %v827_v16 }
 0x18f   : > { %v3602_v29 = vadd.f32 %v1256_v18, %v1002_v19  ;;  %1932 = vmatprep.subr.mxu0 %v3045_v0  ;;  %2740 = vmatprep.subr.mxu1 %v3045_v0  ;;  %v595_v18 = vld [vmem:[#allocation2 + $0xa80] sm:$0xff] }
 0x190   : > { %v1006_v31 = vpop.f32.mrf.mxu0  ;;  %v1261_v32 = vpop.f32.mrf.mxu1  ;;  %1565 = vmatmul.mubr.f32.gmra.mxu0 %v549_v21  ;;  %1820 = vmatmul.mubr.f32.gmra.mxu1 %v551_v22  ;;  %v605_v22 = vld [vmem:[#allocation2 + $0xad0] sm:$0xff]  ;;  %v607_v23 = vld [vmem:[#allocation2 + $0xae0] sm:$0xff] }
 0x191   : > { %v1007_v34 = vadd.f32 %v3506_v20, %v1006_v31  ;;  %1569 = vmatprep.mubr.f32.mxu0 %v561_v27  ;;  %1824 = vmatprep.mubr.f32.mxu1 %v563_v28  ;;  %v822_v27 = vld [vmem:[%s3211_s21 + $0x488] sm:$0xff] }
 0x192   : > { %v1008_v39 = vpop.f32.mrf.mxu0  ;;  %v1263_v40 = vpop.f32.mrf.mxu1  ;;  %1933 = vmatpush2.msra.mxu0 %v826_v30  ;;  %2772 = vmatpush2.msra.mxu1 %v826_v30 }
 0x193   : > { %v3608_v43 = vadd.f32 %v1261_v32, %v1007_v34  ;;  %1934 = vmatprep.subr.mxu0 %v3045_v0  ;;  %2741 = vmatprep.subr.mxu1 %v3045_v0  ;;  %v604_v32 = vld [vmem:[#allocation2 + $0xac8] sm:$0xff]  ;;  %v606_v34 = vld [vmem:[#allocation2 + $0xad8] sm:$0xff] }
 0x194   : > { %v1011_v46 = vpop.f32.mrf.mxu0  ;;  %v1266_v47 = vpop.f32.mrf.mxu1  ;;  %1570 = vmatmul.mubr.f32.gmra.mxu0 %v560_v35  ;;  %1825 = vmatmul.mubr.f32.gmra.mxu1 %v562_v36  ;;  %v616_v39 = vld [vmem:[#allocation2 + $0xb28] sm:$0xff]  ;;  %v618_v40 = vld [vmem:[#allocation2 + $0xb38] sm:$0xff] }
 0x195   : > { %v1012_v48 = vadd.f32 %v3506_v20, %v1011_v46  ;;  %1574 = vmatprep.mubr.f32.mxu0 %v572_v41  ;;  %1829 = vmatprep.mubr.f32.mxu1 %v574_v42  ;;  %v821_v42 = vld [vmem:[%s3211_s21 + $0x480] sm:$0xff] }
 0x196   : > { %v1013_v53 = vpop.f32.mrf.mxu0  ;;  %v1268_v54 = vpop.f32.mrf.mxu1  ;;  %1935 = vmatpush2.msra.mxu0 %v825_v45  ;;  %2773 = vmatpush2.msra.mxu1 %v825_v45 }
 0x197   : > { %v3614_v58 = vadd.f32 %v1266_v47, %v1012_v48  ;;  %1936 = vmatprep.subr.mxu0 %v3045_v0  ;;  %2742 = vmatprep.subr.mxu1 %v3045_v0  ;;  %v3638_v47 = vld [vmem:[%s3211_s21 + $0x578] sm:$0xff] }
 0x198   : > { %v1016_v60 = vpop.f32.mrf.mxu0  ;;  %v1271_v61 = vpop.f32.mrf.mxu1  ;;  %1575 = vmatmul.mubr.f32.gmra.mxu0 %v571_v49  ;;  %1830 = vmatmul.mubr.f32.gmra.mxu1 %v573_v52  ;;  %v615_v49 = vld [vmem:[#allocation2 + $0xb20] sm:$0xff]  ;;  %v617_v52 = vld [vmem:[#allocation2 + $0xb30] sm:$0xff] }
 0x199   : > { %v1017_v63 = vadd.f32 %v3506_v20, %v1016_v60  ;;  %1579 = vmatprep.mubr.f32.mxu0 %v583_v56  ;;  %1834 = vmatprep.mubr.f32.mxu1 %v585_v57  ;;  %v627_v56 = vld [vmem:[#allocation2 + $0xb80] sm:$0xff]  ;;  %v629_v57 = vld [vmem:[#allocation2 + $0xb90] sm:$0xff] }
 0x19a   : > { %v1018_v5 = vpop.f32.mrf.mxu0  ;;  %v1273_v6 = vpop.f32.mrf.mxu1  ;;  %1937 = vmatpush2.msra.mxu0 %v824_v59  ;;  %2774 = vmatpush2.msra.mxu1 %v824_v59 }
 0x19b   : > { %v3620_v9 = vadd.f32 %v1271_v61, %v1017_v63  ;;  %1938 = vmatprep.subr.mxu0 %v3045_v0  ;;  %2743 = vmatprep.subr.mxu1 %v3045_v0  ;;  %v626_v63 = vld [vmem:[#allocation2 + $0xb78] sm:$0xff] }
 0x19c   : > { %v1021_v12 = vpop.f32.mrf.mxu0  ;;  %v1276_v13 = vpop.f32.mrf.mxu1  ;;  %1580 = vmatmul.mubr.f32.gmra.mxu0 %v582_v2  ;;  %1835 = vmatmul.mubr.f32.gmra.mxu1 %v584_v4  ;;  %v628_v2 = vld [vmem:[#allocation2 + $0xb88] sm:$0xff]  ;;  %v638_v6 = vld [vmem:[#allocation2 + $0xbd8] sm:$0xff] }
 0x19d   : > { %v1022_v16 = vadd.f32 %v3506_v20, %v1021_v12  ;;  %1584 = vmatprep.mubr.f32.mxu0 %v594_v7  ;;  %1839 = vmatprep.mubr.f32.mxu1 %v596_v8  ;;  %v640_v7 = vld [vmem:[#allocation2 + $0xbe8] sm:$0xff] }
 0x19e   : > { %v1023_v19 = vpop.f32.mrf.mxu0  ;;  %v1278_v21 = vpop.f32.mrf.mxu1  ;;  %1939 = vmatpush2.msra.mxu0 %v823_v10  ;;  %2775 = vmatpush2.msra.mxu1 %v823_v10 }
 0x19f   : > { %v3626_v25 = vadd.f32 %v1276_v13, %v1022_v16  ;;  %1940 = vmatprep.subr.mxu0 %v3045_v0  ;;  %2744 = vmatprep.subr.mxu1 %v3045_v0  ;;  %v637_v16 = vld [vmem:[#allocation2 + $0xbd0] sm:$0xff] }
 0x1a0   : > { %v1026_v28 = vpop.f32.mrf.mxu0  ;;  %v1281_v30 = vpop.f32.mrf.mxu1  ;;  %1585 = vmatmul.mubr.f32.gmra.mxu0 %v593_v17  ;;  %1840 = vmatmul.mubr.f32.gmra.mxu1 %v595_v18  ;;  %v639_v17 = vld [vmem:[#allocation2 + $0xbe0] sm:$0xff]  ;;  %v649_v21 = vld [vmem:[#allocation2 + $0xc30] sm:$0xff] }
 0x1a1   : > { %v1027_v31 = vadd.f32 %v3506_v20, %v1026_v28  ;;  %1589 = vmatprep.mubr.f32.mxu0 %v605_v22  ;;  %1844 = vmatprep.mubr.f32.mxu1 %v607_v23  ;;  %v651_v22 = vld [vmem:[#allocation2 + $0xc40] sm:$0xff] }
 0x1a2   : > { %v1028_v35 = vpop.f32.mrf.mxu0  ;;  %v1283_v36 = vpop.f32.mrf.mxu1  ;;  %1941 = vmatpush2.msra.mxu0 %v822_v27  ;;  %2776 = vmatpush2.msra.mxu1 %v822_v27 }
 0x1a3   : > { %v3632_v41 = vadd.f32 %v1281_v30, %v1027_v31  ;;  %1942 = vmatprep.subr.mxu0 %v3045_v0  ;;  %2745 = vmatprep.subr.mxu1 %v3045_v0  ;;  %v648_v31 = vld [vmem:[#allocation2 + $0xc28] sm:$0xff] }
 0x1a4   : > { %v1031_v45 = vpop.f32.mrf.mxu0  ;;  %v1286_v46 = vpop.f32.mrf.mxu1  ;;  %1590 = vmatmul.mubr.f32.gmra.mxu0 %v604_v32  ;;  %1845 = vmatmul.mubr.f32.gmra.mxu1 %v606_v34  ;;  %v650_v32 = vld [vmem:[#allocation2 + $0xc38] sm:$0xff]  ;;  %v660_v36 = vld [vmem:[#allocation2 + $0xc88] sm:$0xff] }
 0x1a5   : > { %v1032_v48 = vadd.f32 %v3506_v20, %v1031_v45  ;;  %1594 = vmatprep.mubr.f32.mxu0 %v616_v39  ;;  %1849 = vmatprep.mubr.f32.mxu1 %v618_v40  ;;  %v662_v39 = vld [vmem:[#allocation2 + $0xc98] sm:$0xff] }
 0x1a6   : > { %v1033_v53 = vpop.f32.mrf.mxu0  ;;  %v1288_v54 = vpop.f32.mrf.mxu1  ;;  %1943 = vmatpush2.msra.mxu0 %v821_v42  ;;  %2777 = vmatpush2.msra.mxu1 %v821_v42 }
 0x1a7   : > { %v3641_v59 = vadd.f32 %v1286_v46, %v1032_v48  ;;  %2625 = vmatprep.subr.mxu1 %v3638_v47  ;;  %v659_v48 = vld [vmem:[#allocation2 + $0xc80] sm:$0xff] }
 0x1a8   : > { %v1036_v0 = vpop.f32.mrf.mxu0  ;;  %v1291_v60 = vpop.f32.mrf.mxu1  ;;  %1595 = vmatmul.mubr.f32.gmra.mxu0 %v615_v49  ;;  %1850 = vmatmul.mubr.f32.gmra.mxu1 %v617_v52  ;;  %v661_v49 = vld [vmem:[#allocation2 + $0xc90] sm:$0xff]  ;;  %v671_v54 = vld [vmem:[#allocation2 + $0xce0] sm:$0xff] }
 0x1a9   : > { %v1037_v61 = vadd.f32 %v3506_v20, %v1036_v0  ;;  %1599 = vmatprep.mubr.f32.mxu0 %v627_v56  ;;  %1854 = vmatprep.mubr.f32.mxu1 %v629_v57  ;;  %v673_v56 = vld [vmem:[#allocation2 + $0xcf0] sm:$0xff] }
 0x1aa   : > { %v1038_v4 = vpop.f32.mrf.mxu0  ;;  %v1293_v5 = vpop.f32.mrf.mxu1 }
 0x1ab   : > { %v3645_v8 = vadd.f32 %v1291_v60, %v1037_v61 }
 0x1ac   : > { %v1041_v10 = vpop.f32.mrf.mxu0  ;;  %v1296_v12 = vpop.f32.mrf.mxu1  ;;  %1600 = vmatmul.mubr.f32.gmra.mxu0 %v626_v63  ;;  %1855 = vmatmul.mubr.f32.gmra.mxu1 %v628_v2  ;;  %v670_v63 = vld [vmem:[#allocation2 + $0xcd8] sm:$0xff]  ;;  %v672_v2 = vld [vmem:[#allocation2 + $0xce8] sm:$0xff] }
 0x1ad   : > { %v1042_v13 = vadd.f32 %v3506_v20, %v1041_v10  ;;  %1604 = vmatprep.mubr.f32.mxu0 %v638_v6  ;;  %1859 = vmatprep.mubr.f32.mxu1 %v640_v7  ;;  %v268_v6 = vld [vmem:[#allocation2 + $0x48] sm:$0xff]  ;;  %v587_v7 = vld [vmem:[#allocation2 + $0xa40] sm:$0xff] }
 0x1ae   : > { %v1043_v18 = vpop.f32.mrf.mxu0  ;;  %v1298_v19 = vpop.f32.mrf.mxu1 }
 0x1af   : > { %v3648_v23 = vadd.f32 %v1296_v12, %v1042_v13  ;;  %v586_v18 = vld [vmem:[#allocation2 + $0xa38] sm:$0xff] }
 0x1b0   : > { %v1046_v27 = vpop.f32.mrf.mxu0  ;;  %v1301_v28 = vpop.f32.mrf.mxu1  ;;  %1605 = vmatmul.mubr.f32.gmra.mxu0 %v637_v16  ;;  %1860 = vmatmul.mubr.f32.gmra.mxu1 %v639_v17  ;;  %v267_v17 = vld [vmem:[#allocation2 + $0x40] sm:$0xff] }
 0x1b1   : > { %v1047_v30 = vadd.f32 %v3506_v20, %v1046_v27  ;;  %1609 = vmatprep.mubr.f32.mxu0 %v649_v21  ;;  %1864 = vmatprep.mubr.f32.mxu1 %v651_v22  ;;  %v279_v22 = vld [vmem:[#allocation2 + $0xa0] sm:$0xff]  ;;  %v598_v27 = vld [vmem:[#allocation2 + $0xa98] sm:$0xff] }
 0x1b2   : > { %v1048_v34 = vpop.f32.mrf.mxu0  ;;  %v1303_v35 = vpop.f32.mrf.mxu1 }
 0x1b3   : > { %v3651_v40 = vadd.f32 %v1301_v28, %v1047_v30  ;;  %v3665_v34 = vld [vmem:[%s230_s5] ss:$0 sm:$0xff]  ;;  %v278_v35 = vld [vmem:[#allocation2 + $0x98] sm:$0xff] }
 0x1b4   : > { %v1051_v42 = vpop.f32.mrf.mxu0  ;;  %v1306_v45 = vpop.f32.mrf.mxu1  ;;  %1610 = vmatmul.mubr.f32.gmra.mxu0 %v648_v31  ;;  %1865 = vmatmul.mubr.f32.gmra.mxu1 %v650_v32  ;;  %v851_v32 = vld [vmem:[%s3211_s21 + $0x570] sm:$0xff] }
 0x1b5   : > { %v1052_v46 = vadd.f32 %v3506_v20, %v1051_v42  ;;  %1614 = vmatprep.mubr.f32.mxu0 %v660_v36  ;;  %1869 = vmatprep.mubr.f32.mxu1 %v662_v39  ;;  %v597_v36 = vld [vmem:[#allocation2 + $0xa90] sm:$0xff] }
 0x1b6   : > { %v1053_v52 = vpop.f32.mrf.mxu0  ;;  %v1308_v53 = vpop.f32.mrf.mxu1 }
 0x1b7   : > { %v3654_v57 = vadd.f32 %v1306_v45, %v1052_v46  ;;  %v290_v45 = vld [vmem:[#allocation2 + $0xf8] sm:$0xff]  ;;  %v609_v46 = vld [vmem:[#allocation2 + $0xaf0] sm:$0xff] }
 0x1b8   : > { %v1056_v0 = vpop.f32.mrf.mxu0  ;;  %v1311_v60 = vpop.f32.mrf.mxu1  ;;  %1615 = vmatmul.mubr.f32.gmra.mxu0 %v659_v48  ;;  %1870 = vmatmul.mubr.f32.gmra.mxu1 %v661_v49  ;;  %v850_v53 = vld [vmem:[%s3211_s21 + $0x568] sm:$0xff] }
 0x1b9   : > { %v1057_v61 = vadd.f32 %v3506_v20, %v1056_v0  ;;  %1619 = vmatprep.mubr.f32.mxu0 %v671_v54  ;;  %1874 = vmatprep.mubr.f32.mxu1 %v673_v56  ;;  %v289_v56 = vld [vmem:[#allocation2 + $0xf0] sm:$0xff]  ;;  %v608_v0 = vld [vmem:[#allocation2 + $0xae8] sm:$0xff] }
 0x1ba   : > { %v1058_v4 = vpop.f32.mrf.mxu0  ;;  %v1313_v5 = vpop.f32.mrf.mxu1 }
 0x1bb   : > { %v3657_v10 = vadd.f32 %v1311_v60, %v1057_v61  ;;  %v620_v4 = vld [vmem:[#allocation2 + $0xb48] sm:$0xff] }
 0x1bc   : > { %v1061_v12 = vpop.f32.mrf.mxu0  ;;  %v1316_v13 = vpop.f32.mrf.mxu1  ;;  %1620 = vmatmul.mubr.f32.gmra.mxu0 %v670_v63  ;;  %1875 = vmatmul.mubr.f32.gmra.mxu1 %v672_v2  ;;  %v849_v2 = vld [vmem:[%s3211_s21 + $0x560] sm:$0xff] }
 0x1bd   : > { %v1062_v16 = vadd.f32 %v3506_v20, %v1061_v12  ;;  %1944 = vmatprep.mubr.f32.mxu0 %v268_v6  ;;  %2089 = vmatprep.mubr.f32.mxu1 %v587_v7  ;;  %v300_v12 = vld [vmem:[#allocation2 + $0x148] sm:$0xff] }
 0x1be   : > { %v1063_v19 = vpop.f32.mrf.mxu0  ;;  %v1318_v21 = vpop.f32.mrf.mxu1 }
 0x1bf   : > { %v3660_v28 = vadd.f32 %v1316_v13, %v1062_v16  ;;  %v619_v13 = vld [vmem:[#allocation2 + $0xb40] sm:$0xff]  ;;  %v312_v19 = vld [vmem:[#allocation2 + $0x1a8] sm:$0xff] }
 0x1c0   : > { %v1066_v30 = vpop.f32.mrf.mxu0  ;;  %v1321_v31 = vpop.f32.mrf.mxu1  ;;  %1945 = vmatmul.mubr.f32.vlgmr.msra.gmra.mxu0 %v267_v17  ;;  %2090 = vmatmul.mubr.f32.vlgmr.msra.gmra.mxu1 %v586_v18  ;;  %v848_v18 = vld [vmem:[%s3211_s21 + $0x558] sm:$0xff] }
 0x1c1   : > { %v1067_v20 = vadd.f32 %v3665_v34, %v1066_v30  ;;  %1949 = vmatprep.mubr.f32.mxu0 %v279_v22  ;;  %2094 = vmatprep.mubr.f32.mxu1 %v598_v27  ;;  %v631_v22 = vld [vmem:[#allocation2 + $0xba0] sm:$0xff] }
 0x1c2   : > { %v1068_v39 = vpop.f32.mrf.mxu0  ;;  %v1323_v42 = vpop.f32.mrf.mxu1  ;;  %2626 = vmatpush3.msra.mxu1 %v3638_v47  ;;  %v301_v47 = vld [vmem:[#allocation2 + $0x150] sm:$0xff] }
 0x1c3   : > { %v3669_v48 = vadd.f32 %v1321_v31, %v1067_v20  ;;  %2627 = vmatprep.subr.mxu1 %v851_v32  ;;  %v847_v31 = vld [vmem:[%s3211_s21 + $0x550] sm:$0xff]  ;;  %v630_v39 = vld [vmem:[#allocation2 + $0xb98] sm:$0xff] }
 0x1c4   : > { %v1071_v49 = vpop.f32.mrf.mxu0  ;;  %v1326_v52 = vpop.f32.mrf.mxu1  ;;  %1950 = vmatmul.mubr.f32.gmra.mxu0 %v278_v35  ;;  %2095 = vmatmul.mubr.f32.gmra.mxu1 %v597_v36  ;;  %v311_v20 = vld [vmem:[#allocation2 + $0x1a0] sm:$0xff]  ;;  %v846_v42 = vld [vmem:[%s3211_s21 + $0x548] sm:$0xff] }
 0x1c5   : > { %v1072_v54 = vadd.f32 %v3665_v34, %v1071_v49  ;;  %1954 = vmatprep.mubr.f32.mxu0 %v290_v45  ;;  %2099 = vmatprep.mubr.f32.mxu1 %v609_v46  ;;  %v323_v46 = vld [vmem:[#allocation2 + $0x200] sm:$0xff] }
 0x1c6   : > { %v1073_v60 = vpop.f32.mrf.mxu0  ;;  %v1328_v61 = vpop.f32.mrf.mxu1  ;;  %2628 = vmatpush3.msra.mxu1 %v851_v32 }
 0x1c7   : > { %v3673_v63 = vadd.f32 %v1326_v52, %v1072_v54  ;;  %2629 = vmatprep.subr.mxu1 %v850_v53  ;;  %v642_v54 = vld [vmem:[#allocation2 + $0xbf8] sm:$0xff] }
 0x1c8   : > { %v1076_v5 = vpop.f32.mrf.mxu0  ;;  %v1331_v6 = vpop.f32.mrf.mxu1  ;;  %1955 = vmatmul.mubr.f32.gmra.mxu0 %v289_v56  ;;  %2100 = vmatmul.mubr.f32.gmra.mxu1 %v608_v0  ;;  %v322_v0 = vld [vmem:[#allocation2 + $0x1f8] sm:$0xff] }
 0x1c9   : > { %v1077_v7 = vadd.f32 %v3665_v34, %v1076_v5  ;;  %2630 = vmatpush3.msra.mxu1 %v850_v53  ;;  %1959 = vmatprep.mubr.f32.mxu0 %v301_v47  ;;  %v845_v53 = vld [vmem:[%s3211_s21 + $0x540] sm:$0xff]  ;;  %v334_v5 = vld [vmem:[#allocation2 + $0x258] sm:$0xff] }
 0x1ca   : > { %v1078_v16 = vpop.f32.mrf.mxu0  ;;  %v1333_v17 = vpop.f32.mrf.mxu1  ;;  %2631 = vmatprep.subr.mxu1 %v849_v2  ;;  %2104 = vmatprep.mubr.f32.mxu1 %v620_v4  ;;  %v641_v47 = vld [vmem:[#allocation2 + $0xbf0] sm:$0xff] }
 0x1cb   : > { %v3678_v21 = vadd.f32 %v1331_v6, %v1077_v7  ;;  %2632 = vmatpush3.msra.mxu1 %v849_v2  ;;  %v844_v2 = vld [vmem:[%s3211_s21 + $0x538] sm:$0xff]  ;;  %v333_v17 = vld [vmem:[#allocation2 + $0x250] sm:$0xff] }
 0x1cc   : > { %v1081_v27 = vpop.f32.mrf.mxu0  ;;  %v1336_v30 = vpop.f32.mrf.mxu1  ;;  %1960 = vmatmul.mubr.f32.gmra.mxu0 %v300_v12  ;;  %2105 = vmatmul.mubr.f32.gmra.mxu1 %v619_v13  ;;  %v843_v12 = vld [vmem:[%s3211_s21 + $0x530] sm:$0xff]  ;;  %v653_v13 = vld [vmem:[#allocation2 + $0xc50] sm:$0xff] }
 0x1cd   : > { %v1082_v32 = vadd.f32 %v3665_v34, %v1081_v27  ;;  %2633 = vmatprep.subr.mxu1 %v848_v18  ;;  %1964 = vmatprep.mubr.f32.mxu0 %v312_v19  ;;  %v842_v27 = vld [vmem:[%s3211_s21 + $0x528] sm:$0xff] }
 0x1ce   : > { %2634 = vmatpush3.msra.mxu1 %v848_v18  ;;  %v1083_v35 = vpop.f32.mrf.mxu0  ;;  %v1338_v36 = vpop.f32.mrf.mxu1  ;;  %2109 = vmatprep.mubr.f32.mxu1 %v631_v22  ;;  %v652_v22 = vld [vmem:[#allocation2 + $0xc48] sm:$0xff] }
 0x1cf   : > { %v3683_v45 = vadd.f32 %v1336_v30, %v1082_v32  ;;  %2635 = vmatprep.subr.mxu1 %v847_v31  ;;  %v841_v35 = vld [vmem:[%s3211_s21 + $0x520] sm:$0xff]  ;;  %v664_v36 = vld [vmem:[#allocation2 + $0xca8] sm:$0xff] }
 0x1d0   : > { %2636 = vmatpush3.msra.mxu1 %v847_v31  ;;  %v1086_v49 = vpop.f32.mrf.mxu0  ;;  %v1341_v52 = vpop.f32.mrf.mxu1  ;;  %1965 = vmatmul.mubr.f32.gmra.mxu0 %v311_v20  ;;  %v345_v31 = vld [vmem:[#allocation2 + $0x2b0] sm:$0xff] }
 0x1d1   : > { %v1087_v56 = vadd.f32 %v3665_v34, %v1086_v49  ;;  %2110 = vmatmul.mubr.f32.gmra.mxu1 %v630_v39  ;;  %2637 = vmatprep.subr.mxu1 %v846_v42 }
 0x1d2   : > { %2638 = vmatpush3.msra.mxu1 %v846_v42  ;;  %v1088_v60 = vpop.f32.mrf.mxu0  ;;  %v1343_v61 = vpop.f32.mrf.mxu1  ;;  %1969 = vmatprep.mubr.f32.mxu0 %v323_v46  ;;  %v344_v42 = vld [vmem:[#allocation2 + $0x2a8] sm:$0xff] }
 0x1d3   : > { %v3688_v4 = vadd.f32 %v1341_v52, %v1087_v56  ;;  %2639 = vmatprep.subr.mxu1 %v845_v53  ;;  %2114 = vmatprep.mubr.f32.mxu1 %v642_v54  ;;  %v663_v52 = vld [vmem:[#allocation2 + $0xca0] sm:$0xff]  ;;  %v356_v56 = vld [vmem:[#allocation2 + $0x308] sm:$0xff] }
 0x1d4   : > { %2640 = vmatpush3.msra.mxu1 %v845_v53  ;;  %v1091_v6 = vpop.f32.mrf.mxu0  ;;  %v1346_v7 = vpop.f32.mrf.mxu1  ;;  %1970 = vmatmul.mubr.f32.gmra.mxu0 %v322_v0  ;;  %v840_v53 = vld [vmem:[%s3211_s21 + $0x518] sm:$0xff]  ;;  %v839_v61 = vld [vmem:[%s3211_s21 + $0x510] sm:$0xff] }
 0x1d5   : > { %v1092_v16 = vadd.f32 %v3665_v34, %v1091_v6  ;;  %2115 = vmatmul.mubr.f32.gmra.mxu1 %v641_v47  ;;  %2641 = vmatprep.subr.mxu1 %v844_v2  ;;  %v675_v47 = vld [vmem:[#allocation2 + $0xd00] sm:$0xff] }
 0x1d6   : > { %2642 = vmatpush3.msra.mxu1 %v844_v2  ;;  %v1093_v18 = vpop.f32.mrf.mxu0  ;;  %v1348_v19 = vpop.f32.mrf.mxu1  ;;  %1974 = vmatprep.mubr.f32.mxu0 %v334_v5  ;;  %v355_v5 = vld [vmem:[#allocation2 + $0x300] sm:$0xff] }
 0x1d7   : > { %v3693_v30 = vadd.f32 %v1346_v7, %v1092_v16  ;;  %2643 = vmatprep.subr.mxu1 %v843_v12  ;;  %2119 = vmatprep.mubr.f32.mxu1 %v653_v13  ;;  %v838_v13 = vld [vmem:[%s3211_s21 + $0x508] sm:$0xff] }
 0x1d8   : > { %2644 = vmatpush3.msra.mxu1 %v843_v12  ;;  %v1096_v32 = vpop.f32.mrf.mxu0  ;;  %v1351_v20 = vpop.f32.mrf.mxu1  ;;  %1975 = vmatmul.mubr.f32.gmra.mxu0 %v333_v17  ;;  %v674_v12 = vld [vmem:[#allocation2 + $0xcf8] sm:$0xff]  ;;  %v367_v17 = vld [vmem:[#allocation2 + $0x360] sm:$0xff] }
 0x1d9   : > { %v1097_v39 = vadd.f32 %v3665_v34, %v1096_v32  ;;  %2120 = vmatmul.mubr.f32.gmra.mxu1 %v652_v22  ;;  %2645 = vmatprep.subr.mxu1 %v842_v27  ;;  %v837_v22 = vld [vmem:[%s3211_s21 + $0x500] sm:$0xff]  ;;  %v366_v32 = vld [vmem:[#allocation2 + $0x358] sm:$0xff] }
 0x1da   : > { %2646 = vmatpush3.msra.mxu1 %v842_v27  ;;  %v1098_v46 = vpop.f32.mrf.mxu0  ;;  %v1353_v49 = vpop.f32.mrf.mxu1  ;;  %1979 = vmatprep.mubr.f32.mxu0 %v345_v31  ;;  %v269_v27 = vld [vmem:[#allocation2 + $0x50] sm:$0xff] }
 0x1db   : > { %v3698_v54 = vadd.f32 %v1351_v20, %v1097_v39  ;;  %2647 = vmatprep.subr.mxu1 %v841_v35  ;;  %2124 = vmatprep.mubr.f32.mxu1 %v664_v36  ;;  %v280_v36 = vld [vmem:[#allocation2 + $0xa8] sm:$0xff]  ;;  %v378_v39 = vld [vmem:[#allocation2 + $0x3b8] sm:$0xff]  ;;  %v291_v46 = vld [vmem:[#allocation2 + $0x100] sm:$0xff] }
 0x1dc   : > { %2648 = vmatpush3.msra.mxu1 %v841_v35  ;;  %v1101_v0 = vpop.f32.mrf.mxu0  ;;  %v1356_v60 = vpop.f32.mrf.mxu1  ;;  %1980 = vmatmul.mubr.f32.gmra.mxu0 %v344_v42 }
 0x1dd   : > { %v1102_v2 = vadd.f32 %v3665_v34, %v1101_v0  ;;  %2125 = vmatmul.mubr.f32.gmra.mxu1 %v663_v52  ;;  %2649 = vmatprep.subr.mxu1 %v840_v53 }
 0x1de   : > { %2650 = vmatpush3.msra.mxu1 %v840_v53  ;;  %v1103_v6 = vpop.f32.mrf.mxu0  ;;  %v1358_v7 = vpop.f32.mrf.mxu1  ;;  %1984 = vmatprep.mubr.f32.mxu0 %v356_v56  ;;  %v377_v56 = vld [vmem:[#allocation2 + $0x3b0] sm:$0xff] }
 0x1df   : > { %v3703_v16 = vadd.f32 %v1356_v60, %v1102_v2  ;;  %2651 = vmatprep.subr.mxu1 %v839_v61  ;;  %2129 = vmatprep.mubr.f32.mxu1 %v675_v47  ;;  %v389_v47 = vld [vmem:[#allocation2 + $0x410] sm:$0xff] }
 0x1e0   : > { %2652 = vmatpush3.msra.mxu1 %v839_v61  ;;  %v1106_v18 = vpop.f32.mrf.mxu0  ;;  %v1361_v19 = vpop.f32.mrf.mxu1  ;;  %1985 = vmatmul.mubr.f32.gmra.mxu0 %v355_v5  ;;  %v302_v61 = vld [vmem:[#allocation2 + $0x158] sm:$0xff]  ;;  %v313_v5 = vld [vmem:[#allocation2 + $0x1b0] sm:$0xff] }
 0x1e1   : > { %v1107_v31 = vadd.f32 %v3665_v34, %v1106_v18  ;;  %2130 = vmatmul.mubr.f32.gmra.mxu1 %v674_v12  ;;  %2653 = vmatprep.subr.mxu1 %v838_v13  ;;  %v324_v18 = vld [vmem:[#allocation2 + $0x208] sm:$0xff] }
 0x1e2   : > { %2654 = vmatpush3.msra.mxu1 %v838_v13  ;;  %v1108_v20 = vpop.f32.mrf.mxu0  ;;  %v1363_v35 = vpop.f32.mrf.mxu1  ;;  %1989 = vmatprep.mubr.f32.mxu0 %v367_v17  ;;  %v388_v13 = vld [vmem:[#allocation2 + $0x408] sm:$0xff] }
 0x1e3   : > { %v3707_v42 = vadd.f32 %v1361_v19, %v1107_v31  ;;  %2655 = vmatprep.subr.mxu1 %v837_v22  ;;  %2657 = vmatprep.mubr.f32.mxu1 %v269_v27  ;;  %v400_v19 = vld [vmem:[#allocation2 + $0x468] sm:$0xff]  ;;  %v335_v27 = vld [vmem:[#allocation2 + $0x260] sm:$0xff] }
 0x1e4   : > { %2656 = vmatpush3.msra.mxu1 %v837_v22  ;;  %v1111_v49 = vpop.f32.mrf.mxu0  ;;  %v1366_v52 = vpop.f32.mrf.mxu1  ;;  %1990 = vmatmul.mubr.f32.gmra.mxu0 %v366_v32  ;;  %v399_v35 = vld [vmem:[#allocation2 + $0x460] sm:$0xff] }
 0x1e5   : > { %v1112_v53 = vadd.f32 %v3665_v34, %v1111_v49  ;;  %2658 = vmatmul.mubr.f32.vlgmr.msra.gmra.mxu1 %v280_v36  ;;  %1994 = vmatprep.mubr.f32.mxu0 %v378_v39  ;;  %v346_v39 = vld [vmem:[#allocation2 + $0x2b8] sm:$0xff] }
 0x1e6   : > { %v1113_v0 = vpop.f32.mrf.mxu0  ;;  %v1368_v60 = vpop.f32.mrf.mxu1  ;;  %2660 = vmatprep.mubr.f32.mxu1 %v291_v46  ;;  %v411_v46 = vld [vmem:[#allocation2 + $0x4c0] sm:$0xff] }
 0x1e7   : > { %v3710_v2 = vadd.f32 %v1366_v52, %v1112_v53  ;;  %v357_v52 = vld [vmem:[#allocation2 + $0x310] sm:$0xff]  ;;  %v410_v60 = vld [vmem:[#allocation2 + $0x4b8] sm:$0xff] }
 0x1e8   : > { %v1436_v6 = vpop.f32.mrf.mxu0  ;;  %v1691_v7 = vpop.f32.mrf.mxu1  ;;  %1995 = vmatmul.mubr.f32.gmra.mxu0 %v377_v56 }
 0x1e9   : > { %v1437_v12 = vadd.f32 %v1436_v6, %v3512_v33  ;;  %2661 = vmatmul.mubr.f32.gmra.mxu1 %v302_v61  ;;  %1999 = vmatprep.mubr.f32.mxu0 %v389_v47  ;;  %v368_v47 = vld [vmem:[#allocation2 + $0x368] sm:$0xff] }
 0x1ea   : > { %v1438_v34 = vpop.f32.mrf.mxu0  ;;  %v1693_v17 = vpop.f32.mrf.mxu1  ;;  %2663 = vmatprep.mubr.f32.mxu1 %v313_v5  ;;  %v422_v5 = vld [vmem:[#allocation2 + $0x518] sm:$0xff] }
 0x1eb   : > { %v3713_v22 = vadd.f32 %v1691_v7, %v1437_v12  ;;  %v379_v7 = vld [vmem:[#allocation2 + $0x3c0] sm:$0xff]  ;;  %v421_v17 = vld [vmem:[#allocation2 + $0x510] sm:$0xff] }
 0x1ec   : > { %v1441_v31 = vpop.f32.mrf.mxu0  ;;  %v1696_v32 = vpop.f32.mrf.mxu1  ;;  %2000 = vmatmul.mubr.f32.gmra.mxu0 %v388_v13 }
 0x1ed   : > { %v1442_v20 = vadd.f32 %v1441_v31, %v3518_v44  ;;  %2664 = vmatmul.mubr.f32.gmra.mxu1 %v324_v18  ;;  %2004 = vmatprep.mubr.f32.mxu0 %v400_v19  ;;  %v390_v19 = vld [vmem:[#allocation2 + $0x418] sm:$0xff] }
 0x1ee   : > { %v1443_v33 = vpop.f32.mrf.mxu0  ;;  %v1698_v36 = vpop.f32.mrf.mxu1  ;;  %2666 = vmatprep.mubr.f32.mxu1 %v335_v27  ;;  %v433_v27 = vld [vmem:[#allocation2 + $0x570] sm:$0xff] }
 0x1ef   : > { %v3716_v49 = vadd.f32 %v1696_v32, %v1442_v20  ;;  %v401_v32 = vld [vmem:[#allocation2 + $0x470] sm:$0xff]  ;;  %v432_v36 = vld [vmem:[#allocation2 + $0x568] sm:$0xff] }
 0x1f0   : > { %v1446_v53 = vpop.f32.mrf.mxu0  ;;  %v1701_v56 = vpop.f32.mrf.mxu1  ;;  %2005 = vmatmul.mubr.f32.gmra.mxu0 %v399_v35 }
 0x1f1   : > { %v1447_v0 = vadd.f32 %v1446_v53, %v3524_v55  ;;  %2667 = vmatmul.mubr.f32.gmra.mxu1 %v346_v39  ;;  %2009 = vmatprep.mubr.f32.mxu0 %v411_v46  ;;  %v412_v46 = vld [vmem:[#allocation2 + $0x4c8] sm:$0xff] }
 0x1f2   : > { %v1448_v44 = vpop.f32.mrf.mxu0  ;;  %v1703_v61 = vpop.f32.mrf.mxu1  ;;  %2669 = vmatprep.mubr.f32.mxu1 %v357_v52  ;;  %v444_v52 = vld [vmem:[#allocation2 + $0x5c8] sm:$0xff] }
 0x1f3   : > { %v3719_v6 = vadd.f32 %v1701_v56, %v1447_v0  ;;  %v423_v56 = vld [vmem:[#allocation2 + $0x520] sm:$0xff] }
 0x1f4   : > { %v1451_v12 = vpop.f32.mrf.mxu0  ;;  %v1706_v13 = vpop.f32.mrf.mxu1  ;;  %2010 = vmatmul.mubr.f32.gmra.mxu0 %v410_v60  ;;  %v443_v61 = vld [vmem:[#allocation2 + $0x5c0] sm:$0xff] }
 0x1f5   : > { %v1452_v34 = vadd.f32 %v1451_v12, %v3530_v3  ;;  %2670 = vmatmul.mubr.f32.gmra.mxu1 %v368_v47  ;;  %2014 = vmatprep.mubr.f32.mxu0 %v422_v5  ;;  %v434_v5 = vld [vmem:[#allocation2 + $0x578] sm:$0xff] }
 0x1f6   : > { %v1453_v55 = vpop.f32.mrf.mxu0  ;;  %v1708_v18 = vpop.f32.mrf.mxu1  ;;  %2672 = vmatprep.mubr.f32.mxu1 %v379_v7  ;;  %v455_v7 = vld [vmem:[#allocation2 + $0x620] sm:$0xff] }
 0x1f7   : > { %v3722_v31 = vadd.f32 %v1706_v13, %v1452_v34  ;;  %v445_v13 = vld [vmem:[#allocation2 + $0x5d0] sm:$0xff]  ;;  %v454_v18 = vld [vmem:[#allocation2 + $0x618] sm:$0xff] }
 0x1f8   : > { %v1456_v20 = vpop.f32.mrf.mxu0  ;;  %v1711_v35 = vpop.f32.mrf.mxu1  ;;  %2015 = vmatmul.mubr.f32.gmra.mxu0 %v421_v17 }
 0x1f9   : > { %v1457_v33 = vadd.f32 %v1456_v20, %v3536_v14  ;;  %2673 = vmatmul.mubr.f32.gmra.mxu1 %v390_v19  ;;  %2019 = vmatprep.mubr.f32.mxu0 %v433_v27  ;;  %v456_v27 = vld [vmem:[#allocation2 + $0x628] sm:$0xff] }
 0x1fa   : > { %v1458_v3 = vpop.f32.mrf.mxu0  ;;  %v1713_v39 = vpop.f32.mrf.mxu1  ;;  %2675 = vmatprep.mubr.f32.mxu1 %v401_v32  ;;  %v466_v32 = vld [vmem:[#allocation2 + $0x678] sm:$0xff] }
 0x1fb   : > { %v3725_v53 = vadd.f32 %v1711_v35, %v1457_v33  ;;  %v467_v35 = vld [vmem:[#allocation2 + $0x680] sm:$0xff]  ;;  %v465_v39 = vld [vmem:[#allocation2 + $0x670] sm:$0xff] }
 0x1fc   : > { %v1461_v0 = vpop.f32.mrf.mxu0  ;;  %v1716_v60 = vpop.f32.mrf.mxu1  ;;  %2020 = vmatmul.mubr.f32.gmra.mxu0 %v432_v36 }
 0x1fd   : > { %v1462_v44 = vadd.f32 %v1461_v0, %v3542_v26  ;;  %2676 = vmatmul.mubr.f32.gmra.mxu1 %v412_v46  ;;  %2024 = vmatprep.mubr.f32.mxu0 %v444_v52  ;;  %v478_v52 = vld [vmem:[#allocation2 + $0x6d8] sm:$0xff] }
 0x1fe   : > { %v1463_v14 = vpop.f32.mrf.mxu0  ;;  %v1718_v47 = vpop.f32.mrf.mxu1  ;;  %2678 = vmatprep.mubr.f32.mxu1 %v423_v56  ;;  %v477_v56 = vld [vmem:[#allocation2 + $0x6d0] sm:$0xff] }
 0x1ff   : > { %v3728_v12 = vadd.f32 %v1716_v60, %v1462_v44  ;;  %v489_v60 = vld [vmem:[#allocation2 + $0x730] sm:$0xff]  ;;  %v476_v47 = vld [vmem:[#allocation2 + $0x6c8] sm:$0xff] }
 0x200   : > { %v1466_v34 = vpop.f32.mrf.mxu0  ;;  %v1721_v17 = vpop.f32.mrf.mxu1  ;;  %2025 = vmatmul.mubr.f32.gmra.mxu0 %v443_v61 }
 0x201   : > { %v1467_v55 = vadd.f32 %v1466_v34, %v3548_v38  ;;  %2679 = vmatmul.mubr.f32.gmra.mxu1 %v434_v5  ;;  %2029 = vmatprep.mubr.f32.mxu0 %v455_v7  ;;  %v500_v7 = vld [vmem:[#allocation2 + $0x788] sm:$0xff] }
 0x202   : > { %v1468_v26 = vpop.f32.mrf.mxu0  ;;  %v1723_v19 = vpop.f32.mrf.mxu1  ;;  %2681 = vmatprep.mubr.f32.mxu1 %v445_v13  ;;  %v488_v13 = vld [vmem:[#allocation2 + $0x728] sm:$0xff] }
 0x203   : > { %v3731_v20 = vadd.f32 %v1721_v17, %v1467_v55  ;;  %v511_v17 = vld [vmem:[#allocation2 + $0x7e0] sm:$0xff] }
 0x204   : > { %v1471_v33 = vpop.f32.mrf.mxu0  ;;  %v1726_v36 = vpop.f32.mrf.mxu1  ;;  %2030 = vmatmul.mubr.f32.gmra.mxu0 %v454_v18  ;;  %v487_v19 = vld [vmem:[#allocation2 + $0x720] sm:$0xff] }
 0x205   : > { %v1472_v3 = vadd.f32 %v1471_v33, %v3554_v50  ;;  %2682 = vmatmul.mubr.f32.gmra.mxu1 %v456_v27  ;;  %2034 = vmatprep.mubr.f32.mxu0 %v466_v32  ;;  %v522_v32 = vld [vmem:[#allocation2 + $0x838] sm:$0xff] }
 0x206   : > { %v1473_v38 = vpop.f32.mrf.mxu0  ;;  %v1728_v46 = vpop.f32.mrf.mxu1  ;;  %2684 = vmatprep.mubr.f32.mxu1 %v467_v35  ;;  %v499_v35 = vld [vmem:[#allocation2 + $0x780] sm:$0xff] }
 0x207   : > { %v3734_v0 = vadd.f32 %v1726_v36, %v1472_v3  ;;  %v533_v36 = vld [vmem:[#allocation2 + $0x890] sm:$0xff]  ;;  %v498_v46 = vld [vmem:[#allocation2 + $0x778] sm:$0xff] }
 0x208   : > { %v1476_v44 = vpop.f32.mrf.mxu0  ;;  %v1731_v61 = vpop.f32.mrf.mxu1  ;;  %2035 = vmatmul.mubr.f32.gmra.mxu0 %v465_v39 }
 0x209   : > { %v1477_v14 = vadd.f32 %v1476_v44, %v3560_v62  ;;  %2685 = vmatmul.mubr.f32.gmra.mxu1 %v478_v52  ;;  %2039 = vmatprep.mubr.f32.mxu0 %v477_v56  ;;  %v544_v56 = vld [vmem:[#allocation2 + $0x8e8] sm:$0xff] }
 0x20a   : > { %v1478_v50 = vpop.f32.mrf.mxu0  ;;  %v1733_v5 = vpop.f32.mrf.mxu1  ;;  %2687 = vmatprep.mubr.f32.mxu1 %v489_v60  ;;  %v510_v60 = vld [vmem:[#allocation2 + $0x7d8] sm:$0xff] }
 0x20b   : > { %v3737_v34 = vadd.f32 %v1731_v61, %v1477_v14  ;;  %v555_v61 = vld [vmem:[#allocation2 + $0x940] sm:$0xff]  ;;  %v509_v5 = vld [vmem:[#allocation2 + $0x7d0] sm:$0xff] }
 0x20c   : > { %v1481_v55 = vpop.f32.mrf.mxu0  ;;  %v1736_v18 = vpop.f32.mrf.mxu1  ;;  %2040 = vmatmul.mubr.f32.gmra.mxu0 %v476_v47 }
 0x20d   : > { %v1482_v26 = vadd.f32 %v1481_v55, %v3566_v11  ;;  %2688 = vmatmul.mubr.f32.gmra.mxu1 %v500_v7  ;;  %2044 = vmatprep.mubr.f32.mxu0 %v488_v13  ;;  %v566_v13 = vld [vmem:[#allocation2 + $0x998] sm:$0xff] }
 0x20e   : > { %v1483_v62 = vpop.f32.mrf.mxu0  ;;  %v1738_v27 = vpop.f32.mrf.mxu1  ;;  %2690 = vmatprep.mubr.f32.mxu1 %v511_v17  ;;  %v521_v17 = vld [vmem:[#allocation2 + $0x830] sm:$0xff] }
 0x20f   : > { %v3740_v33 = vadd.f32 %v1736_v18, %v1482_v26  ;;  %v577_v18 = vld [vmem:[#allocation2 + $0x9f0] sm:$0xff]  ;;  %v520_v27 = vld [vmem:[#allocation2 + $0x828] sm:$0xff] }
 0x210   : > { %v1486_v3 = vpop.f32.mrf.mxu0  ;;  %v1741_v39 = vpop.f32.mrf.mxu1  ;;  %2045 = vmatmul.mubr.f32.gmra.mxu0 %v487_v19 }
 0x211   : > { %v1487_v38 = vadd.f32 %v1486_v3, %v3572_v24  ;;  %2691 = vmatmul.mubr.f32.gmra.mxu1 %v522_v32  ;;  %2049 = vmatprep.mubr.f32.mxu0 %v499_v35  ;;  %v588_v35 = vld [vmem:[#allocation2 + $0xa48] sm:$0xff] }
 0x212   : > { %v1488_v11 = vpop.f32.mrf.mxu0  ;;  %v1743_v52 = vpop.f32.mrf.mxu1  ;;  %2693 = vmatprep.mubr.f32.mxu1 %v533_v36  ;;  %v532_v36 = vld [vmem:[#allocation2 + $0x888] sm:$0xff] }
 0x213   : > { %v3743_v44 = vadd.f32 %v1741_v39, %v1487_v38  ;;  %v599_v39 = vld [vmem:[#allocation2 + $0xaa0] sm:$0xff] }
 0x214   : > { %v1491_v14 = vpop.f32.mrf.mxu0  ;;  %v1746_v47 = vpop.f32.mrf.mxu1  ;;  %2050 = vmatmul.mubr.f32.gmra.mxu0 %v498_v46  ;;  %v531_v52 = vld [vmem:[#allocation2 + $0x880] sm:$0xff] }
 0x215   : > { %v1492_v50 = vadd.f32 %v1491_v14, %v3578_v37  ;;  %2694 = vmatmul.mubr.f32.gmra.mxu1 %v544_v56  ;;  %2054 = vmatprep.mubr.f32.mxu0 %v510_v60  ;;  %v610_v60 = vld [vmem:[#allocation2 + $0xaf8] sm:$0xff] }
 0x216   : > { %v1493_v24 = vpop.f32.mrf.mxu0  ;;  %v1748_v7 = vpop.f32.mrf.mxu1  ;;  %2696 = vmatprep.mubr.f32.mxu1 %v555_v61  ;;  %v543_v61 = vld [vmem:[#allocation2 + $0x8e0] sm:$0xff] }
 0x217   : > { %v3746_v55 = vadd.f32 %v1746_v47, %v1492_v50  ;;  %v621_v47 = vld [vmem:[#allocation2 + $0xb50] sm:$0xff]  ;;  %v542_v7 = vld [vmem:[#allocation2 + $0x8d8] sm:$0xff] }
 0x218   : > { %v1496_v26 = vpop.f32.mrf.mxu0  ;;  %v1751_v19 = vpop.f32.mrf.mxu1  ;;  %2055 = vmatmul.mubr.f32.gmra.mxu0 %v509_v5 }
 0x219   : > { %v1497_v62 = vadd.f32 %v1496_v26, %v3584_v51  ;;  %2697 = vmatmul.mubr.f32.gmra.mxu1 %v566_v13  ;;  %2059 = vmatprep.mubr.f32.mxu0 %v521_v17  ;;  %v632_v17 = vld [vmem:[#allocation2 + $0xba8] sm:$0xff] }
 0x21a   : > { %v1498_v37 = vpop.f32.mrf.mxu0  ;;  %v1753_v32 = vpop.f32.mrf.mxu1  ;;  %2699 = vmatprep.mubr.f32.mxu1 %v577_v18  ;;  %v554_v18 = vld [vmem:[#allocation2 + $0x938] sm:$0xff] }
 0x21b   : > { %v3749_v3 = vadd.f32 %v1751_v19, %v1497_v62  ;;  %v643_v19 = vld [vmem:[#allocation2 + $0xc00] sm:$0xff]  ;;  %v553_v32 = vld [vmem:[#allocation2 + $0x930] sm:$0xff] }
 0x21c   : > { %v1501_v38 = vpop.f32.mrf.mxu0  ;;  %v1756_v46 = vpop.f32.mrf.mxu1  ;;  %2060 = vmatmul.mubr.f32.gmra.mxu0 %v520_v27 }
 0x21d   : > { %v1502_v11 = vadd.f32 %v1501_v38, %v3590_v1  ;;  %2700 = vmatmul.mubr.f32.gmra.mxu1 %v588_v35  ;;  %2064 = vmatprep.mubr.f32.mxu0 %v532_v36  ;;  %v654_v36 = vld [vmem:[#allocation2 + $0xc58] sm:$0xff] }
 0x21e   : > { %v1503_v51 = vpop.f32.mrf.mxu0  ;;  %v1758_v56 = vpop.f32.mrf.mxu1  ;;  %2702 = vmatprep.mubr.f32.mxu1 %v599_v39  ;;  %v565_v39 = vld [vmem:[#allocation2 + $0x990] sm:$0xff] }
 0x21f   : > { %v3752_v14 = vadd.f32 %v1756_v46, %v1502_v11  ;;  %v665_v46 = vld [vmem:[#allocation2 + $0xcb0] sm:$0xff]  ;;  %v564_v56 = vld [vmem:[#allocation2 + $0x988] sm:$0xff] }
 0x220   : > { %v1506_v50 = vpop.f32.mrf.mxu0  ;;  %v1761_v5 = vpop.f32.mrf.mxu1  ;;  %2065 = vmatmul.mubr.f32.gmra.mxu0 %v531_v52 }
 0x221   : > { %v1507_v24 = vadd.f32 %v1506_v50, %v3596_v15  ;;  %2703 = vmatmul.mubr.f32.gmra.mxu1 %v610_v60  ;;  %2069 = vmatprep.mubr.f32.mxu0 %v543_v61  ;;  %v676_v61 = vld [vmem:[#allocation2 + $0xd08] sm:$0xff] }
 0x222   : > { %v1508_v1 = vpop.f32.mrf.mxu0  ;;  %v1763_v13 = vpop.f32.mrf.mxu1  ;;  %2705 = vmatprep.mubr.f32.mxu1 %v621_v47  ;;  %v576_v47 = vld [vmem:[#allocation2 + $0x9e8] sm:$0xff] }
 0x223   : > { %v3755_v26 = vadd.f32 %v1761_v5, %v1507_v24  ;;  %v575_v1 = vld [vmem:[#allocation2 + $0x9e0] sm:$0xff] }
 0x224   : > { %v1511_v62 = vpop.f32.mrf.mxu0  ;;  %v1766_v27 = vpop.f32.mrf.mxu1  ;;  %2070 = vmatmul.mubr.f32.gmra.mxu0 %v542_v7 }
 0x225   : > { %v1512_v37 = vadd.f32 %v1511_v62, %v3602_v29  ;;  %2706 = vmatmul.mubr.f32.gmra.mxu1 %v632_v17  ;;  %2074 = vmatprep.mubr.f32.mxu0 %v554_v18 }
 0x226   : > { %v1513_v15 = vpop.f32.mrf.mxu0  ;;  %v1768_v35 = vpop.f32.mrf.mxu1  ;;  %2708 = vmatprep.mubr.f32.mxu1 %v643_v19 }
 0x227   : > { %v3758_v38 = vadd.f32 %v1766_v27, %v1512_v37 }
 0x228   : > { %v1516_v11 = vpop.f32.mrf.mxu0  ;;  %v1771_v52 = vpop.f32.mrf.mxu1  ;;  %2075 = vmatmul.mubr.f32.gmra.mxu0 %v553_v32 }
 0x229   : > { %v1517_v51 = vadd.f32 %v1516_v11, %v3608_v43  ;;  %2709 = vmatmul.mubr.f32.gmra.mxu1 %v654_v36  ;;  %2079 = vmatprep.mubr.f32.mxu0 %v565_v39 }
 0x22a   : > { %v1518_v29 = vpop.f32.mrf.mxu0  ;;  %v1773_v60 = vpop.f32.mrf.mxu1  ;;  %2711 = vmatprep.mubr.f32.mxu1 %v665_v46 }
 0x22b   : > { %v3761_v50 = vadd.f32 %v1771_v52, %v1517_v51 }
 0x22c   : > { %v1521_v5 = vpop.f32.mrf.mxu0  ;;  %v1776_v24 = vpop.f32.mrf.mxu1  ;;  %2080 = vmatmul.mubr.f32.gmra.mxu0 %v564_v56 }
 0x22d   : > { %v1522_v7 = vadd.f32 %v1521_v5, %v3614_v58  ;;  %2712 = vmatmul.mubr.f32.gmra.mxu1 %v676_v61  ;;  %2084 = vmatprep.mubr.f32.mxu0 %v576_v47 }
 0x22e   : > { %v1523_v13 = vpop.f32.mrf.mxu0  ;;  %v1778_v43 = vpop.f32.mrf.mxu1 }
 0x22f   : > { %v3764_v17 = vadd.f32 %v1776_v24, %v1522_v7 }
 0x230   : > { %v1526_v18 = vpop.f32.mrf.mxu0  ;;  %v1781_v19 = vpop.f32.mrf.mxu1  ;;  %2085 = vmatmul.mubr.f32.gmra.mxu0 %v575_v1 }
 0x231   : > { %v1527_v62 = vadd.f32 %v1526_v18, %v3620_v9 }
 0x232   : > { %v1528_v27 = vpop.f32.mrf.mxu0  ;;  %v1783_v37 = vpop.f32.mrf.mxu1 }
 0x233   : > { %v3767_v32 = vadd.f32 %v1781_v19, %v1527_v62 }
 0x234   : > { %v1531_v15 = vpop.f32.mrf.mxu0  ;;  %v1786_v35 = vpop.f32.mrf.mxu1 }
 0x235   : > { %v1532_v58 = vadd.f32 %v1531_v15, %v3626_v25 }
 0x236   : > { %v1533_v36 = vpop.f32.mrf.mxu0  ;;  %v1788_v39 = vpop.f32.mrf.mxu1 }
 0x237   : > { %v3770_v46 = vadd.f32 %v1786_v35, %v1532_v58 }
 0x238   : > { %v1536_v11 = vpop.f32.mrf.mxu0  ;;  %v1791_v52 = vpop.f32.mrf.mxu1 }
 0x239   : > { %v1537_v51 = vadd.f32 %v1536_v11, %v3632_v41 }
 0x23a   : > { %v1538_v56 = vpop.f32.mrf.mxu0  ;;  %v1793_v29 = vpop.f32.mrf.mxu1 }
 0x23b   : > { %v3773_v60 = vadd.f32 %v1791_v52, %v1537_v51 }
 0x23c   : > { %v1541_v9 = vpop.f32.mrf.mxu0  ;;  %v1796_v61 = vpop.f32.mrf.mxu1 }
 0x23d   : > { %v1542_v47 = vadd.f32 %v1541_v9, %v3641_v59 }
 0x23e   : > { %v1543_v5 = vpop.f32.mrf.mxu0  ;;  %v1798_v24 = vpop.f32.mrf.mxu1 }
 0x23f   : > { %v3776_v7 = vadd.f32 %v1796_v61, %v1542_v47 }
 0x240   : > { %v1546_v25 = vpop.f32.mrf.mxu0  ;;  %v1801_v1 = vpop.f32.mrf.mxu1 }
 0x241   : > { %v1547_v13 = vadd.f32 %v1546_v25, %v3645_v8 }
 0x242   : > { %v1548_v43 = vpop.f32.mrf.mxu0  ;;  %v1803_v18 = vpop.f32.mrf.mxu1 }
 0x243   : > { %v3779_v19 = vadd.f32 %v1801_v1, %v1547_v13 }
 0x244   : > { %v1551_v41 = vpop.f32.mrf.mxu0  ;;  %v1806_v62 = vpop.f32.mrf.mxu1 }
 0x245   : > { %v1552_v27 = vadd.f32 %v1551_v41, %v3648_v23 }
 0x246   : > { %v1553_v37 = vpop.f32.mrf.mxu0  ;;  %v1808_v15 = vpop.f32.mrf.mxu1 }
 0x247   : > { %v3782_v35 = vadd.f32 %v1806_v62, %v1552_v27 }
 0x248   : > { %v1556_v59 = vpop.f32.mrf.mxu0  ;;  %v1811_v58 = vpop.f32.mrf.mxu1 }
 0x249   : > { %v1557_v36 = vadd.f32 %v1556_v59, %v3651_v40 }
 0x24a   : > { %v1558_v39 = vpop.f32.mrf.mxu0  ;;  %v1813_v11 = vpop.f32.mrf.mxu1 }
 0x24b   : > { %v3785_v52 = vadd.f32 %v1811_v58, %v1557_v36 }
 0x24c   : > { %v1561_v8 = vpop.f32.mrf.mxu0  ;;  %v1816_v51 = vpop.f32.mrf.mxu1 }
 0x24d   : > { %v1562_v56 = vadd.f32 %v1561_v8, %v3654_v57 }
 0x24e   : > { %v1563_v29 = vpop.f32.mrf.mxu0  ;;  %v1818_v9 = vpop.f32.mrf.mxu1 }
 0x24f   : > { %v3788_v61 = vadd.f32 %v1816_v51, %v1562_v56 }
 0x250   : > { %v1566_v23 = vpop.f32.mrf.mxu0  ;;  %v1821_v47 = vpop.f32.mrf.mxu1 }
 0x251   : > { %v1567_v5 = vadd.f32 %v1566_v23, %v3657_v10 }
 0x252   : > { %v1568_v24 = vpop.f32.mrf.mxu0  ;;  %v1823_v25 = vpop.f32.mrf.mxu1 }
 0x253   : > { %v3791_v1 = vadd.f32 %v1821_v47, %v1567_v5 }
 0x254   : > { %v1571_v40 = vpop.f32.mrf.mxu0  ;;  %v1826_v13 = vpop.f32.mrf.mxu1 }
 0x255   : > { %v1572_v43 = vadd.f32 %v1571_v40, %v3660_v28 }
 0x256   : > { %v1573_v18 = vpop.f32.mrf.mxu0  ;;  %v1828_v41 = vpop.f32.mrf.mxu1 }
 0x257   : > { %v3794_v62 = vadd.f32 %v1826_v13, %v1572_v43 }
 0x258   : > { %v1576_v57 = vpop.f32.mrf.mxu0  ;;  %v1831_v27 = vpop.f32.mrf.mxu1 }
 0x259   : > { %v1577_v37 = vadd.f32 %v1576_v57, %v3669_v48 }
 0x25a   : > { %v1578_v15 = vpop.f32.mrf.mxu0  ;;  %v1833_v59 = vpop.f32.mrf.mxu1 }
 0x25b   : > { %v3797_v58 = vadd.f32 %v1831_v27, %v1577_v37 }
 0x25c   : > { %v1581_v10 = vpop.f32.mrf.mxu0  ;;  %v1836_v36 = vpop.f32.mrf.mxu1 }
 0x25d   : > { %v1582_v39 = vadd.f32 %v1581_v10, %v3673_v63 }
 0x25e   : > { %v1583_v11 = vpop.f32.mrf.mxu0  ;;  %v1838_v8 = vpop.f32.mrf.mxu1 }
 0x25f   : > { %v1837_v51 = vadd.f32 %v1836_v36, %v1582_v39 }
 0x260   : > { %v1586_v28 = vpop.f32.mrf.mxu0  ;;  %v1841_v56 = vpop.f32.mrf.mxu1 }
 0x261   : > { %v1587_v29 = vadd.f32 %v1586_v28, %v3678_v21 }
 0x262   : > { %v1588_v9 = vpop.f32.mrf.mxu0  ;;  %v1843_v23 = vpop.f32.mrf.mxu1 }
 0x263   : > { %v1842_v47 = vadd.f32 %v1841_v56, %v1587_v29 }
 0x264   : > { %v1591_v5 = vpop.f32.mrf.mxu0  ;;  %v1846_v48 = vpop.f32.mrf.mxu1 }
 0x265   : > { %v1592_v24 = vadd.f32 %v1591_v5, %v3683_v45 }
 0x266   : > { %v1593_v25 = vpop.f32.mrf.mxu0  ;;  %v1848_v40 = vpop.f32.mrf.mxu1 }
 0x267   : > { %v1847_v13 = vadd.f32 %v1846_v48, %v1592_v24 }
 0x268   : > { %v1596_v43 = vpop.f32.mrf.mxu0  ;;  %v1851_v18 = vpop.f32.mrf.mxu1 }
 0x269   : > { %v1597_v63 = vadd.f32 %v1596_v43, %v3688_v4 }
 0x26a   : > { %v1598_v41 = vpop.f32.mrf.mxu0  ;;  %v1853_v57 = vpop.f32.mrf.mxu1 }
 0x26b   : > { %v1852_v27 = vadd.f32 %v1851_v18, %v1597_v63 }
 0x26c   : > { %v1601_v37 = vpop.f32.mrf.mxu0  ;;  %v1856_v15 = vpop.f32.mrf.mxu1 }
 0x26d   : > { %v1602_v21 = vadd.f32 %v1601_v37, %v3693_v30 }
 0x26e   : > { %v1603_v59 = vpop.f32.mrf.mxu0  ;;  %v1858_v10 = vpop.f32.mrf.mxu1 }
 0x26f   : > { %v1857_v36 = vadd.f32 %v1856_v15, %v1602_v21 }
 0x270   : > { %v1606_v39 = vpop.f32.mrf.mxu0  ;;  %v1861_v11 = vpop.f32.mrf.mxu1 }
 0x271   : > { %v1607_v45 = vadd.f32 %v1606_v39, %v3698_v54 }
 0x272   : > { %v1608_v8 = vpop.f32.mrf.mxu0  ;;  %v1863_v28 = vpop.f32.mrf.mxu1 }
 0x273   : > { %v1862_v56 = vadd.f32 %v1861_v11, %v1607_v45 }
 0x274   : > { %v1611_v29 = vpop.f32.mrf.mxu0  ;;  %v1866_v9 = vpop.f32.mrf.mxu1 }
 0x275   : > { %v1612_v4 = vadd.f32 %v1611_v29, %v3703_v16 }
 0x276   : > { %v1613_v23 = vpop.f32.mrf.mxu0  ;;  %v1868_v5 = vpop.f32.mrf.mxu1 }
 0x277   : > { %v1867_v48 = vadd.f32 %v1866_v9, %v1612_v4 }
 0x278   : > { %v1616_v24 = vpop.f32.mrf.mxu0  ;;  %v1871_v25 = vpop.f32.mrf.mxu1 }
 0x279   : > { %v1617_v30 = vadd.f32 %v1616_v24, %v3707_v42 }
 0x27a   : > { %v1618_v40 = vpop.f32.mrf.mxu0  ;;  %v1873_v43 = vpop.f32.mrf.mxu1 }
 0x27b   : > { %v1872_v18 = vadd.f32 %v1871_v25, %v1617_v30 }
 0x27c   : > { %v1621_v63 = vpop.f32.mrf.mxu0  ;;  %v1876_v41 = vpop.f32.mrf.mxu1 }
 0x27d   : > { %v1622_v54 = vadd.f32 %v1621_v63, %v3710_v2 }
 0x27e   : > { %v1623_v57 = vpop.f32.mrf.mxu0  ;;  %v1878_v37 = vpop.f32.mrf.mxu1 }
 0x27f   : > { %v1877_v15 = vadd.f32 %v1876_v41, %v1622_v54 }
 0x280   : > { %v1946_v21 = vpop.f32.mrf.mxu0  ;;  %v2091_v59 = vpop.f32.mrf.mxu1 }
 0x281   : > { %v3808_v16 = vadd.f32 %v2091_v59, %v1837_v51 }
 0x282   : > { %v1948_v10 = vpop.f32.mrf.mxu0  ;;  %v2093_v39 = vpop.f32.mrf.mxu1 }
 0x284   : > { %v1951_v11 = vpop.f32.mrf.mxu0  ;;  %v2096_v45 = vpop.f32.mrf.mxu1 }
 0x285   : > { %v3810_v8 = vadd.f32 %v2096_v45, %v1842_v47 }
 0x286   : > { %v1953_v42 = vpop.f32.mrf.mxu0  ;;  %v2098_v28 = vpop.f32.mrf.mxu1 }
 0x288   : > { %v1956_v29 = vpop.f32.mrf.mxu0  ;;  %v2101_v9 = vpop.f32.mrf.mxu1 }
 0x289   : > { %v3812_v4 = vadd.f32 %v2101_v9, %v1847_v13 }
 0x28a   : > { %v1958_v2 = vpop.f32.mrf.mxu0  ;;  %v2103_v23 = vpop.f32.mrf.mxu1 }
 0x28c   : > { %v1961_v5 = vpop.f32.mrf.mxu0  ;;  %v2106_v24 = vpop.f32.mrf.mxu1 }
 0x28d   : > { %v3814_v25 = vadd.f32 %v2106_v24, %v1852_v27 }
 0x28e   : > { %v1963_v51 = vpop.f32.mrf.mxu0  ;;  %v2108_v30 = vpop.f32.mrf.mxu1 }
 0x290   : > { %v1966_v40 = vpop.f32.mrf.mxu0 }
 0x291   : > { %v2111_v43 = vpop.f32.mrf.mxu1 }
 0x292   : > { %v3816_v63 = vadd.f32 %v2111_v43, %v1857_v36  ;;  %v1968_v47 = vpop.f32.mrf.mxu0 }
 0x293   : > { %v2113_v41 = vpop.f32.mrf.mxu1  ;;  %v1952_v47 = vadd.f32 %v1951_v11, %v3716_v49  ;;  %v1957_v49 = vadd.f32 %v1956_v29, %v3719_v6 }
 0x294   : > { %v1971_v54 = vpop.f32.mrf.mxu0 }
 0x295   : > { %v2116_v57 = vpop.f32.mrf.mxu1 }
 0x296   : > { %v3818_v37 = vadd.f32 %v2116_v57, %v1862_v56  ;;  %v1973_v13 = vpop.f32.mrf.mxu0  ;;  %v1947_v57 = vadd.f32 %v1946_v21, %v3713_v22 }
 0x297   : > { %v2118_v59 = vpop.f32.mrf.mxu1 }
 0x298   : > { %v1976_v10 = vpop.f32.mrf.mxu0 }
 0x299   : > { %v2121_v39 = vpop.f32.mrf.mxu1 }
 0x29a   : > { %v3820_v45 = vadd.f32 %v2121_v39, %v1867_v48  ;;  %v1978_v27 = vpop.f32.mrf.mxu0 }
 0x29b   : > { %v2123_v42 = vpop.f32.mrf.mxu1 }
 0x29c   : > { %v1981_v28 = vpop.f32.mrf.mxu0 }
 0x29d   : > { %v2126_v9 = vpop.f32.mrf.mxu1  ;;  %v1982_v6 = vadd.f32 %v1981_v28, %v3734_v0 }
 0x29e   : > { %v3822_v2 = vadd.f32 %v2126_v9, %v1872_v18  ;;  %v1983_v36 = vpop.f32.mrf.mxu0  ;;  %v1962_v18 = vadd.f32 %v1961_v5, %v3722_v31  ;;  %v1972_v9 = vadd.f32 %v1971_v54, %v3728_v12  ;;  %v1977_v12 = vadd.f32 %v1976_v10, %v3731_v20 }
 0x29f   : > { %v2128_v23 = vpop.f32.mrf.mxu1 }
 0x2a0   : > { %v1986_v24 = vpop.f32.mrf.mxu0  ;;  %v1967_v23 = vadd.f32 %v1966_v40, %v3725_v53 }
 0x2a1   : > { %v2131_v51 = vpop.f32.mrf.mxu1  ;;  %v1987_v0 = vadd.f32 %v1986_v24, %v3737_v34 }
 0x2a2   : > { %v3825_v30 = vadd.f32 %v2131_v51, %v1877_v15  ;;  %v1988_v56 = vpop.f32.mrf.mxu0 }
 0x2a3   : > { %v2133_v43 = vpop.f32.mrf.mxu1 }
 0x2a4   : > { %v1991_v41 = vpop.f32.mrf.mxu0 }
 0x2a5   : > { %v2659_v48 = vpop.f32.mrf.mxu1  ;;  %v1992_v53 = vadd.f32 %v1991_v41, %v3740_v33 }
 0x2a6   : > { %v2207_v13 = vadd.f32 %v2659_v48, %v1952_v47  ;;  %v1993_v59 = vpop.f32.mrf.mxu0 }
 0x2a7   : > { %v2201_v39 = vpop.f32.mrf.mxu1 }
 0x2a8   : > { %2391 = vst [vmem:[%s3830_s23 + $0x8] sm:$0xff] %v2207_v13  ;;  %v2202_v15 = vadd.f32 %v2201_v39, %v1947_v57  ;;  %v1996_v27 = vpop.f32.mrf.mxu0 }
 0x2a9   : > { %v2662_v42 = vpop.f32.mrf.mxu1  ;;  %v1997_v33 = vadd.f32 %v1996_v27, %v3743_v44 }
 0x2aa   : > { %2390 = vst [vmem:[%s3830_s23] sm:$0xff] %v2202_v15  ;;  %v2217_v22 = vadd.f32 %v2662_v42, %v1962_v18  ;;  %v1998_v21 = vpop.f32.mrf.mxu0 }
 0x2ab   : > { %v2211_v11 = vpop.f32.mrf.mxu1 }
 0x2ac   : > { %2393 = vst [vmem:[%s3830_s23 + $0x18] sm:$0xff] %v2217_v22  ;;  %v2212_v31 = vadd.f32 %v2211_v11, %v1957_v49  ;;  %v2001_v5 = vpop.f32.mrf.mxu0 }
 0x2ad   : > { %v2665_v36 = vpop.f32.mrf.mxu1  ;;  %v2002_v20 = vadd.f32 %v2001_v5, %v3746_v55 }
 0x2ae   : > { %2392 = vst [vmem:[%s3830_s23 + $0x10] sm:$0xff] %v2212_v31  ;;  %v2227_v51 = vadd.f32 %v2665_v36, %v1972_v9  ;;  %v2003_v56 = vpop.f32.mrf.mxu0 }
 0x2af   : > { %v2221_v43 = vpop.f32.mrf.mxu1 }
 0x2b0   : > { %2395 = vst [vmem:[%s3830_s23 + $0x28] sm:$0xff] %v2227_v51  ;;  %v2222_v29 = vadd.f32 %v2221_v43, %v1967_v23  ;;  %v2006_v47 = vpop.f32.mrf.mxu0 }
 0x2b1   : > { %v2668_v48 = vpop.f32.mrf.mxu1  ;;  %v2007_v55 = vadd.f32 %v2006_v47, %v3749_v3 }
 0x2b2   : > { %2394 = vst [vmem:[%s3830_s23 + $0x20] sm:$0xff] %v2222_v29  ;;  %v2237_v54 = vadd.f32 %v2668_v48, %v1982_v6  ;;  %v2008_v57 = vpop.f32.mrf.mxu0 }
 0x2b3   : > { %v2231_v13 = vpop.f32.mrf.mxu1 }
 0x2b4   : > { %2397 = vst [vmem:[%s3830_s23 + $0x38] sm:$0xff] %v2237_v54  ;;  %v2232_v40 = vadd.f32 %v2231_v13, %v1977_v12  ;;  %v2011_v59 = vpop.f32.mrf.mxu0 }
 0x2b5   : > { %v2671_v39 = vpop.f32.mrf.mxu1  ;;  %v2012_v34 = vadd.f32 %v2011_v59, %v3752_v14 }
 0x2b6   : > { %2396 = vst [vmem:[%s3830_s23 + $0x30] sm:$0xff] %v2232_v40  ;;  %v2247_v28 = vadd.f32 %v2671_v39, %v1992_v53  ;;  %v2013_v18 = vpop.f32.mrf.mxu0 }
 0x2b7   : > { %v2241_v15 = vpop.f32.mrf.mxu1 }
 0x2b8   : > { %2399 = vst [vmem:[%s3830_s23 + $0x48] sm:$0xff] %v2247_v28  ;;  %v2242_v10 = vadd.f32 %v2241_v15, %v1987_v0  ;;  %v2016_v42 = vpop.f32.mrf.mxu0 }
 0x2b9   : > { %v2674_v49 = vpop.f32.mrf.mxu1  ;;  %v2017_v14 = vadd.f32 %v2016_v42, %v3755_v26 }
 0x2ba   : > { %2398 = vst [vmem:[%s3830_s23 + $0x40] sm:$0xff] %v2242_v10  ;;  %v2257_v41 = vadd.f32 %v2674_v49, %v2002_v20  ;;  %v2018_v22 = vpop.f32.mrf.mxu0 }
 0x2bb   : > { %v2251_v21 = vpop.f32.mrf.mxu1 }
 0x2bc   : > { %2401 = vst [vmem:[%s3830_s23 + $0x58] sm:$0xff] %v2257_v41  ;;  %v2252_v24 = vadd.f32 %v2251_v21, %v1997_v33  ;;  %v2021_v11 = vpop.f32.mrf.mxu0 }
 0x2bd   : > { %v2677_v9 = vpop.f32.mrf.mxu1  ;;  %v2022_v44 = vadd.f32 %v2021_v11, %v3758_v38 }
 0x2be   : > { %2400 = vst [vmem:[%s3830_s23 + $0x50] sm:$0xff] %v2252_v24  ;;  %v2267_v31 = vadd.f32 %v2677_v9, %v2012_v34  ;;  %v2023_v5 = vpop.f32.mrf.mxu0 }
 0x2bf   : > { %v2261_v36 = vpop.f32.mrf.mxu1 }
 0x2c0   : > { %2403 = vst [vmem:[%s3830_s23 + $0x68] sm:$0xff] %v2267_v31  ;;  %v2262_v27 = vadd.f32 %v2261_v36, %v2007_v55  ;;  %v2026_v23 = vpop.f32.mrf.mxu0 }
 0x2c1   : > { %v2680_v51 = vpop.f32.mrf.mxu1  ;;  %v2027_v38 = vadd.f32 %v2026_v23, %v3761_v50 }
 0x2c2   : > { %2402 = vst [vmem:[%s3830_s23 + $0x60] sm:$0xff] %v2262_v27  ;;  %v2277_v56 = vadd.f32 %v2680_v51, %v2022_v44  ;;  %v2028_v43 = vpop.f32.mrf.mxu0 }
 0x2c3   : > { %v2271_v6 = vpop.f32.mrf.mxu1 }
 0x2c4   : > { %2405 = vst [vmem:[%s3830_s23 + $0x78] sm:$0xff] %v2277_v56  ;;  %v2272_v3 = vadd.f32 %v2271_v6, %v2017_v14  ;;  %v2031_v29 = vpop.f32.mrf.mxu0 }
 0x2c5   : > { %v2032_v47 = vadd.f32 %v2031_v29, %v3764_v17  ;;  %v2683_v48 = vpop.f32.mrf.mxu1 }
 0x2c6   : > { %2404 = vst [vmem:[%s3830_s23 + $0x70] sm:$0xff] %v2272_v3  ;;  %v2033_v12 = vpop.f32.mrf.mxu0 }
 0x2c7   : > { %v2287_v54 = vadd.f32 %v2683_v48, %v2032_v47  ;;  %v2281_v57 = vpop.f32.mrf.mxu1 }
 0x2c8   : > { %v2282_v26 = vadd.f32 %v2281_v57, %v2027_v38  ;;  %v2036_v13 = vpop.f32.mrf.mxu0 }
 0x2c9   : > { %2407 = vst [vmem:[%s3830_s23 + $0x88] sm:$0xff] %v2287_v54  ;;  %v2037_v53 = vadd.f32 %v2036_v13, %v3767_v32  ;;  %v2686_v40 = vpop.f32.mrf.mxu1 }
 0x2ca   : > { %2406 = vst [vmem:[%s3830_s23 + $0x80] sm:$0xff] %v2282_v26  ;;  %v2038_v59 = vpop.f32.mrf.mxu0 }
 0x2cb   : > { %v2291_v39 = vpop.f32.mrf.mxu1 }
 0x2cc   : > { %v2292_v0 = vadd.f32 %v2291_v39, %v2037_v53  ;;  %v2041_v17 = vpop.f32.mrf.mxu0 }
 0x2cd   : > { %v2042_v50 = vadd.f32 %v2041_v17, %v3770_v46  ;;  %v2689_v28 = vpop.f32.mrf.mxu1 }
 0x2ce   : > { %2408 = vst [vmem:[%s3830_s23 + $0x90] sm:$0xff] %v2292_v0  ;;  %v2043_v18 = vpop.f32.mrf.mxu0 }
 0x2cf   : > { %v2297_v15 = vadd.f32 %v2686_v40, %v2042_v50  ;;  %v2301_v20 = vpop.f32.mrf.mxu1 }
 0x2d0   : > { %v2046_v10 = vpop.f32.mrf.mxu0 }
 0x2d1   : > { %2409 = vst [vmem:[%s3830_s23 + $0x98] sm:$0xff] %v2297_v15  ;;  %v2047_v42 = vadd.f32 %v2046_v10, %v3773_v60  ;;  %v2692_v32 = vpop.f32.mrf.mxu1 }
 0x2d2   : > { %v2048_v49 = vpop.f32.mrf.mxu0 }
 0x2d3   : > { %v2302_v33 = vadd.f32 %v2301_v20, %v2047_v42  ;;  %v2311_v41 = vpop.f32.mrf.mxu1 }
 0x2d4   : > { %v2051_v22 = vpop.f32.mrf.mxu0 }
 0x2d5   : > { %2410 = vst [vmem:[%s3830_s23 + $0xa0] sm:$0xff] %v2302_v33  ;;  %v2052_v21 = vadd.f32 %v2051_v22, %v3776_v7  ;;  %v2695_v46 = vpop.f32.mrf.mxu1 }
 0x2d6   : > { %v2053_v34 = vpop.f32.mrf.mxu0 }
 0x2d7   : > { %v2307_v24 = vadd.f32 %v2689_v28, %v2052_v21  ;;  %v2321_v11 = vpop.f32.mrf.mxu1 }
 0x2d8   : > { %v2056_v9 = vpop.f32.mrf.mxu0 }
 0x2d9   : > { %2411 = vst [vmem:[%s3830_s23 + $0xa8] sm:$0xff] %v2307_v24  ;;  %v2057_v55 = vadd.f32 %v2056_v9, %v3779_v19  ;;  %v2698_v60 = vpop.f32.mrf.mxu1 }
 0x2da   : > { %v2058_v31 = vpop.f32.mrf.mxu0 }
 0x2db   : > { %v2312_v5 = vadd.f32 %v2311_v41, %v2057_v55  ;;  %v2331_v36 = vpop.f32.mrf.mxu1 }
 0x2dc   : > { %v2061_v44 = vpop.f32.mrf.mxu0 }
 0x2dd   : > { %2412 = vst [vmem:[%s3830_s23 + $0xb0] sm:$0xff] %v2312_v5  ;;  %v2062_v27 = vadd.f32 %v2061_v44, %v3782_v35  ;;  %v2701_v7 = vpop.f32.mrf.mxu1 }
 0x2de   : > { %v2347_v23 = vadd.f32 %v2701_v7, %v3808_v16  ;;  %v2063_v51 = vpop.f32.mrf.mxu0 }
 0x2df   : > { %v2317_v14 = vadd.f32 %v2692_v32, %v2062_v27  ;;  %v2341_v56 = vpop.f32.mrf.mxu1 }
 0x2e0   : > { %2419 = vst [vmem:[%s3830_s23 + $0xe8] sm:$0xff] %v2347_v23  ;;  %v2066_v43 = vpop.f32.mrf.mxu0 }
 0x2e1   : > { %2413 = vst [vmem:[%s3830_s23 + $0xb8] sm:$0xff] %v2317_v14  ;;  %v2067_v19 = vadd.f32 %v2066_v43, %v3785_v52  ;;  %v2704_v6 = vpop.f32.mrf.mxu1 }
 0x2e2   : > { %v2357_v3 = vadd.f32 %v2704_v6, %v3812_v4  ;;  %v2068_v29 = vpop.f32.mrf.mxu0 }
 0x2e3   : > { %v2322_v47 = vadd.f32 %v2321_v11, %v2067_v19  ;;  %v2351_v35 = vpop.f32.mrf.mxu1 }
 0x2e4   : > { %2421 = vst [vmem:[%s3830_s23 + $0xf8] sm:$0xff] %v2357_v3  ;;  %v2352_v16 = vadd.f32 %v2351_v35, %v3810_v8  ;;  %v2071_v48 = vpop.f32.mrf.mxu0 }
 0x2e5   : > { %2414 = vst [vmem:[%s3830_s23 + $0xc0] sm:$0xff] %v2322_v47  ;;  %v2072_v38 = vadd.f32 %v2071_v48, %v3788_v61  ;;  %v2707_v12 = vpop.f32.mrf.mxu1 }
 0x2e6   : > { %2420 = vst [vmem:[%s3830_s23 + $0xf0] sm:$0xff] %v2352_v16  ;;  %v2367_v52 = vadd.f32 %v2707_v12, %v3816_v63  ;;  %v2073_v54 = vpop.f32.mrf.mxu0 }
 0x2e7   : > { %v2327_v57 = vadd.f32 %v2695_v46, %v2072_v38  ;;  %v2361_v4 = vpop.f32.mrf.mxu1 }
 0x2e8   : > { %2423 = vst [vmem:[%s3830_s23 + $0x108] sm:$0xff] %v2367_v52  ;;  %v2362_v26 = vadd.f32 %v2361_v4, %v3814_v25  ;;  %v2076_v13 = vpop.f32.mrf.mxu0 }
 0x2e9   : > { %2415 = vst [vmem:[%s3830_s23 + $0xc8] sm:$0xff] %v2327_v57  ;;  %v2077_v8 = vadd.f32 %v2076_v13, %v3791_v1  ;;  %v2710_v53 = vpop.f32.mrf.mxu1 }
 0x2ea   : > { %2422 = vst [vmem:[%s3830_s23 + $0x100] sm:$0xff] %v2362_v26  ;;  %v2377_v61 = vadd.f32 %v2710_v53, %v3820_v45  ;;  %v2078_v40 = vpop.f32.mrf.mxu0 }
 0x2eb   : > { %v2332_v63 = vadd.f32 %v2331_v36, %v2077_v8  ;;  %v2371_v59 = vpop.f32.mrf.mxu1 }
 0x2ec   : > { %2425 = vst [vmem:[%s3830_s23 + $0x118] sm:$0xff] %v2377_v61  ;;  %v2372_v39 = vadd.f32 %v2371_v59, %v3818_v37  ;;  %v2081_v25 = vpop.f32.mrf.mxu0 }
 0x2ed   : > { %2416 = vst [vmem:[%s3830_s23 + $0xd0] sm:$0xff] %v2332_v63  ;;  %v2082_v0 = vadd.f32 %v2081_v25, %v3794_v62  ;;  %v2713_v1 = vpop.f32.mrf.mxu1 }
 0x2ee   : > { %2424 = vst [vmem:[%s3830_s23 + $0x110] sm:$0xff] %v2372_v39  ;;  %v2387_v17 = vadd.f32 %v2713_v1, %v3825_v30  ;;  %v2083_v45 = vpop.f32.mrf.mxu0 }
 0x2ef   : > { %v2337_v50 = vadd.f32 %v2698_v60, %v2082_v0  ;;  %v2381_v28 = vpop.f32.mrf.mxu1 }
 0x2f0   : > { %2427 = vst [vmem:[%s3830_s23 + $0x128] sm:$0xff] %v2387_v17  ;;  %v2382_v37 = vadd.f32 %v2381_v28, %v3822_v2  ;;  %v2086_v18 = vpop.f32.mrf.mxu0 }
 0x2f1   : > { %2417 = vst [vmem:[%s3830_s23 + $0xd8] sm:$0xff] %v2337_v50  ;;  %v2087_v15 = vadd.f32 %v2086_v18, %v3797_v58 }
 0x2f2   : > { %2426 = vst [vmem:[%s3830_s23 + $0x120] sm:$0xff] %v2382_v37  ;;  %v2088_v62 = vpop.f32.mrf.mxu0 }
 0x2f3   : > { %v2342_v30 = vadd.f32 %v2341_v56, %v2087_v15 }
 0x2f5   : > { %2418 = vst [vmem:[%s3830_s23 + $0xe0] sm:$0xff] %v2342_v30 }
 0x2f6   : > { %2964 = shalt.err (!%p2961_p6)
}
 0x2f7   : > { %s2965_s30 = scalar_lea.hbm %s3908_s4, 4864  ;;  %s2969_s21 = scalar_lea.hbm %s3963_s3, 9728 }
 0x2f8   : > { %p2966_p8 = scmp.ne.s32.totalorder %s3908_s4, %s2965_s30  ;;  %p2970_p11 = scmp.lt.s32.totalorder %s3908_s4, %s3963_s3 }
 0x2f9   : > { %p2971_p5 = scmp.lt.s32.totalorder %s2969_s21, %s2965_s30 }
 0x2fa   : > { %p2967_p13 = pnand %p2966_p8, %p3976_p10 }
 0x2fb   : > { %p2972_p12 = por %p2971_p5, %p2970_p11 }
 0x2fc   : > { %p2968_p9 = pneg %p2967_p13 }
 0x2fe   : > { %p2973_p7 = pnand %p2972_p12, %p2968_p9 }
 0x300   : > { %2976 = shalt.err (!%p2973_p7)
}
 0x301   : > { %s3047_s23 = smov 128   ;;  %s3048_s27 = smov 256  }
 0x302   : > { %s3049_s11 = smov 8  }
 0x303   : > { %2789 = dma.vmem_to_hbm [thread:$0]  (%p3976_p10), %s3911_s7, 4864, %s3908_s4, %s2429_s15, %s3047_s23, %s3048_s27, %s3049_s11  }
 0x304 PF: > { %s2459_s28 = sand.u32 1, %s3015_s12   ;;  %p3977_p2 = scmp.ne.s32.totalorder %s3970_s26, 0 }
 0x305   : > { %p3978_p1 = scmp.ge.s32.totalorder %s3035_s17, 2  ;;  %s2460_s6 = scalar_lea.sflag [#allocation4], %s2459_s28 }
 0x307   : > { %p2803_p0 = pnand %p3978_p1, %p3977_p2 }
 0x309   : > { %p2804_p3 = pneg %p2803_p0 }
 0x30b   : > { %3010 = dma.done.wait (%p2804_p3), %s2460_s6, 4864  }
 0x30c   : > { %3012 = vsyncadd (%p2804_p3), %s2460_s6, 4294962432  ;;  %s20_s17 = sadd.s32 1, %s3035_s17   ;;  %s3979_s12 = smov %s3019_s13 }
 0x30d   : > { %p17_p4 = scmp.ge.s32.totalorder %s20_s17, 4   ;;  %s3980_s13 = smov %s3023_s14 }
 0x30e   : > { %s3981_s14 = smov %s3118_s24  ;;  %s3982_s15 = smov %s3031_s16 }
 0x30f   : > { %s3983_s16 = smov %s3985_s18  ;;  %19 = sbr.rel (!%p17_p4) target bundleno = 7 (0x7), region = 94 }
 0x314   :  { %2465 = vsyncpa [#allocation3], 1 }
 0x315   :  { %2467 = vsyncpa [#allocation3 + $0x1], 1 }
 0x316   :  { %2468 = vsyncpa [#allocation6], 1 }
 0x317   :  { %2470 = vsyncpa [#allocation6 + $0x1], 1 }
 0x318   :  { %2471 = vsyncpa [#allocation4], 1 }
 0x319   :  { %2473 = vsyncpa [#allocation4 + $0x1], 1 }

</bundles_post_ra>
